<compile_context>
chip_gen: v7x
topology: tpu7x:2x2x1
jax: 0.10.0
libtpu: 0.0.40
codegen_flags: <defaults>
</compile_context>

<pallas_src>
import functools
import math

import jax
import jax.numpy as jnp
from jax import lax
from jax.experimental import pallas as pl
from jax.experimental.pallas import tpu as pltpu

LANE = 128
BN_EPS = 1e-5


def _ceil_to(n, m):
    return ((n + m - 1) // m) * m


# ----------------------------- Pallas kernels ------------------------------


def _conv_stats_kernel(x_ref, m_ref, b_ref, s_ref, y_ref, st_ref, *, kh, ho):
    """Fused-im2col valid conv + bias for one image; accumulates BN batch stats.

    x_ref : (1, Hi, CWi)   input slab, lanes = (cin, w), w fastest
    m_ref : (kh, CWi, CWo) banded weight matrices (one per kernel row)
    b_ref : (1, CWo)       bias broadcast to the (cout, wo) lane layout
    s_ref : (CWo, Cout)    per-channel column-sum selector
    y_ref : (1, ho, CWo)   conv + bias output (pre-BN / pre-ReLU)
    st_ref: (2, Cout)      [sum; sum of squares], accumulated over the batch grid
    """
    acc = jnp.dot(x_ref[0, 0:ho, :], m_ref[0],
                  preferred_element_type=jnp.float32)
    for di in range(1, kh):
        acc = acc + jnp.dot(x_ref[0, di:di + ho, :], m_ref[di],
                            preferred_element_type=jnp.float32)
    acc = acc + b_ref[...]
    y_ref[0] = acc

    col = jnp.concatenate(
        [jnp.sum(acc, axis=0, keepdims=True),
         jnp.sum(acc * acc, axis=0, keepdims=True)], axis=0)        # (2, CWo)
    stats = jnp.dot(col, s_ref[...], preferred_element_type=jnp.float32)

    @pl.when(pl.program_id(0) == 0)
    def _():
        st_ref[...] = jnp.zeros_like(st_ref)

    st_ref[...] += stats


def _bn_relu_pool_kernel(y_ref, st_ref, stt_ref, gb_ref, q_ref, p_ref, o_ref,
                         *, count):
    """Training-mode BatchNorm + ReLU + 2x2 stride-2 max-pool for one image.

    y_ref  : (1, Ho, CWo)   conv + bias output
    st_ref : (2, Cout)      batch [sum; sum of squares]
    stt_ref: (Cout, CWo)    channel -> lane broadcast selector (S^T)
    gb_ref : (2, CWo)       [gamma; beta] pre-broadcast to the lane layout
    q_ref  : (2, CWo, CWp)  even/odd lane (w) pooling selectors
    p_ref  : (2, Hp, Ho)    even/odd row (h) pooling selectors
    o_ref  : (1, Hp, CWp)   pooled output
    """
    inv_n = 1.0 / count
    mean_c = st_ref[0:1, :] * inv_n                                  # (1, Cout)
    var_c = st_ref[1:2, :] * inv_n - mean_c * mean_c                 # biased var
    rstd_c = lax.rsqrt(var_c + BN_EPS)
    mean_l = jnp.dot(mean_c, stt_ref[...], preferred_element_type=jnp.float32)
    rstd_l = jnp.dot(rstd_c, stt_ref[...], preferred_element_type=jnp.float32)
    scale = rstd_l * gb_ref[0:1, :]
    shift = gb_ref[1:2, :] - mean_l * scale
    z = jnp.maximum(y_ref[0] * scale + shift, 0.0)                   # BN + ReLU
    m_w = jnp.maximum(
        jnp.dot(z, q_ref[0], preferred_element_type=jnp.float32),
        jnp.dot(z, q_ref[1], preferred_element_type=jnp.float32))    # pool over w
    o_ref[0] = jnp.maximum(
        jnp.dot(p_ref[0], m_w, preferred_element_type=jnp.float32),
        jnp.dot(p_ref[1], m_w, preferred_element_type=jnp.float32))  # pool over h


# ------------------------- constants / layer wrapper ------------------------


def _layer_constants(weight, bias, gamma, beta, wi, cwi_pad):
    """Constant matrices for one fused conv + BN + ReLU + pool layer.

    Activation layout per image: a (H, cwi_pad) slab whose lane index is
    ci*wi + w (w fastest) for the first Cin*wi lanes, zero padding after.
    """
    cout, cin, kh, kw = weight.shape
    wo = wi - kw + 1                       # = ho (square activations in LeNet)
    wp = wo // 2
    cwo, cwp = cout * wo, cout * wp
    cwo_pad, cwp_pad = _ceil_to(cwo, LANE), _ceil_to(cwp, LANE)
    w32 = weight.astype(jnp.float32)

    # Banded (Toeplitz) weight matrices: one (Cin*Wi, Cout*Wo) matrix per
    # kernel row di, with M[di][ci*Wi + wo_ + kj, co*Wo + wo_] = W[co,ci,di,kj].
    mats = []
    for di in range(kh):
        m_di = jnp.zeros((cin * wi, cwo), jnp.float32)
        for kj in range(kw):
            band = jnp.eye(wi, wo, k=-kj, dtype=jnp.float32)         # (Wi, Wo)
            m_di = m_di + jnp.kron(w32[:, :, di, kj].T, band)
        mats.append(m_di)
    m = jnp.pad(jnp.stack(mats, axis=0),
                ((0, 0), (0, cwi_pad - cin * wi), (0, cwo_pad - cwo)))

    bias_l = jnp.pad(jnp.repeat(bias.astype(jnp.float32), wo)[None, :],
                     ((0, 0), (0, cwo_pad - cwo)))                   # (1, CWo)

    s = jnp.pad(jnp.kron(jnp.eye(cout, dtype=jnp.float32),
                         jnp.ones((wo, 1), jnp.float32)),
                ((0, cwo_pad - cwo), (0, 0)))                        # (CWo, Cout)
    s_t = jnp.transpose(s)                                           # (Cout, CWo)

    gb = jnp.pad(jnp.stack([jnp.repeat(gamma.astype(jnp.float32), wo),
                            jnp.repeat(beta.astype(jnp.float32), wo)], axis=0),
                 ((0, 0), (0, cwo_pad - cwo)))                       # (2, CWo)

    eye_w = jnp.eye(wo, dtype=jnp.float32)
    q = jnp.pad(jnp.stack(
        [jnp.kron(jnp.eye(cout, dtype=jnp.float32), eye_w[:, 0::2]),
         jnp.kron(jnp.eye(cout, dtype=jnp.float32), eye_w[:, 1::2])], axis=0),
        ((0, 0), (0, cwo_pad - cwo), (0, cwp_pad - cwp)))            # (2,CWo,CWp)

    p = jnp.stack([eye_w[0::2, :], eye_w[1::2, :]], axis=0)          # (2, Hp, Ho)

    dims = dict(kh=kh, cout=cout, ho=wo, wo=wo, hp=wp,
                cwo_pad=cwo_pad, cwp_pad=cwp_pad)
    return dict(m=m, bias=bias_l, s=s, s_t=s_t, gb=gb, q=q, p=p, dims=dims)


def fused_conv_bn_relu_pool(x, consts):
    """One LeNet_BN feature layer on (B, Hi, CWi) activation slabs."""
    d = consts["dims"]
    batch, hi, cwi = x.shape
    kh, ho, hp = d["kh"], d["ho"], d["hp"]
    cwo, cwp, cout = d["cwo_pad"], d["cwp_pad"], d["cout"]

    y, st = pl.pallas_call(
        functools.partial(_conv_stats_kernel, kh=kh, ho=ho),
        out_shape=(jax.ShapeDtypeStruct((batch, ho, cwo), jnp.float32),
                   jax.ShapeDtypeStruct((2, cout), jnp.float32)),
        grid=(batch,),
        in_specs=[
            pl.BlockSpec((1, hi, cwi), lambda b: (b, 0, 0)),
            pl.BlockSpec(consts["m"].shape, lambda b: (0, 0, 0)),
            pl.BlockSpec(consts["bias"].shape, lambda b: (0, 0)),
            pl.BlockSpec(consts["s"].shape, lambda b: (0, 0)),
        ],
        out_specs=(pl.BlockSpec((1, ho, cwo), lambda b: (b, 0, 0)),
                   pl.BlockSpec((2, cout), lambda b: (0, 0))),
        compiler_params=pltpu.CompilerParams(
            dimension_semantics=("arbitrary",)),   # stats accumulate over batch
    )(x, consts["m"], consts["bias"], consts["s"])

    out = pl.pallas_call(
        functools.partial(_bn_relu_pool_kernel,
                          count=float(batch * ho * d["wo"])),
        out_shape=jax.ShapeDtypeStruct((batch, hp, cwp), jnp.float32),
        grid=(batch,),
        in_specs=[
            pl.BlockSpec((1, ho, cwo), lambda b: (b, 0, 0)),
            pl.BlockSpec((2, cout), lambda b: (0, 0)),
            pl.BlockSpec(consts["s_t"].shape, lambda b: (0, 0)),
            pl.BlockSpec(consts["gb"].shape, lambda b: (0, 0)),
            pl.BlockSpec(consts["q"].shape, lambda b: (0, 0, 0)),
            pl.BlockSpec(consts["p"].shape, lambda b: (0, 0, 0)),
        ],
        out_specs=pl.BlockSpec((1, hp, cwp), lambda b: (b, 0, 0)),
        compiler_params=pltpu.CompilerParams(
            dimension_semantics=("parallel",)),
    )(y, st, consts["s_t"], consts["gb"], consts["q"], consts["p"])
    return out


# ------------------------------- forward ------------------------------------


def lenet_bn_forward(params, img):
    """Matches LeNet_BN.forward: view (B,3,32,32) -> features -> flatten."""
    b = img.shape[0]
    x = img.reshape(b, 3, 32, 32).astype(jnp.float32)
    # NCHW -> per-image (H, Cin*W) slabs, w fastest on the lane axis.
    x = jnp.transpose(x, (0, 2, 1, 3)).reshape(b, 32, 3 * 32)

    c1 = _layer_constants(params["conv1"]["weight"], params["conv1"]["bias"],
                          params["bn1"]["gamma"], params["bn1"]["beta"],
                          wi=32, cwi_pad=x.shape[2])
    x = fused_conv_bn_relu_pool(x, c1)          # (B, 14, 128), 6*14=84 valid

    c2 = _layer_constants(params["conv2"]["weight"], params["conv2"]["bias"],
                          params["bn2"]["gamma"], params["bn2"]["beta"],
                          wi=14, cwi_pad=x.shape[2])
    x = fused_conv_bn_relu_pool(x, c2)          # (B, 5, 128), 16*5=80 valid

    # torch.flatten(NCHW features, 1): (c, h, w) order, c slowest.
    feat = x[:, :, :16 * 5].reshape(b, 5, 16, 5)
    return jnp.transpose(feat, (0, 2, 1, 3)).reshape(b, 16 * 5 * 5)
    # TODO(synk): the classifier Sequential is defined in the PyTorch module
    # but never applied in its forward(), so it is not implemented here.


def init_params(key):
    # in_channels=3 (the module's forward views the input as 3x32x32).
    def conv_init(k, cout, cin, ksz):
        stdv = 1.0 / math.sqrt(cin * ksz * ksz)
        kw_, kb_ = jax.random.split(k)
        return dict(
            weight=jax.random.uniform(kw_, (cout, cin, ksz, ksz), jnp.float32,
                                      -stdv, stdv),
            bias=jax.random.uniform(kb_, (cout,), jnp.float32, -stdv, stdv))

    k1, k2 = jax.random.split(key)
    return {
        "conv1": conv_init(k1, 6, 3, 5),
        "bn1": dict(gamma=jnp.ones((6,), jnp.float32),
                    beta=jnp.zeros((6,), jnp.float32)),
        "conv2": conv_init(k2, 16, 6, 5),
        "bn2": dict(gamma=jnp.ones((16,), jnp.float32),
                    beta=jnp.zeros((16,), jnp.float32)),
    }


def reference_forward(params, img):
    """Pure-JAX (XLA) reference of the same forward, for a numeric check."""
    b = img.shape[0]
    x = img.reshape(b, 3, 32, 32).astype(jnp.float32)
    for i in (1, 2):
        w = params[f"conv{i}"]["weight"]
        x = lax.conv_general_dilated(
            x, w, (1, 1), "VALID",
            dimension_numbers=("NCHW", "OIHW", "NCHW"),
            precision=lax.Precision.HIGHEST)
        x = x + params[f"conv{i}"]["bias"][None, :, None, None]
        mean = jnp.mean(x, axis=(0, 2, 3), keepdims=True)
        var = jnp.mean(jnp.square(x - mean), axis=(0, 2, 3), keepdims=True)
        x = (x - mean) * lax.rsqrt(var + BN_EPS)
        x = (x * params[f"bn{i}"]["gamma"][None, :, None, None]
             + params[f"bn{i}"]["beta"][None, :, None, None])
        x = jnp.maximum(x, 0.0)
        x = lax.reduce_window(x, -jnp.inf, lax.max,
                              (1, 1, 2, 2), (1, 1, 2, 2), "VALID")
    return x.reshape(b, -1)


# --------------------------------- main --------------------------------------

if __name__ == "__main__":
    key = jax.random.PRNGKey(0)
    kp, kx = jax.random.split(key)
    params = init_params(kp)
    img = jax.random.normal(kx, (2, 3, 32, 32), jnp.float32)

    fwd = jax.jit(lenet_bn_forward)
    out = jax.block_until_ready(fwd(params, img))
    assert out.shape == (2, 16 * 5 * 5), out.shape
    assert bool(jnp.all(jnp.isfinite(out)))

    ref = reference_forward(params, img)
    assert jnp.allclose(out, ref, atol=5e-2, rtol=5e-2), (
        "max abs diff = %f" % float(jnp.max(jnp.abs(out - ref))))
    print("KERNEL_OK")
</pallas_src>

<mosaic_0001>
module attributes {stable_mosaic.version = 11 : i64} {
  func.func @_conv_stats_kernel(%arg0: i32, %arg1: memref<1x32x96xf32, #tpu.memory_space<vmem>>, %arg2: memref<5x96x256xf32, #tpu.memory_space<vmem>>, %arg3: memref<1x256xf32, #tpu.memory_space<vmem>>, %arg4: memref<256x6xf32, #tpu.memory_space<vmem>>, %arg5: memref<1x28x256xf32, #tpu.memory_space<vmem>>, %arg6: memref<2x6xf32, #tpu.memory_space<vmem>>) attributes {dimension_semantics = [#tpu.dimension_semantics<arbitrary>], iteration_bounds = array<i64: 2>, scalar_prefetch = 0 : i64, scratch_operands = 0 : i64, tpu.core_type = #tpu.core_type<tc>, window_params = [{transform_indices = @transform_0, window_bounds = array<i64: 1, 32, 96>}, {pipeline_mode = #tpu.pipeline_mode<synchronous>, transform_indices = @transform_1, window_bounds = array<i64: 5, 96, 256>}, {pipeline_mode = #tpu.pipeline_mode<synchronous>, transform_indices = @transform_2, window_bounds = array<i64: 1, 256>}, {pipeline_mode = #tpu.pipeline_mode<synchronous>, transform_indices = @transform_3, window_bounds = array<i64: 256, 6>}, {transform_indices = @transform_4, window_bounds = array<i64: 1, 28, 256>}, {pipeline_mode = #tpu.pipeline_mode<synchronous>, transform_indices = @transform_5, window_bounds = array<i64: 2, 6>}]} {
    %c0 = arith.constant 0 : index
    %c0_0 = arith.constant 0 : index
    %c0_1 = arith.constant 0 : index
    %0 = vector.load %arg1[%c0, %c0_0, %c0_1] : memref<1x32x96xf32, #tpu.memory_space<vmem>>, vector<1x28x96xf32>
    %1 = vector.shape_cast %0 : vector<1x28x96xf32> to vector<28x96xf32>
    %c0_2 = arith.constant 0 : index
    %c0_3 = arith.constant 0 : index
    %c0_4 = arith.constant 0 : index
    %2 = vector.load %arg2[%c0_2, %c0_3, %c0_4] : memref<5x96x256xf32, #tpu.memory_space<vmem>>, vector<1x96x256xf32>
    %3 = vector.shape_cast %2 : vector<1x96x256xf32> to vector<96x256xf32>
    %cst = arith.constant dense<0.000000e+00> : vector<28x256xf32>
    %4 = tpu.matmul %1, %3, %cst {dimension_numbers = #tpu.dot_dimension_numbers<[1], [0], [0], [1], [0, 0, 1, 1], [], []>} : vector<28x96xf32>, vector<96x256xf32>, vector<28x256xf32> -> vector<28x256xf32>
    %c0_5 = arith.constant 0 : index
    %c1 = arith.constant 1 : index
    %c0_6 = arith.constant 0 : index
    %5 = vector.load %arg1[%c0_5, %c1, %c0_6] : memref<1x32x96xf32, #tpu.memory_space<vmem>>, vector<1x28x96xf32>
    %6 = vector.shape_cast %5 : vector<1x28x96xf32> to vector<28x96xf32>
    %c1_7 = arith.constant 1 : index
    %c0_8 = arith.constant 0 : index
    %c0_9 = arith.constant 0 : index
    %7 = vector.load %arg2[%c1_7, %c0_8, %c0_9] : memref<5x96x256xf32, #tpu.memory_space<vmem>>, vector<1x96x256xf32>
    %8 = vector.shape_cast %7 : vector<1x96x256xf32> to vector<96x256xf32>
    %cst_10 = arith.constant dense<0.000000e+00> : vector<28x256xf32>
    %9 = tpu.matmul %6, %8, %cst_10 {dimension_numbers = #tpu.dot_dimension_numbers<[1], [0], [0], [1], [0, 0, 1, 1], [], []>} : vector<28x96xf32>, vector<96x256xf32>, vector<28x256xf32> -> vector<28x256xf32>
    %10 = arith.addf %4, %9 : vector<28x256xf32>
    %c0_11 = arith.constant 0 : index
    %c2 = arith.constant 2 : index
    %c0_12 = arith.constant 0 : index
    %11 = vector.load %arg1[%c0_11, %c2, %c0_12] : memref<1x32x96xf32, #tpu.memory_space<vmem>>, vector<1x28x96xf32>
    %12 = vector.shape_cast %11 : vector<1x28x96xf32> to vector<28x96xf32>
    %c2_13 = arith.constant 2 : index
    %c0_14 = arith.constant 0 : index
    %c0_15 = arith.constant 0 : index
    %13 = vector.load %arg2[%c2_13, %c0_14, %c0_15] : memref<5x96x256xf32, #tpu.memory_space<vmem>>, vector<1x96x256xf32>
    %14 = vector.shape_cast %13 : vector<1x96x256xf32> to vector<96x256xf32>
    %cst_16 = arith.constant dense<0.000000e+00> : vector<28x256xf32>
    %15 = tpu.matmul %12, %14, %cst_16 {dimension_numbers = #tpu.dot_dimension_numbers<[1], [0], [0], [1], [0, 0, 1, 1], [], []>} : vector<28x96xf32>, vector<96x256xf32>, vector<28x256xf32> -> vector<28x256xf32>
    %16 = arith.addf %10, %15 : vector<28x256xf32>
    %c0_17 = arith.constant 0 : index
    %c3 = arith.constant 3 : index
    %c0_18 = arith.constant 0 : index
    %17 = vector.load %arg1[%c0_17, %c3, %c0_18] : memref<1x32x96xf32, #tpu.memory_space<vmem>>, vector<1x28x96xf32>
    %18 = vector.shape_cast %17 : vector<1x28x96xf32> to vector<28x96xf32>
    %c3_19 = arith.constant 3 : index
    %c0_20 = arith.constant 0 : index
    %c0_21 = arith.constant 0 : index
    %19 = vector.load %arg2[%c3_19, %c0_20, %c0_21] : memref<5x96x256xf32, #tpu.memory_space<vmem>>, vector<1x96x256xf32>
    %20 = vector.shape_cast %19 : vector<1x96x256xf32> to vector<96x256xf32>
    %cst_22 = arith.constant dense<0.000000e+00> : vector<28x256xf32>
    %21 = tpu.matmul %18, %20, %cst_22 {dimension_numbers = #tpu.dot_dimension_numbers<[1], [0], [0], [1], [0, 0, 1, 1], [], []>} : vector<28x96xf32>, vector<96x256xf32>, vector<28x256xf32> -> vector<28x256xf32>
    %22 = arith.addf %16, %21 : vector<28x256xf32>
    %c0_23 = arith.constant 0 : index
    %c4 = arith.constant 4 : index
    %c0_24 = arith.constant 0 : index
    %23 = vector.load %arg1[%c0_23, %c4, %c0_24] : memref<1x32x96xf32, #tpu.memory_space<vmem>>, vector<1x28x96xf32>
    %24 = vector.shape_cast %23 : vector<1x28x96xf32> to vector<28x96xf32>
    %c4_25 = arith.constant 4 : index
    %c0_26 = arith.constant 0 : index
    %c0_27 = arith.constant 0 : index
    %25 = vector.load %arg2[%c4_25, %c0_26, %c0_27] : memref<5x96x256xf32, #tpu.memory_space<vmem>>, vector<1x96x256xf32>
    %26 = vector.shape_cast %25 : vector<1x96x256xf32> to vector<96x256xf32>
    %cst_28 = arith.constant dense<0.000000e+00> : vector<28x256xf32>
    %27 = tpu.matmul %24, %26, %cst_28 {dimension_numbers = #tpu.dot_dimension_numbers<[1], [0], [0], [1], [0, 0, 1, 1], [], []>} : vector<28x96xf32>, vector<96x256xf32>, vector<28x256xf32> -> vector<28x256xf32>
    %28 = arith.addf %22, %27 : vector<28x256xf32>
    %c0_29 = arith.constant 0 : index
    %c0_30 = arith.constant 0 : index
    %29 = vector.load %arg3[%c0_29, %c0_30] : memref<1x256xf32, #tpu.memory_space<vmem>>, vector<1x256xf32>
    %30 = vector.broadcast %29 : vector<1x256xf32> to vector<28x256xf32>
    %31 = arith.addf %28, %30 : vector<28x256xf32>
    %c0_31 = arith.constant 0 : index
    %c0_32 = arith.constant 0 : index
    %c0_33 = arith.constant 0 : index
    %32 = vector.load %arg5[%c0_31, %c0_32, %c0_33] : memref<1x28x256xf32, #tpu.memory_space<vmem>>, vector<1x28x256xf32>
    %33 = vector.shape_cast %32 : vector<1x28x256xf32> to vector<28x256xf32>
    %34 = vector.shape_cast %31 : vector<28x256xf32> to vector<1x28x256xf32>
    tpu.vector_store %arg5[%c0_31, %c0_32, %c0_33], %34 {strides = array<i32>} : memref<1x28x256xf32, #tpu.memory_space<vmem>>, vector<1x28x256xf32>,
    %cst_34 = arith.constant dense<0.000000e+00> : vector<256xf32>
    %35 = vector.multi_reduction <add>, %31, %cst_34 [0] : vector<28x256xf32> to vector<256xf32>
    %36 = vector.shape_cast %35 : vector<256xf32> to vector<1x256xf32>
    %37 = arith.mulf %31, %31 : vector<28x256xf32>
    %cst_35 = arith.constant dense<0.000000e+00> : vector<256xf32>
    %38 = vector.multi_reduction <add>, %37, %cst_35 [0] : vector<28x256xf32> to vector<256xf32>
    %39 = vector.shape_cast %38 : vector<256xf32> to vector<1x256xf32>
    %40 = tpu.concatenate %36, %39 in 0 : vector<1x256xf32>, vector<1x256xf32> -> vector<2x256xf32>
    %c0_36 = arith.constant 0 : index
    %c0_37 = arith.constant 0 : index
    %41 = vector.load %arg4[%c0_36, %c0_37] : memref<256x6xf32, #tpu.memory_space<vmem>>, vector<256x6xf32>
    %cst_38 = arith.constant dense<0.000000e+00> : vector<2x6xf32>
    %42 = tpu.matmul %40, %41, %cst_38 {dimension_numbers = #tpu.dot_dimension_numbers<[1], [0], [0], [1], [0, 0, 1, 1], [], []>} : vector<2x256xf32>, vector<256x6xf32>, vector<2x6xf32> -> vector<2x6xf32>
    %c0_i32 = arith.constant 0 : i32
    %43 = arith.cmpi eq, %arg0, %c0_i32 : i32
    %44 = arith.extui %43 : i1 to i32
    %c0_i32_39 = arith.constant 0 : i32
    %45 = arith.cmpi ne, %44, %c0_i32_39 : i32
    scf.if %45 {
      %cst_44 = arith.constant 0.000000e+00 : f32
      %49 = vector.broadcast %cst_44 : f32 to vector<2x6xf32>
      %c0_45 = arith.constant 0 : index
      %c0_46 = arith.constant 0 : index
      %50 = vector.load %arg6[%c0_45, %c0_46] : memref<2x6xf32, #tpu.memory_space<vmem>>, vector<2x6xf32>
      tpu.vector_store %arg6[%c0_45, %c0_46], %49 {strides = array<i32>} : memref<2x6xf32, #tpu.memory_space<vmem>>, vector<2x6xf32>,
    } else {
    }
    %c0_40 = arith.constant 0 : index
    %c0_41 = arith.constant 0 : index
    %46 = vector.load %arg6[%c0_40, %c0_41] : memref<2x6xf32, #tpu.memory_space<vmem>>, vector<2x6xf32>
    %47 = arith.addf %46, %42 : vector<2x6xf32>
    %c0_42 = arith.constant 0 : index
    %c0_43 = arith.constant 0 : index
    %48 = vector.load %arg6[%c0_42, %c0_43] : memref<2x6xf32, #tpu.memory_space<vmem>>, vector<2x6xf32>
    tpu.vector_store %arg6[%c0_42, %c0_43], %47 {strides = array<i32>} : memref<2x6xf32, #tpu.memory_space<vmem>>, vector<2x6xf32>,
    return
  }
  func.func @transform_0(%arg0: i32) -> (i32, i32, i32) {
    %c0_i32 = arith.constant 0 : i32
    %c0_i32_0 = arith.constant 0 : i32
    %c0_i32_1 = arith.constant 0 : i32
    return %arg0, %c0_i32, %c0_i32_0 : i32, i32, i32
  }
  func.func @transform_1(%arg0: i32) -> (i32, i32, i32) {
    %c0_i32 = arith.constant 0 : i32
    %c0_i32_0 = arith.constant 0 : i32
    %c0_i32_1 = arith.constant 0 : i32
    %c0_i32_2 = arith.constant 0 : i32
    return %c0_i32, %c0_i32_0, %c0_i32_1 : i32, i32, i32
  }
  func.func @transform_2(%arg0: i32) -> (i32, i32) {
    %c0_i32 = arith.constant 0 : i32
    %c0_i32_0 = arith.constant 0 : i32
    %c0_i32_1 = arith.constant 0 : i32
    return %c0_i32, %c0_i32_0 : i32, i32
  }
  func.func @transform_3(%arg0: i32) -> (i32, i32) {
    %c0_i32 = arith.constant 0 : i32
    %c0_i32_0 = arith.constant 0 : i32
    %c0_i32_1 = arith.constant 0 : i32
    return %c0_i32, %c0_i32_0 : i32, i32
  }
  func.func @transform_4(%arg0: i32) -> (i32, i32, i32) {
    %c0_i32 = arith.constant 0 : i32
    %c0_i32_0 = arith.constant 0 : i32
    %c0_i32_1 = arith.constant 0 : i32
    return %arg0, %c0_i32, %c0_i32_0 : i32, i32, i32
  }
  func.func @transform_5(%arg0: i32) -> (i32, i32) {
    %c0_i32 = arith.constant 0 : i32
    %c0_i32_0 = arith.constant 0 : i32
    %c0_i32_1 = arith.constant 0 : i32
    return %c0_i32, %c0_i32_0 : i32, i32
  }
}

module attributes {stable_mosaic.version = 11 : i64} {
  func.func @_bn_relu_pool_kernel(%arg0: i32, %arg1: memref<1x28x256xf32, #tpu.memory_space<vmem>>, %arg2: memref<2x6xf32, #tpu.memory_space<vmem>>, %arg3: memref<6x256xf32, #tpu.memory_space<vmem>>, %arg4: memref<2x256xf32, #tpu.memory_space<vmem>>, %arg5: memref<2x256x128xf32, #tpu.memory_space<vmem>>, %arg6: memref<2x14x28xf32, #tpu.memory_space<vmem>>, %arg7: memref<1x14x128xf32, #tpu.memory_space<vmem>>) attributes {dimension_semantics = [#tpu.dimension_semantics<parallel>], iteration_bounds = array<i64: 2>, scalar_prefetch = 0 : i64, scratch_operands = 0 : i64, tpu.core_type = #tpu.core_type<tc>, window_params = [{transform_indices = @transform_0, window_bounds = array<i64: 1, 28, 256>}, {pipeline_mode = #tpu.pipeline_mode<synchronous>, transform_indices = @transform_1, window_bounds = array<i64: 2, 6>}, {pipeline_mode = #tpu.pipeline_mode<synchronous>, transform_indices = @transform_2, window_bounds = array<i64: 6, 256>}, {pipeline_mode = #tpu.pipeline_mode<synchronous>, transform_indices = @transform_3, window_bounds = array<i64: 2, 256>}, {pipeline_mode = #tpu.pipeline_mode<synchronous>, transform_indices = @transform_4, window_bounds = array<i64: 2, 256, 128>}, {pipeline_mode = #tpu.pipeline_mode<synchronous>, transform_indices = @transform_5, window_bounds = array<i64: 2, 14, 28>}, {transform_indices = @transform_6, window_bounds = array<i64: 1, 14, 128>}]} {
    %c0 = arith.constant 0 : index
    %c0_0 = arith.constant 0 : index
    %0 = vector.load %arg2[%c0, %c0_0] : memref<2x6xf32, #tpu.memory_space<vmem>>, vector<1x6xf32>
    %cst = arith.constant 6.37755089E-4 : f32
    %1 = vector.broadcast %cst : f32 to vector<1x6xf32>
    %2 = arith.mulf %0, %1 : vector<1x6xf32>
    %c1 = arith.constant 1 : index
    %c0_1 = arith.constant 0 : index
    %3 = vector.load %arg2[%c1, %c0_1] : memref<2x6xf32, #tpu.memory_space<vmem>>, vector<1x6xf32>
    %cst_2 = arith.constant 6.37755089E-4 : f32
    %4 = vector.broadcast %cst_2 : f32 to vector<1x6xf32>
    %5 = arith.mulf %3, %4 : vector<1x6xf32>
    %6 = arith.mulf %2, %2 : vector<1x6xf32>
    %7 = arith.subf %5, %6 : vector<1x6xf32>
    %cst_3 = arith.constant 9.99999974E-6 : f32
    %8 = vector.broadcast %cst_3 : f32 to vector<1x6xf32>
    %9 = arith.addf %7, %8 : vector<1x6xf32>
    %10 = math.rsqrt %9 : vector<1x6xf32>
    %c0_4 = arith.constant 0 : index
    %c0_5 = arith.constant 0 : index
    %11 = vector.load %arg3[%c0_4, %c0_5] : memref<6x256xf32, #tpu.memory_space<vmem>>, vector<6x256xf32>
    %cst_6 = arith.constant dense<0.000000e+00> : vector<1x256xf32>
    %12 = tpu.matmul %2, %11, %cst_6 {dimension_numbers = #tpu.dot_dimension_numbers<[1], [0], [0], [1], [0, 0, 1, 1], [], []>} : vector<1x6xf32>, vector<6x256xf32>, vector<1x256xf32> -> vector<1x256xf32>
    %c0_7 = arith.constant 0 : index
    %c0_8 = arith.constant 0 : index
    %13 = vector.load %arg3[%c0_7, %c0_8] : memref<6x256xf32, #tpu.memory_space<vmem>>, vector<6x256xf32>
    %cst_9 = arith.constant dense<0.000000e+00> : vector<1x256xf32>
    %14 = tpu.matmul %10, %13, %cst_9 {dimension_numbers = #tpu.dot_dimension_numbers<[1], [0], [0], [1], [0, 0, 1, 1], [], []>} : vector<1x6xf32>, vector<6x256xf32>, vector<1x256xf32> -> vector<1x256xf32>
    %c0_10 = arith.constant 0 : index
    %c0_11 = arith.constant 0 : index
    %15 = vector.load %arg4[%c0_10, %c0_11] : memref<2x256xf32, #tpu.memory_space<vmem>>, vector<1x256xf32>
    %16 = arith.mulf %14, %15 : vector<1x256xf32>
    %c1_12 = arith.constant 1 : index
    %c0_13 = arith.constant 0 : index
    %17 = vector.load %arg4[%c1_12, %c0_13] : memref<2x256xf32, #tpu.memory_space<vmem>>, vector<1x256xf32>
    %18 = arith.mulf %12, %16 : vector<1x256xf32>
    %19 = arith.subf %17, %18 : vector<1x256xf32>
    %c0_14 = arith.constant 0 : index
    %c0_15 = arith.constant 0 : index
    %c0_16 = arith.constant 0 : index
    %20 = vector.load %arg1[%c0_14, %c0_15, %c0_16] : memref<1x28x256xf32, #tpu.memory_space<vmem>>, vector<1x28x256xf32>
    %21 = vector.shape_cast %20 : vector<1x28x256xf32> to vector<28x256xf32>
    %22 = vector.broadcast %16 : vector<1x256xf32> to vector<28x256xf32>
    %23 = arith.mulf %21, %22 : vector<28x256xf32>
    %24 = vector.broadcast %19 : vector<1x256xf32> to vector<28x256xf32>
    %25 = arith.addf %23, %24 : vector<28x256xf32>
    %cst_17 = arith.constant 0.000000e+00 : f32
    %26 = vector.broadcast %cst_17 : f32 to vector<28x256xf32>
    %27 = arith.maximumf %25, %26 : vector<28x256xf32>
    %c0_18 = arith.constant 0 : index
    %c0_19 = arith.constant 0 : index
    %c0_20 = arith.constant 0 : index
    %28 = vector.load %arg5[%c0_18, %c0_19, %c0_20] : memref<2x256x128xf32, #tpu.memory_space<vmem>>, vector<1x256x128xf32>
    %29 = vector.shape_cast %28 : vector<1x256x128xf32> to vector<256x128xf32>
    %cst_21 = arith.constant dense<0.000000e+00> : vector<28x128xf32>
    %30 = tpu.matmul %27, %29, %cst_21 {dimension_numbers = #tpu.dot_dimension_numbers<[1], [0], [0], [1], [0, 0, 1, 1], [], []>} : vector<28x256xf32>, vector<256x128xf32>, vector<28x128xf32> -> vector<28x128xf32>
    %c1_22 = arith.constant 1 : index
    %c0_23 = arith.constant 0 : index
    %c0_24 = arith.constant 0 : index
    %31 = vector.load %arg5[%c1_22, %c0_23, %c0_24] : memref<2x256x128xf32, #tpu.memory_space<vmem>>, vector<1x256x128xf32>
    %32 = vector.shape_cast %31 : vector<1x256x128xf32> to vector<256x128xf32>
    %cst_25 = arith.constant dense<0.000000e+00> : vector<28x128xf32>
    %33 = tpu.matmul %27, %32, %cst_25 {dimension_numbers = #tpu.dot_dimension_numbers<[1], [0], [0], [1], [0, 0, 1, 1], [], []>} : vector<28x256xf32>, vector<256x128xf32>, vector<28x128xf32> -> vector<28x128xf32>
    %34 = arith.maximumf %30, %33 : vector<28x128xf32>
    %c0_26 = arith.constant 0 : index
    %c0_27 = arith.constant 0 : index
    %c0_28 = arith.constant 0 : index
    %35 = vector.load %arg6[%c0_26, %c0_27, %c0_28] : memref<2x14x28xf32, #tpu.memory_space<vmem>>, vector<1x14x28xf32>
    %36 = vector.shape_cast %35 : vector<1x14x28xf32> to vector<14x28xf32>
    %cst_29 = arith.constant dense<0.000000e+00> : vector<14x128xf32>
    %37 = tpu.matmul %36, %34, %cst_29 {dimension_numbers = #tpu.dot_dimension_numbers<[1], [0], [0], [1], [0, 0, 1, 1], [], []>} : vector<14x28xf32>, vector<28x128xf32>, vector<14x128xf32> -> vector<14x128xf32>
    %c1_30 = arith.constant 1 : index
    %c0_31 = arith.constant 0 : index
    %c0_32 = arith.constant 0 : index
    %38 = vector.load %arg6[%c1_30, %c0_31, %c0_32] : memref<2x14x28xf32, #tpu.memory_space<vmem>>, vector<1x14x28xf32>
    %39 = vector.shape_cast %38 : vector<1x14x28xf32> to vector<14x28xf32>
    %cst_33 = arith.constant dense<0.000000e+00> : vector<14x128xf32>
    %40 = tpu.matmul %39, %34, %cst_33 {dimension_numbers = #tpu.dot_dimension_numbers<[1], [0], [0], [1], [0, 0, 1, 1], [], []>} : vector<14x28xf32>, vector<28x128xf32>, vector<14x128xf32> -> vector<14x128xf32>
    %41 = arith.maximumf %37, %40 : vector<14x128xf32>
    %c0_34 = arith.constant 0 : index
    %c0_35 = arith.constant 0 : index
    %c0_36 = arith.constant 0 : index
    %42 = vector.load %arg7[%c0_34, %c0_35, %c0_36] : memref<1x14x128xf32, #tpu.memory_space<vmem>>, vector<1x14x128xf32>
    %43 = vector.shape_cast %42 : vector<1x14x128xf32> to vector<14x128xf32>
    %44 = vector.shape_cast %41 : vector<14x128xf32> to vector<1x14x128xf32>
    tpu.vector_store %arg7[%c0_34, %c0_35, %c0_36], %44 {strides = array<i32>} : memref<1x14x128xf32, #tpu.memory_space<vmem>>, vector<1x14x128xf32>,
    return
  }
  func.func @transform_0(%arg0: i32) -> (i32, i32, i32) {
    %c0_i32 = arith.constant 0 : i32
    %c0_i32_0 = arith.constant 0 : i32
    %c0_i32_1 = arith.constant 0 : i32
    return %arg0, %c0_i32, %c0_i32_0 : i32, i32, i32
  }
  func.func @transform_1(%arg0: i32) -> (i32, i32) {
    %c0_i32 = arith.constant 0 : i32
    %c0_i32_0 = arith.constant 0 : i32
    %c0_i32_1 = arith.constant 0 : i32
    return %c0_i32, %c0_i32_0 : i32, i32
  }
  func.func @transform_2(%arg0: i32) -> (i32, i32) {
    %c0_i32 = arith.constant 0 : i32
    %c0_i32_0 = arith.constant 0 : i32
    %c0_i32_1 = arith.constant 0 : i32
    return %c0_i32, %c0_i32_0 : i32, i32
  }
  func.func @transform_3(%arg0: i32) -> (i32, i32) {
    %c0_i32 = arith.constant 0 : i32
    %c0_i32_0 = arith.constant 0 : i32
    %c0_i32_1 = arith.constant 0 : i32
    return %c0_i32, %c0_i32_0 : i32, i32
  }
  func.func @transform_4(%arg0: i32) -> (i32, i32, i32) {
    %c0_i32 = arith.constant 0 : i32
    %c0_i32_0 = arith.constant 0 : i32
    %c0_i32_1 = arith.constant 0 : i32
    %c0_i32_2 = arith.constant 0 : i32
    return %c0_i32, %c0_i32_0, %c0_i32_1 : i32, i32, i32
  }
  func.func @transform_5(%arg0: i32) -> (i32, i32, i32) {
    %c0_i32 = arith.constant 0 : i32
    %c0_i32_0 = arith.constant 0 : i32
    %c0_i32_1 = arith.constant 0 : i32
    %c0_i32_2 = arith.constant 0 : i32
    return %c0_i32, %c0_i32_0, %c0_i32_1 : i32, i32, i32
  }
  func.func @transform_6(%arg0: i32) -> (i32, i32, i32) {
    %c0_i32 = arith.constant 0 : i32
    %c0_i32_0 = arith.constant 0 : i32
    %c0_i32_1 = arith.constant 0 : i32
    return %arg0, %c0_i32, %c0_i32_0 : i32, i32, i32
  }
}

module attributes {stable_mosaic.version = 11 : i64} {
  func.func @_conv_stats_kernel(%arg0: i32, %arg1: memref<1x14x128xf32, #tpu.memory_space<vmem>>, %arg2: memref<5x128x256xf32, #tpu.memory_space<vmem>>, %arg3: memref<1x256xf32, #tpu.memory_space<vmem>>, %arg4: memref<256x16xf32, #tpu.memory_space<vmem>>, %arg5: memref<1x10x256xf32, #tpu.memory_space<vmem>>, %arg6: memref<2x16xf32, #tpu.memory_space<vmem>>) attributes {dimension_semantics = [#tpu.dimension_semantics<arbitrary>], iteration_bounds = array<i64: 2>, scalar_prefetch = 0 : i64, scratch_operands = 0 : i64, tpu.core_type = #tpu.core_type<tc>, window_params = [{transform_indices = @transform_0, window_bounds = array<i64: 1, 14, 128>}, {pipeline_mode = #tpu.pipeline_mode<synchronous>, transform_indices = @transform_1, window_bounds = array<i64: 5, 128, 256>}, {pipeline_mode = #tpu.pipeline_mode<synchronous>, transform_indices = @transform_2, window_bounds = array<i64: 1, 256>}, {pipeline_mode = #tpu.pipeline_mode<synchronous>, transform_indices = @transform_3, window_bounds = array<i64: 256, 16>}, {transform_indices = @transform_4, window_bounds = array<i64: 1, 10, 256>}, {pipeline_mode = #tpu.pipeline_mode<synchronous>, transform_indices = @transform_5, window_bounds = array<i64: 2, 16>}]} {
    %c0 = arith.constant 0 : index
    %c0_0 = arith.constant 0 : index
    %c0_1 = arith.constant 0 : index
    %0 = vector.load %arg1[%c0, %c0_0, %c0_1] : memref<1x14x128xf32, #tpu.memory_space<vmem>>, vector<1x10x128xf32>
    %1 = vector.shape_cast %0 : vector<1x10x128xf32> to vector<10x128xf32>
    %c0_2 = arith.constant 0 : index
    %c0_3 = arith.constant 0 : index
    %c0_4 = arith.constant 0 : index
    %2 = vector.load %arg2[%c0_2, %c0_3, %c0_4] : memref<5x128x256xf32, #tpu.memory_space<vmem>>, vector<1x128x256xf32>
    %3 = vector.shape_cast %2 : vector<1x128x256xf32> to vector<128x256xf32>
    %cst = arith.constant dense<0.000000e+00> : vector<10x256xf32>
    %4 = tpu.matmul %1, %3, %cst {dimension_numbers = #tpu.dot_dimension_numbers<[1], [0], [0], [1], [0, 0, 1, 1], [], []>} : vector<10x128xf32>, vector<128x256xf32>, vector<10x256xf32> -> vector<10x256xf32>
    %c0_5 = arith.constant 0 : index
    %c1 = arith.constant 1 : index
    %c0_6 = arith.constant 0 : index
    %5 = vector.load %arg1[%c0_5, %c1, %c0_6] : memref<1x14x128xf32, #tpu.memory_space<vmem>>, vector<1x10x128xf32>
    %6 = vector.shape_cast %5 : vector<1x10x128xf32> to vector<10x128xf32>
    %c1_7 = arith.constant 1 : index
    %c0_8 = arith.constant 0 : index
    %c0_9 = arith.constant 0 : index
    %7 = vector.load %arg2[%c1_7, %c0_8, %c0_9] : memref<5x128x256xf32, #tpu.memory_space<vmem>>, vector<1x128x256xf32>
    %8 = vector.shape_cast %7 : vector<1x128x256xf32> to vector<128x256xf32>
    %cst_10 = arith.constant dense<0.000000e+00> : vector<10x256xf32>
    %9 = tpu.matmul %6, %8, %cst_10 {dimension_numbers = #tpu.dot_dimension_numbers<[1], [0], [0], [1], [0, 0, 1, 1], [], []>} : vector<10x128xf32>, vector<128x256xf32>, vector<10x256xf32> -> vector<10x256xf32>
    %10 = arith.addf %4, %9 : vector<10x256xf32>
    %c0_11 = arith.constant 0 : index
    %c2 = arith.constant 2 : index
    %c0_12 = arith.constant 0 : index
    %11 = vector.load %arg1[%c0_11, %c2, %c0_12] : memref<1x14x128xf32, #tpu.memory_space<vmem>>, vector<1x10x128xf32>
    %12 = vector.shape_cast %11 : vector<1x10x128xf32> to vector<10x128xf32>
    %c2_13 = arith.constant 2 : index
    %c0_14 = arith.constant 0 : index
    %c0_15 = arith.constant 0 : index
    %13 = vector.load %arg2[%c2_13, %c0_14, %c0_15] : memref<5x128x256xf32, #tpu.memory_space<vmem>>, vector<1x128x256xf32>
    %14 = vector.shape_cast %13 : vector<1x128x256xf32> to vector<128x256xf32>
    %cst_16 = arith.constant dense<0.000000e+00> : vector<10x256xf32>
    %15 = tpu.matmul %12, %14, %cst_16 {dimension_numbers = #tpu.dot_dimension_numbers<[1], [0], [0], [1], [0, 0, 1, 1], [], []>} : vector<10x128xf32>, vector<128x256xf32>, vector<10x256xf32> -> vector<10x256xf32>
    %16 = arith.addf %10, %15 : vector<10x256xf32>
    %c0_17 = arith.constant 0 : index
    %c3 = arith.constant 3 : index
    %c0_18 = arith.constant 0 : index
    %17 = vector.load %arg1[%c0_17, %c3, %c0_18] : memref<1x14x128xf32, #tpu.memory_space<vmem>>, vector<1x10x128xf32>
    %18 = vector.shape_cast %17 : vector<1x10x128xf32> to vector<10x128xf32>
    %c3_19 = arith.constant 3 : index
    %c0_20 = arith.constant 0 : index
    %c0_21 = arith.constant 0 : index
    %19 = vector.load %arg2[%c3_19, %c0_20, %c0_21] : memref<5x128x256xf32, #tpu.memory_space<vmem>>, vector<1x128x256xf32>
    %20 = vector.shape_cast %19 : vector<1x128x256xf32> to vector<128x256xf32>
    %cst_22 = arith.constant dense<0.000000e+00> : vector<10x256xf32>
    %21 = tpu.matmul %18, %20, %cst_22 {dimension_numbers = #tpu.dot_dimension_numbers<[1], [0], [0], [1], [0, 0, 1, 1], [], []>} : vector<10x128xf32>, vector<128x256xf32>, vector<10x256xf32> -> vector<10x256xf32>
    %22 = arith.addf %16, %21 : vector<10x256xf32>
    %c0_23 = arith.constant 0 : index
    %c4 = arith.constant 4 : index
    %c0_24 = arith.constant 0 : index
    %23 = vector.load %arg1[%c0_23, %c4, %c0_24] : memref<1x14x128xf32, #tpu.memory_space<vmem>>, vector<1x10x128xf32>
    %24 = vector.shape_cast %23 : vector<1x10x128xf32> to vector<10x128xf32>
    %c4_25 = arith.constant 4 : index
    %c0_26 = arith.constant 0 : index
    %c0_27 = arith.constant 0 : index
    %25 = vector.load %arg2[%c4_25, %c0_26, %c0_27] : memref<5x128x256xf32, #tpu.memory_space<vmem>>, vector<1x128x256xf32>
    %26 = vector.shape_cast %25 : vector<1x128x256xf32> to vector<128x256xf32>
    %cst_28 = arith.constant dense<0.000000e+00> : vector<10x256xf32>
    %27 = tpu.matmul %24, %26, %cst_28 {dimension_numbers = #tpu.dot_dimension_numbers<[1], [0], [0], [1], [0, 0, 1, 1], [], []>} : vector<10x128xf32>, vector<128x256xf32>, vector<10x256xf32> -> vector<10x256xf32>
    %28 = arith.addf %22, %27 : vector<10x256xf32>
    %c0_29 = arith.constant 0 : index
    %c0_30 = arith.constant 0 : index
    %29 = vector.load %arg3[%c0_29, %c0_30] : memref<1x256xf32, #tpu.memory_space<vmem>>, vector<1x256xf32>
    %30 = vector.broadcast %29 : vector<1x256xf32> to vector<10x256xf32>
    %31 = arith.addf %28, %30 : vector<10x256xf32>
    %c0_31 = arith.constant 0 : index
    %c0_32 = arith.constant 0 : index
    %c0_33 = arith.constant 0 : index
    %32 = vector.load %arg5[%c0_31, %c0_32, %c0_33] : memref<1x10x256xf32, #tpu.memory_space<vmem>>, vector<1x10x256xf32>
    %33 = vector.shape_cast %32 : vector<1x10x256xf32> to vector<10x256xf32>
    %34 = vector.shape_cast %31 : vector<10x256xf32> to vector<1x10x256xf32>
    tpu.vector_store %arg5[%c0_31, %c0_32, %c0_33], %34 {strides = array<i32>} : memref<1x10x256xf32, #tpu.memory_space<vmem>>, vector<1x10x256xf32>,
    %cst_34 = arith.constant dense<0.000000e+00> : vector<256xf32>
    %35 = vector.multi_reduction <add>, %31, %cst_34 [0] : vector<10x256xf32> to vector<256xf32>
    %36 = vector.shape_cast %35 : vector<256xf32> to vector<1x256xf32>
    %37 = arith.mulf %31, %31 : vector<10x256xf32>
    %cst_35 = arith.constant dense<0.000000e+00> : vector<256xf32>
    %38 = vector.multi_reduction <add>, %37, %cst_35 [0] : vector<10x256xf32> to vector<256xf32>
    %39 = vector.shape_cast %38 : vector<256xf32> to vector<1x256xf32>
    %40 = tpu.concatenate %36, %39 in 0 : vector<1x256xf32>, vector<1x256xf32> -> vector<2x256xf32>
    %c0_36 = arith.constant 0 : index
    %c0_37 = arith.constant 0 : index
    %41 = vector.load %arg4[%c0_36, %c0_37] : memref<256x16xf32, #tpu.memory_space<vmem>>, vector<256x16xf32>
    %cst_38 = arith.constant dense<0.000000e+00> : vector<2x16xf32>
    %42 = tpu.matmul %40, %41, %cst_38 {dimension_numbers = #tpu.dot_dimension_numbers<[1], [0], [0], [1], [0, 0, 1, 1], [], []>} : vector<2x256xf32>, vector<256x16xf32>, vector<2x16xf32> -> vector<2x16xf32>
    %c0_i32 = arith.constant 0 : i32
    %43 = arith.cmpi eq, %arg0, %c0_i32 : i32
    %44 = arith.extui %43 : i1 to i32
    %c0_i32_39 = arith.constant 0 : i32
    %45 = arith.cmpi ne, %44, %c0_i32_39 : i32
    scf.if %45 {
      %cst_44 = arith.constant 0.000000e+00 : f32
      %49 = vector.broadcast %cst_44 : f32 to vector<2x16xf32>
      %c0_45 = arith.constant 0 : index
      %c0_46 = arith.constant 0 : index
      %50 = vector.load %arg6[%c0_45, %c0_46] : memref<2x16xf32, #tpu.memory_space<vmem>>, vector<2x16xf32>
      tpu.vector_store %arg6[%c0_45, %c0_46], %49 {strides = array<i32>} : memref<2x16xf32, #tpu.memory_space<vmem>>, vector<2x16xf32>,
    } else {
    }
    %c0_40 = arith.constant 0 : index
    %c0_41 = arith.constant 0 : index
    %46 = vector.load %arg6[%c0_40, %c0_41] : memref<2x16xf32, #tpu.memory_space<vmem>>, vector<2x16xf32>
    %47 = arith.addf %46, %42 : vector<2x16xf32>
    %c0_42 = arith.constant 0 : index
    %c0_43 = arith.constant 0 : index
    %48 = vector.load %arg6[%c0_42, %c0_43] : memref<2x16xf32, #tpu.memory_space<vmem>>, vector<2x16xf32>
    tpu.vector_store %arg6[%c0_42, %c0_43], %47 {strides = array<i32>} : memref<2x16xf32, #tpu.memory_space<vmem>>, vector<2x16xf32>,
    return
  }
  func.func @transform_0(%arg0: i32) -> (i32, i32, i32) {
    %c0_i32 = arith.constant 0 : i32
    %c0_i32_0 = arith.constant 0 : i32
    %c0_i32_1 = arith.constant 0 : i32
    return %arg0, %c0_i32, %c0_i32_0 : i32, i32, i32
  }
  func.func @transform_1(%arg0: i32) -> (i32, i32, i32) {
    %c0_i32 = arith.constant 0 : i32
    %c0_i32_0 = arith.constant 0 : i32
    %c0_i32_1 = arith.constant 0 : i32
    %c0_i32_2 = arith.constant 0 : i32
    return %c0_i32, %c0_i32_0, %c0_i32_1 : i32, i32, i32
  }
  func.func @transform_2(%arg0: i32) -> (i32, i32) {
    %c0_i32 = arith.constant 0 : i32
    %c0_i32_0 = arith.constant 0 : i32
    %c0_i32_1 = arith.constant 0 : i32
    return %c0_i32, %c0_i32_0 : i32, i32
  }
  func.func @transform_3(%arg0: i32) -> (i32, i32) {
    %c0_i32 = arith.constant 0 : i32
    %c0_i32_0 = arith.constant 0 : i32
    %c0_i32_1 = arith.constant 0 : i32
    return %c0_i32, %c0_i32_0 : i32, i32
  }
  func.func @transform_4(%arg0: i32) -> (i32, i32, i32) {
    %c0_i32 = arith.constant 0 : i32
    %c0_i32_0 = arith.constant 0 : i32
    %c0_i32_1 = arith.constant 0 : i32
    return %arg0, %c0_i32, %c0_i32_0 : i32, i32, i32
  }
  func.func @transform_5(%arg0: i32) -> (i32, i32) {
    %c0_i32 = arith.constant 0 : i32
    %c0_i32_0 = arith.constant 0 : i32
    %c0_i32_1 = arith.constant 0 : i32
    return %c0_i32, %c0_i32_0 : i32, i32
  }
}

module attributes {stable_mosaic.version = 11 : i64} {
  func.func @_bn_relu_pool_kernel(%arg0: i32, %arg1: memref<1x10x256xf32, #tpu.memory_space<vmem>>, %arg2: memref<2x16xf32, #tpu.memory_space<vmem>>, %arg3: memref<16x256xf32, #tpu.memory_space<vmem>>, %arg4: memref<2x256xf32, #tpu.memory_space<vmem>>, %arg5: memref<2x256x128xf32, #tpu.memory_space<vmem>>, %arg6: memref<2x5x10xf32, #tpu.memory_space<vmem>>, %arg7: memref<1x5x128xf32, #tpu.memory_space<vmem>>) attributes {dimension_semantics = [#tpu.dimension_semantics<parallel>], iteration_bounds = array<i64: 2>, scalar_prefetch = 0 : i64, scratch_operands = 0 : i64, tpu.core_type = #tpu.core_type<tc>, window_params = [{transform_indices = @transform_0, window_bounds = array<i64: 1, 10, 256>}, {pipeline_mode = #tpu.pipeline_mode<synchronous>, transform_indices = @transform_1, window_bounds = array<i64: 2, 16>}, {pipeline_mode = #tpu.pipeline_mode<synchronous>, transform_indices = @transform_2, window_bounds = array<i64: 16, 256>}, {pipeline_mode = #tpu.pipeline_mode<synchronous>, transform_indices = @transform_3, window_bounds = array<i64: 2, 256>}, {pipeline_mode = #tpu.pipeline_mode<synchronous>, transform_indices = @transform_4, window_bounds = array<i64: 2, 256, 128>}, {pipeline_mode = #tpu.pipeline_mode<synchronous>, transform_indices = @transform_5, window_bounds = array<i64: 2, 5, 10>}, {transform_indices = @transform_6, window_bounds = array<i64: 1, 5, 128>}]} {
    %c0 = arith.constant 0 : index
    %c0_0 = arith.constant 0 : index
    %0 = vector.load %arg2[%c0, %c0_0] : memref<2x16xf32, #tpu.memory_space<vmem>>, vector<1x16xf32>
    %cst = arith.constant 5.000000e-03 : f32
    %1 = vector.broadcast %cst : f32 to vector<1x16xf32>
    %2 = arith.mulf %0, %1 : vector<1x16xf32>
    %c1 = arith.constant 1 : index
    %c0_1 = arith.constant 0 : index
    %3 = vector.load %arg2[%c1, %c0_1] : memref<2x16xf32, #tpu.memory_space<vmem>>, vector<1x16xf32>
    %cst_2 = arith.constant 5.000000e-03 : f32
    %4 = vector.broadcast %cst_2 : f32 to vector<1x16xf32>
    %5 = arith.mulf %3, %4 : vector<1x16xf32>
    %6 = arith.mulf %2, %2 : vector<1x16xf32>
    %7 = arith.subf %5, %6 : vector<1x16xf32>
    %cst_3 = arith.constant 9.99999974E-6 : f32
    %8 = vector.broadcast %cst_3 : f32 to vector<1x16xf32>
    %9 = arith.addf %7, %8 : vector<1x16xf32>
    %10 = math.rsqrt %9 : vector<1x16xf32>
    %c0_4 = arith.constant 0 : index
    %c0_5 = arith.constant 0 : index
    %11 = vector.load %arg3[%c0_4, %c0_5] : memref<16x256xf32, #tpu.memory_space<vmem>>, vector<16x256xf32>
    %cst_6 = arith.constant dense<0.000000e+00> : vector<1x256xf32>
    %12 = tpu.matmul %2, %11, %cst_6 {dimension_numbers = #tpu.dot_dimension_numbers<[1], [0], [0], [1], [0, 0, 1, 1], [], []>} : vector<1x16xf32>, vector<16x256xf32>, vector<1x256xf32> -> vector<1x256xf32>
    %c0_7 = arith.constant 0 : index
    %c0_8 = arith.constant 0 : index
    %13 = vector.load %arg3[%c0_7, %c0_8] : memref<16x256xf32, #tpu.memory_space<vmem>>, vector<16x256xf32>
    %cst_9 = arith.constant dense<0.000000e+00> : vector<1x256xf32>
    %14 = tpu.matmul %10, %13, %cst_9 {dimension_numbers = #tpu.dot_dimension_numbers<[1], [0], [0], [1], [0, 0, 1, 1], [], []>} : vector<1x16xf32>, vector<16x256xf32>, vector<1x256xf32> -> vector<1x256xf32>
    %c0_10 = arith.constant 0 : index
    %c0_11 = arith.constant 0 : index
    %15 = vector.load %arg4[%c0_10, %c0_11] : memref<2x256xf32, #tpu.memory_space<vmem>>, vector<1x256xf32>
    %16 = arith.mulf %14, %15 : vector<1x256xf32>
    %c1_12 = arith.constant 1 : index
    %c0_13 = arith.constant 0 : index
    %17 = vector.load %arg4[%c1_12, %c0_13] : memref<2x256xf32, #tpu.memory_space<vmem>>, vector<1x256xf32>
    %18 = arith.mulf %12, %16 : vector<1x256xf32>
    %19 = arith.subf %17, %18 : vector<1x256xf32>
    %c0_14 = arith.constant 0 : index
    %c0_15 = arith.constant 0 : index
    %c0_16 = arith.constant 0 : index
    %20 = vector.load %arg1[%c0_14, %c0_15, %c0_16] : memref<1x10x256xf32, #tpu.memory_space<vmem>>, vector<1x10x256xf32>
    %21 = vector.shape_cast %20 : vector<1x10x256xf32> to vector<10x256xf32>
    %22 = vector.broadcast %16 : vector<1x256xf32> to vector<10x256xf32>
    %23 = arith.mulf %21, %22 : vector<10x256xf32>
    %24 = vector.broadcast %19 : vector<1x256xf32> to vector<10x256xf32>
    %25 = arith.addf %23, %24 : vector<10x256xf32>
    %cst_17 = arith.constant 0.000000e+00 : f32
    %26 = vector.broadcast %cst_17 : f32 to vector<10x256xf32>
    %27 = arith.maximumf %25, %26 : vector<10x256xf32>
    %c0_18 = arith.constant 0 : index
    %c0_19 = arith.constant 0 : index
    %c0_20 = arith.constant 0 : index
    %28 = vector.load %arg5[%c0_18, %c0_19, %c0_20] : memref<2x256x128xf32, #tpu.memory_space<vmem>>, vector<1x256x128xf32>
    %29 = vector.shape_cast %28 : vector<1x256x128xf32> to vector<256x128xf32>
    %cst_21 = arith.constant dense<0.000000e+00> : vector<10x128xf32>
    %30 = tpu.matmul %27, %29, %cst_21 {dimension_numbers = #tpu.dot_dimension_numbers<[1], [0], [0], [1], [0, 0, 1, 1], [], []>} : vector<10x256xf32>, vector<256x128xf32>, vector<10x128xf32> -> vector<10x128xf32>
    %c1_22 = arith.constant 1 : index
    %c0_23 = arith.constant 0 : index
    %c0_24 = arith.constant 0 : index
    %31 = vector.load %arg5[%c1_22, %c0_23, %c0_24] : memref<2x256x128xf32, #tpu.memory_space<vmem>>, vector<1x256x128xf32>
    %32 = vector.shape_cast %31 : vector<1x256x128xf32> to vector<256x128xf32>
    %cst_25 = arith.constant dense<0.000000e+00> : vector<10x128xf32>
    %33 = tpu.matmul %27, %32, %cst_25 {dimension_numbers = #tpu.dot_dimension_numbers<[1], [0], [0], [1], [0, 0, 1, 1], [], []>} : vector<10x256xf32>, vector<256x128xf32>, vector<10x128xf32> -> vector<10x128xf32>
    %34 = arith.maximumf %30, %33 : vector<10x128xf32>
    %c0_26 = arith.constant 0 : index
    %c0_27 = arith.constant 0 : index
    %c0_28 = arith.constant 0 : index
    %35 = vector.load %arg6[%c0_26, %c0_27, %c0_28] : memref<2x5x10xf32, #tpu.memory_space<vmem>>, vector<1x5x10xf32>
    %36 = vector.shape_cast %35 : vector<1x5x10xf32> to vector<5x10xf32>
    %cst_29 = arith.constant dense<0.000000e+00> : vector<5x128xf32>
    %37 = tpu.matmul %36, %34, %cst_29 {dimension_numbers = #tpu.dot_dimension_numbers<[1], [0], [0], [1], [0, 0, 1, 1], [], []>} : vector<5x10xf32>, vector<10x128xf32>, vector<5x128xf32> -> vector<5x128xf32>
    %c1_30 = arith.constant 1 : index
    %c0_31 = arith.constant 0 : index
    %c0_32 = arith.constant 0 : index
    %38 = vector.load %arg6[%c1_30, %c0_31, %c0_32] : memref<2x5x10xf32, #tpu.memory_space<vmem>>, vector<1x5x10xf32>
    %39 = vector.shape_cast %38 : vector<1x5x10xf32> to vector<5x10xf32>
    %cst_33 = arith.constant dense<0.000000e+00> : vector<5x128xf32>
    %40 = tpu.matmul %39, %34, %cst_33 {dimension_numbers = #tpu.dot_dimension_numbers<[1], [0], [0], [1], [0, 0, 1, 1], [], []>} : vector<5x10xf32>, vector<10x128xf32>, vector<5x128xf32> -> vector<5x128xf32>
    %41 = arith.maximumf %37, %40 : vector<5x128xf32>
    %c0_34 = arith.constant 0 : index
    %c0_35 = arith.constant 0 : index
    %c0_36 = arith.constant 0 : index
    %42 = vector.load %arg7[%c0_34, %c0_35, %c0_36] : memref<1x5x128xf32, #tpu.memory_space<vmem>>, vector<1x5x128xf32>
    %43 = vector.shape_cast %42 : vector<1x5x128xf32> to vector<5x128xf32>
    %44 = vector.shape_cast %41 : vector<5x128xf32> to vector<1x5x128xf32>
    tpu.vector_store %arg7[%c0_34, %c0_35, %c0_36], %44 {strides = array<i32>} : memref<1x5x128xf32, #tpu.memory_space<vmem>>, vector<1x5x128xf32>,
    return
  }
  func.func @transform_0(%arg0: i32) -> (i32, i32, i32) {
    %c0_i32 = arith.constant 0 : i32
    %c0_i32_0 = arith.constant 0 : i32
    %c0_i32_1 = arith.constant 0 : i32
    return %arg0, %c0_i32, %c0_i32_0 : i32, i32, i32
  }
  func.func @transform_1(%arg0: i32) -> (i32, i32) {
    %c0_i32 = arith.constant 0 : i32
    %c0_i32_0 = arith.constant 0 : i32
    %c0_i32_1 = arith.constant 0 : i32
    return %c0_i32, %c0_i32_0 : i32, i32
  }
  func.func @transform_2(%arg0: i32) -> (i32, i32) {
    %c0_i32 = arith.constant 0 : i32
    %c0_i32_0 = arith.constant 0 : i32
    %c0_i32_1 = arith.constant 0 : i32
    return %c0_i32, %c0_i32_0 : i32, i32
  }
  func.func @transform_3(%arg0: i32) -> (i32, i32) {
    %c0_i32 = arith.constant 0 : i32
    %c0_i32_0 = arith.constant 0 : i32
    %c0_i32_1 = arith.constant 0 : i32
    return %c0_i32, %c0_i32_0 : i32, i32
  }
  func.func @transform_4(%arg0: i32) -> (i32, i32, i32) {
    %c0_i32 = arith.constant 0 : i32
    %c0_i32_0 = arith.constant 0 : i32
    %c0_i32_1 = arith.constant 0 : i32
    %c0_i32_2 = arith.constant 0 : i32
    return %c0_i32, %c0_i32_0, %c0_i32_1 : i32, i32, i32
  }
  func.func @transform_5(%arg0: i32) -> (i32, i32, i32) {
    %c0_i32 = arith.constant 0 : i32
    %c0_i32_0 = arith.constant 0 : i32
    %c0_i32_1 = arith.constant 0 : i32
    %c0_i32_2 = arith.constant 0 : i32
    return %c0_i32, %c0_i32_0, %c0_i32_1 : i32, i32, i32
  }
  func.func @transform_6(%arg0: i32) -> (i32, i32, i32) {
    %c0_i32 = arith.constant 0 : i32
    %c0_i32_0 = arith.constant 0 : i32
    %c0_i32_1 = arith.constant 0 : i32
    return %arg0, %c0_i32, %c0_i32_0 : i32, i32, i32
  }
}

</mosaic_0001>

<bundles_post_ra>
// kernel: lenet_bn_forward.4
= control target key start
LH: loop header
LB: loop body
LE: loop exit
PB: predicated region body
PF: predicated region fallthrough
CT: control target
= control target key end

     0   :  { %s1549_s18 = smov 0   ;;  %s2121_s0 = inlined_call_operand.vmem [shape: f32[2,32,96], index: 0, kind: input, shape index: {}]   ;;  %s2122_s1 = inlined_call_operand.vmem [shape: f32[5,96,256], index: 1, kind: input, shape index: {}]   ;;  %s2123_s2 = inlined_call_operand.vmem [shape: f32[1,256], index: 2, kind: input, shape index: {}]   ;;  %s2124_s3 = inlined_call_operand.vmem [shape: f32[256,6], index: 3, kind: input, shape index: {}]   ;;  %s2125_s4 = inlined_call_operand.vmem [shape: f32[2,28,256], index: 4, kind: output, shape index: {0}]   ;;  %s2126_s5 = inlined_call_operand.vmem [shape: f32[2,6], index: 5, kind: output, shape index: {1}]  }
   0x1 LB: > { %s1555_s19 = sadd.s32 4294967295, %s1515_s18   ;;  %p1154_p0 = scmp.ge.s32.totalorder %s1515_s18, 1  ;;  %s1515_s18 = sphi %s1549_s18, %s16_s18  }
   0x2   : > { %p185_p1 = scmp.lt.s32.totalorder %s1515_s18, 3 }
   0x4   : > { %p186_p2 = pnand %p1154_p0, %p185_p1 }
   0x5   : > { %v1160_v0 = vld [vmem:[%s2122_s1 + $0xc8] sm:$0xff] (!%p186_p2)  ;;  %v1162_v1 = vld [vmem:[%s2122_s1 + $0xd8] sm:$0xff] (!%p186_p2)  ;;  %v1159_v5 = vld [vmem:[%s2122_s1 + $0xc0] sm:$0xff] (!%p186_p2)  ;;  %v1517_v7 = vmov (!%p186_p2), 0.0   ;;  %p213_p3 = scmp.lt.s32.totalorder (!%p186_p2), %s1555_s19, 1  ;;  %vm280_vm0 = vcmask (!%p186_p2), 785408  }
   0x6   : > { %189 = sbr.rel (%p186_p2) target bundleno = 547 (0x223), region = 36  ;;  %v1192_v2 = vld [vmem:[%s2122_s1 + $0x188] sm:$0xff] (!%p186_p2)  ;;  %v1315_v3 = vpack.c.bf16 (!%p186_p2), %v1162_v1, %v1160_v0  ;;  %v1194_v4 = vld [vmem:[%s2122_s1 + $0x198] sm:$0xff] (!%p186_p2)  ;;  %v1161_v6 = vld [vmem:[%s2122_s1 + $0xd0] sm:$0xff] (!%p186_p2)  ;;  %357 = vmatprep.mubr.f32.mxu1 (!%p186_p2), %v1517_v7  ;;  %588 = vmatprep.mubr.f32.mxu0 (!%p186_p2), %v1517_v7  ;;  %vm927_vm1 = vcmask (!%p186_p2), 1043456   ;;  %vm974_vm2 = vcmask (!%p186_p2), 1040384  }
   0x7   : > { %v1363_v8 = vpack.c.bf16 (!%p186_p2), %v1194_v4, %v1192_v2  ;;  %v1317_v9 = vpack.c.bf16 (!%p186_p2), %v1161_v6, %v1159_v5  ;;  %v1191_v10 = vld [vmem:[%s2122_s1 + $0x180] sm:$0xff] (!%p186_p2)  ;;  %v1193_v11 = vld [vmem:[%s2122_s1 + $0x190] sm:$0xff] (!%p186_p2)  ;;  %v1164_v12 = vld [vmem:[%s2122_s1 + $0xe8] sm:$0xff] (!%p186_p2)  ;;  %p1275_p4 = scmp.ne.s32.totalorder (!%p186_p2), %s1555_s19, 0 }
   0x8   : > { %1316 = vmatprep.subr.bf16.mxu1 (!%p186_p2), %v1315_v3  ;;  %v1365_v13 = vpack.c.bf16 (!%p186_p2), %v1193_v11, %v1191_v10  ;;  %v1166_v14 = vld [vmem:[%s2122_s1 + $0xf8] sm:$0xff] (!%p186_p2)  ;;  %v1196_v15 = vld [vmem:[%s2122_s1 + $0x1a8] sm:$0xff] (!%p186_p2)  ;;  %v1163_v19 = vld [vmem:[%s2122_s1 + $0xe0] sm:$0xff] (!%p186_p2) }
   0x9   : > { %v1198_v16 = vld [vmem:[%s2122_s1 + $0x1b8] sm:$0xff] (!%p186_p2)  ;;  %1364 = vmatprep.subr.bf16.mxu0 (!%p186_p2), %v1363_v8  ;;  %1318 = vmatpush1.bf16.msra.mxu1 (!%p186_p2), %v1317_v9  ;;  %v1319_v17 = vpack.c.bf16 (!%p186_p2), %v1166_v14, %v1164_v12  ;;  %v1165_v20 = vld [vmem:[%s2122_s1 + $0xf0] sm:$0xff] (!%p186_p2)  ;;  %v1195_v21 = vld [vmem:[%s2122_s1 + $0x1a0] sm:$0xff] (!%p186_p2) }
   0xa   : > { %v1367_v18 = vpack.c.bf16 (!%p186_p2), %v1198_v16, %v1196_v15  ;;  %1366 = vmatpush1.bf16.msra.mxu0 (!%p186_p2), %v1365_v13  ;;  %v1321_v22 = vpack.c.bf16 (!%p186_p2), %v1165_v20, %v1163_v19  ;;  %v1197_v23 = vld [vmem:[%s2122_s1 + $0x1b0] sm:$0xff] (!%p186_p2)  ;;  %v1168_v24 = vld [vmem:[%s2122_s1 + $0x108] sm:$0xff] (!%p186_p2)  ;;  %v1170_v25 = vld [vmem:[%s2122_s1 + $0x118] sm:$0xff] (!%p186_p2) }
   0xb   : > { %1320 = vmatprep.subr.bf16.mxu1 (!%p186_p2), %v1319_v17  ;;  %v1369_v26 = vpack.c.bf16 (!%p186_p2), %v1197_v23, %v1195_v21  ;;  %v1323_v27 = vpack.c.bf16 (!%p186_p2), %v1170_v25, %v1168_v24  ;;  %v1200_v28 = vld [vmem:[%s2122_s1 + $0x1c8] sm:$0xff] (!%p186_p2)  ;;  %v1202_v29 = vld [vmem:[%s2122_s1 + $0x1d8] sm:$0xff] (!%p186_p2)  ;;  %v1167_v30 = vld [vmem:[%s2122_s1 + $0x100] sm:$0xff] (!%p186_p2) }
   0xc   : > { %1368 = vmatprep.subr.bf16.mxu0 (!%p186_p2), %v1367_v18  ;;  %v1371_v31 = vpack.c.bf16 (!%p186_p2), %v1202_v29, %v1200_v28  ;;  %v1169_v32 = vld [vmem:[%s2122_s1 + $0x110] sm:$0xff] (!%p186_p2)  ;;  %v1199_v33 = vld [vmem:[%s2122_s1 + $0x1c0] sm:$0xff] (!%p186_p2)  ;;  %v1172_v36 = vld [vmem:[%s2122_s1 + $0x128] sm:$0xff] (!%p186_p2) }
   0xd   : > { %v1201_v34 = vld [vmem:[%s2122_s1 + $0x1d0] sm:$0xff]  ;;  %1322 = vmatpush1.bf16.msra.mxu1 %v1321_v22  ;;  %v1325_v35 = vpack.c.bf16 %v1169_v32, %v1167_v30  ;;  %v1174_v37 = vld [vmem:[%s2122_s1 + $0x138] sm:$0xff]  ;;  %v1204_v38 = vld [vmem:[%s2122_s1 + $0x1e8] sm:$0xff]  ;;  %s1691_s10 = scalar_select %p213_p3, %s1555_s19, 1 }
   0xe   : > { %1370 = vmatpush1.bf16.msra.mxu0 %v1369_v26  ;;  %1324 = vmatprep.subr.bf16.mxu1 %v1323_v27  ;;  %v1373_v39 = vpack.c.bf16 %v1201_v34, %v1199_v33  ;;  %v1327_v40 = vpack.c.bf16 %v1174_v37, %v1172_v36  ;;  %v1206_v41 = vld [vmem:[%s2122_s1 + $0x1f8] sm:$0xff]  ;;  %v1171_v42 = vld [vmem:[%s2122_s1 + $0x120] sm:$0xff]  ;;  %v1173_v43 = vld [vmem:[%s2122_s1 + $0x130] sm:$0xff]  ;;  %vm1083_vm3 = vcmask (!%p1275_p4), 41984  }
   0xf   : > { %1372 = vmatprep.subr.bf16.mxu0 %v1371_v31  ;;  %v1375_v44 = vpack.c.bf16 %v1206_v41, %v1204_v38  ;;  %v1203_v45 = vld [vmem:[%s2122_s1 + $0x1e0] sm:$0xff]  ;;  %v1205_v46 = vld [vmem:[%s2122_s1 + $0x1f0] sm:$0xff]  ;;  %v1176_v47 = vld [vmem:[%s2122_s1 + $0x148] sm:$0xff]  ;;  %v1329_v51 = vpack.c.bf16 %v1173_v43, %v1171_v42  ;;  %s1278_s29 = sshll.u32 %s1691_s10, 5  ;;  %s1279_s25 = sshll.u32 %s1691_s10, 6 }
  0x10   : > { %v1178_v48 = vld [vmem:[%s2122_s1 + $0x158] sm:$0xff]  ;;  %v1208_v49 = vld [vmem:[%s2122_s1 + $0x208] sm:$0xff]  ;;  %v1377_v52 = vpack.c.bf16 %v1205_v46, %v1203_v45  ;;  %v1175_v54 = vld [vmem:[%s2122_s1 + $0x140] sm:$0xff]  ;;  %s1727_s12 = scalar_lea.vmem %s2121_s0, %s1278_s29  ;;  %s2094_s28 = scalar_lea.vmem %s2125_s4, %s1279_s25 }
  0x11   : > { %v1210_v50 = vld [vmem:[%s2122_s1 + $0x218] sm:$0xff]  ;;  %1326 = vmatpush1.bf16.msra.mxu1 %v1325_v35  ;;  %v1331_v53 = vpack.c.bf16 %v1178_v48, %v1176_v47  ;;  %v1177_v55 = vld [vmem:[%s2122_s1 + $0x150] sm:$0xff]  ;;  %v1207_v56 = vld [vmem:[%s2122_s1 + $0x200] sm:$0xff] }
  0x12   : > { %1374 = vmatpush1.bf16.msra.mxu0 %v1373_v39  ;;  %1328 = vmatprep.subr.bf16.mxu1 %v1327_v40  ;;  %v1379_v57 = vpack.c.bf16 %v1210_v50, %v1208_v49  ;;  %v1209_v58 = vld [vmem:[%s2122_s1 + $0x210] sm:$0xff]  ;;  %v1180_v59 = vld [vmem:[%s2122_s1 + $0x168] sm:$0xff]  ;;  %v1182_v60 = vld [vmem:[%s2122_s1 + $0x178] sm:$0xff]  ;;  %v1333_v63 = vpack.c.bf16 %v1177_v55, %v1175_v54 }
  0x13   : > { %1376 = vmatprep.subr.bf16.mxu0 %v1375_v44  ;;  %v1212_v61 = vld [vmem:[%s2122_s1 + $0x228] sm:$0xff]  ;;  %v1214_v62 = vld [vmem:[%s2122_s1 + $0x238] sm:$0xff]  ;;  %v1381_v0 = vpack.c.bf16 %v1209_v58, %v1207_v56  ;;  %v1335_v1 = vpack.c.bf16 %v1182_v60, %v1180_v59  ;;  %v1179_v2 = vld [vmem:[%s2122_s1 + $0x160] sm:$0xff] }
  0x14   : > { %v1181_v3 = vld [vmem:[%s2122_s1 + $0x170] sm:$0xff]  ;;  %v1211_v4 = vld [vmem:[%s2122_s1 + $0x220] sm:$0xff]  ;;  %v1383_v5 = vpack.c.bf16 %v1214_v62, %v1212_v61  ;;  %v228_v8 = vld [vmem:[%s2122_s1 + $0x8] sm:$0xff] }
  0x15   : > { %1330 = vmatpush1.bf16.msra.mxu1 %v1329_v51  ;;  %v1213_v6 = vld [vmem:[%s2122_s1 + $0x230] sm:$0xff]  ;;  %v230_v9 = vld [vmem:[%s2122_s1 + $0x18] sm:$0xff]  ;;  %v1220_v10 = vld [vmem:[%s2122_s1 + $0x248] sm:$0xff]  ;;  %v1337_v12 = vpack.c.bf16 %v1181_v3, %v1179_v2 }
  0x16   : > { %1378 = vmatpush1.bf16.msra.mxu0 %v1377_v52  ;;  %1332 = vmatprep.subr.bf16.mxu1 %v1331_v53  ;;  %v1222_v11 = vld [vmem:[%s2122_s1 + $0x258] sm:$0xff]  ;;  %v1385_v13 = vpack.c.bf16 %v1213_v6, %v1211_v4  ;;  %v1339_v14 = vpack.c.bf16 %v230_v9, %v228_v8  ;;  %v227_v15 = vld [vmem:[%s2122_s1] sm:$0xff]  ;;  %v229_v16 = vld [vmem:[%s2122_s1 + $0x10] sm:$0xff] }
  0x17   : > { %1380 = vmatprep.subr.bf16.mxu0 %v1379_v57  ;;  %v1219_v17 = vld [vmem:[%s2122_s1 + $0x240] sm:$0xff]  ;;  %v1387_v18 = vpack.c.bf16 %v1222_v11, %v1220_v10  ;;  %v1221_v19 = vld [vmem:[%s2122_s1 + $0x250] sm:$0xff]  ;;  %v232_v20 = vld [vmem:[%s2122_s1 + $0x28] sm:$0xff]  ;;  %v1341_v25 = vpack.c.bf16 %v229_v16, %v227_v15 }
  0x18   : > { %v234_v21 = vld [vmem:[%s2122_s1 + $0x38] sm:$0xff]  ;;  %v1224_v22 = vld [vmem:[%s2122_s1 + $0x268] sm:$0xff]  ;;  %v1389_v27 = vpack.c.bf16 %v1221_v19, %v1219_v17  ;;  %v231_v29 = vld [vmem:[%s2122_s1 + $0x20] sm:$0xff] }
  0x19   : > { %1334 = vmatpush1.bf16.msra.mxu1 %v1333_v63  ;;  %v1226_v23 = vld [vmem:[%s2122_s1 + $0x278] sm:$0xff]  ;;  %v251_v24 = vld [vmem:[%s1727_s12 + $0x1] sm:$0xff]  ;;  %v1343_v28 = vpack.c.bf16 %v234_v21, %v232_v20  ;;  %v233_v30 = vld [vmem:[%s2122_s1 + $0x30] sm:$0xff] }
  0x1a   : > { %1382 = vmatpush1.bf16.msra.mxu0 %v1381_v0  ;;  %1336 = vmatprep.subr.bf16.mxu1 %v1335_v1  ;;  %v483_v26 = vld [vmem:[%s1727_s12 + $0x2] sm:$0xff]  ;;  %v1391_v32 = vpack.c.bf16 %v1226_v23, %v1224_v22  ;;  %v1225_v33 = vld [vmem:[%s2122_s1 + $0x270] sm:$0xff]  ;;  %v238_v35 = vld [vmem:[%s2122_s1 + $0x58] sm:$0xff]  ;;  %v1345_v38 = vpack.c.bf16 %v233_v30, %v231_v29 }
  0x1b   : > { %1384 = vmatprep.subr.bf16.mxu0 %v1383_v5  ;;  %v1223_v31 = vld [vmem:[%s2122_s1 + $0x260] sm:$0xff]  ;;  %v236_v34 = vld [vmem:[%s2122_s1 + $0x48] sm:$0xff]  ;;  %v1230_v37 = vld [vmem:[%s2122_s1 + $0x298] sm:$0xff] }
  0x1c   : > { %v1228_v36 = vld [vmem:[%s2122_s1 + $0x288] sm:$0xff]  ;;  %v235_v39 = vld [vmem:[%s2122_s1 + $0x40] sm:$0xff]  ;;  %v1393_v41 = vpack.c.bf16 %v1225_v33, %v1223_v31  ;;  %v1347_v42 = vpack.c.bf16 %v238_v35, %v236_v34  ;;  %v237_v43 = vld [vmem:[%s2122_s1 + $0x50] sm:$0xff] }
  0x1d   : > { %1338 = vmatpush1.bf16.msra.mxu1 %v1337_v12  ;;  %v252_v40 = vld [vmem:[%s1727_s12 + $0x9] sm:$0xff]  ;;  %v1227_v44 = vld [vmem:[%s2122_s1 + $0x280] sm:$0xff]  ;;  %v1395_v46 = vpack.c.bf16 %v1230_v37, %v1228_v36  ;;  %v242_v49 = vld [vmem:[%s2122_s1 + $0x78] sm:$0xff]  ;;  %v1349_v52 = vpack.c.bf16 %v237_v43, %v235_v39 }
  0x1e   : > { %1386 = vmatpush1.bf16.msra.mxu0 %v1385_v13  ;;  %1340 = vmatprep.subr.bf16.mxu1 %v1339_v14  ;;  %v484_v45 = vld [vmem:[%s1727_s12 + $0xa] sm:$0xff]  ;;  %v1234_v51 = vld [vmem:[%s2122_s1 + $0x2b8] sm:$0xff]  ;;  %v239_v53 = vld [vmem:[%s2122_s1 + $0x60] sm:$0xff] }
  0x1f   : > { %1388 = vmatprep.subr.bf16.mxu0 %v1387_v18  ;;  %v1229_v47 = vld [vmem:[%s2122_s1 + $0x290] sm:$0xff]  ;;  %v240_v48 = vld [vmem:[%s2122_s1 + $0x68] sm:$0xff]  ;;  %v1231_v58 = vld [vmem:[%s2122_s1 + $0x2a0] sm:$0xff] }
  0x20   : > { %1183 = vmatmul.mubr.msk.f32.vlgmr.msra.gmra.mrb[0].mxu1 %vm280_vm0, %v251_v24  ;;  %v1232_v50 = vld [vmem:[%s2122_s1 + $0x2a8] sm:$0xff]  ;;  %v253_v54 = vld [vmem:[%s1727_s12 + $0x11] sm:$0xff]  ;;  %v1397_v55 = vpack.c.bf16 %v1229_v47, %v1227_v44  ;;  %v1351_v56 = vpack.c.bf16 %v242_v49, %v240_v48  ;;  %v243_v3 = vld [vmem:[%s2122_s1 + $0x80] sm:$0xff] }
  0x21   : > { %1342 = vmatpush1.bf16.msra.mxu1 %v1341_v25  ;;  %1215 = vmatmul.mubr.msk.f32.vlgmr.msra.gmra.mrb[0].mxu0 %vm280_vm0, %v483_v26  ;;  %v241_v57 = vld [vmem:[%s2122_s1 + $0x70] sm:$0xff]  ;;  %v1399_v60 = vpack.c.bf16 %v1234_v51, %v1232_v50  ;;  %v244_v62 = vld [vmem:[%s2122_s1 + $0x88] sm:$0xff]  ;;  %v246_v63 = vld [vmem:[%s2122_s1 + $0x98] sm:$0xff] }
  0x22   : > { %1390 = vmatpush1.bf16.msra.mxu0 %v1389_v27  ;;  %1344 = vmatprep.subr.bf16.mxu1 %v1343_v28  ;;  %v485_v59 = vld [vmem:[%s1727_s12 + $0x12] sm:$0xff]  ;;  %v1236_v0 = vld [vmem:[%s2122_s1 + $0x2c8] sm:$0xff]  ;;  %v1353_v2 = vpack.c.bf16 %v241_v57, %v239_v53  ;;  %v1355_v6 = vpack.c.bf16 %v246_v63, %v244_v62  ;;  %v1235_v9 = vld [vmem:[%s2122_s1 + $0x2c0] sm:$0xff] }
  0x23   : > { %1392 = vmatprep.subr.bf16.mxu0 %v1391_v32  ;;  %363 = vmatprep.mubr.f32.mxu1 %v1517_v7  ;;  %v1233_v61 = vld [vmem:[%s2122_s1 + $0x2b0] sm:$0xff]  ;;  %v1238_v1 = vld [vmem:[%s2122_s1 + $0x2d8] sm:$0xff]  ;;  %v248_v13 = vld [vmem:[%s2122_s1 + $0xa8] sm:$0xff] }
  0x24   : > { %1184 = vmatmul.mubr.msk.f32.gmra.mrb[2].mxu1 %vm280_vm0, %v252_v40  ;;  %594 = vmatprep.mubr.f32.mxu0 %v1517_v7  ;;  %v254_v4 = vld [vmem:[%s1727_s12 + $0x19] sm:$0xf]  ;;  %v1401_v5 = vpack.c.bf16 %v1233_v61, %v1231_v58  ;;  %v245_v8 = vld [vmem:[%s2122_s1 + $0x90] sm:$0xff]  ;;  %v1403_v11 = vpack.c.bf16 %v1238_v1, %v1236_v0  ;;  %v1240_v15 = vld [vmem:[%s2122_s1 + $0x2e8] sm:$0xff] }
  0x25   : > { %1346 = vmatpush1.bf16.msra.mxu1 %v1345_v38  ;;  %1216 = vmatmul.mubr.msk.f32.gmra.mrb[2].mxu0 %vm280_vm0, %v484_v45  ;;  %v486_v10 = vld [vmem:[%s1727_s12 + $0x1a] sm:$0xf]  ;;  %v1237_v12 = vld [vmem:[%s2122_s1 + $0x2d0] sm:$0xff]  ;;  %v1357_v17 = vpack.c.bf16 %v245_v8, %v243_v3  ;;  %v247_v20 = vld [vmem:[%s2122_s1 + $0xa0] sm:$0xff] }
  0x26   : > { %1394 = vmatpush1.bf16.msra.mxu0 %v1393_v41  ;;  %1348 = vmatprep.subr.bf16.mxu1 %v1347_v42  ;;  %v250_v14 = vld [vmem:[%s2122_s1 + $0xb8] sm:$0xff]  ;;  %v1405_v18 = vpack.c.bf16 %v1237_v12, %v1235_v9  ;;  %v249_v21 = vld [vmem:[%s2122_s1 + $0xb0] sm:$0xff]  ;;  %v1239_v23 = vld [vmem:[%s2122_s1 + $0x2e0] sm:$0xff] }
  0x27   : > { %1396 = vmatprep.subr.bf16.mxu0 %v1395_v46  ;;  %369 = vmatprep.mubr.f32.mxu1 %v1517_v7  ;;  %v1242_v16 = vld [vmem:[%s2122_s1 + $0x2f8] sm:$0xff]  ;;  %v1359_v19 = vpack.c.bf16 %v250_v14, %v248_v13  ;;  %v1241_v24 = vld [vmem:[%s2122_s1 + $0x2f0] sm:$0xff]  ;;  %v1248_v25 = vld [vmem:[%s2122_s1 + $0x308] sm:$0xff]  ;;  %v1361_v27 = vpack.c.bf16 %v249_v21, %v247_v20 }
  0x28   : > { %1185 = vmatmul.mubr.msk.f32.gmra.mrb[4].mxu1 %vm280_vm0, %v253_v54  ;;  %600 = vmatprep.mubr.f32.mxu0 %v1517_v7  ;;  %v1407_v22 = vpack.c.bf16 %v1242_v16, %v1240_v15  ;;  %v1250_v26 = vld [vmem:[%s2122_s1 + $0x318] sm:$0xff]  ;;  %v1409_v28 = vpack.c.bf16 %v1241_v24, %v1239_v23  ;;  %v1247_v30 = vld [vmem:[%s2122_s1 + $0x300] sm:$0xff]  ;;  %v1249_v31 = vld [vmem:[%s2122_s1 + $0x310] sm:$0xff] }
  0x29   : > { %1350 = vmatpush1.bf16.msra.mxu1 %v1349_v52  ;;  %1217 = vmatmul.mubr.msk.f32.gmra.mrb[4].mxu0 %vm280_vm0, %v485_v59  ;;  %v1411_v29 = vpack.c.bf16 %v1250_v26, %v1248_v25  ;;  %v1252_v32 = vld [vmem:[%s2122_s1 + $0x328] sm:$0xff]  ;;  %v1254_v33 = vld [vmem:[%s2122_s1 + $0x338] sm:$0xff]  ;;  %v223_v34 = vld [vmem:[%s1727_s12] sm:$0xff]  ;;  %v1413_v36 = vpack.c.bf16 %v1249_v31, %v1247_v30 }
  0x2a   : > { %1398 = vmatpush1.bf16.msra.mxu0 %v1397_v55  ;;  %1352 = vmatprep.subr.bf16.mxu1 %v1351_v56  ;;  %v621_v35 = vld [vmem:[%s1727_s12 + $0x3] sm:$0xff]  ;;  %v1415_v37 = vpack.c.bf16 %v1254_v33, %v1252_v32  ;;  %v1253_v39 = vld [vmem:[%s2122_s1 + $0x330] sm:$0xff]  ;;  %v1258_v41 = vld [vmem:[%s2122_s1 + $0x358] sm:$0xff] }
  0x2b   : > { %1400 = vmatprep.subr.bf16.mxu0 %v1399_v60  ;;  %375 = vmatprep.mubr.f32.mxu1 %v1517_v7  ;;  %v1251_v38 = vld [vmem:[%s2122_s1 + $0x320] sm:$0xff]  ;;  %v1256_v40 = vld [vmem:[%s2122_s1 + $0x348] sm:$0xff]  ;;  %v1257_v47 = vld [vmem:[%s2122_s1 + $0x350] sm:$0xff] }
  0x2c   : > { %1186 = vmatmul.mubr.msk.f32.gmra.mrb[6].mxu1 %vm280_vm0, %v254_v4  ;;  %606 = vmatprep.mubr.f32.mxu0 %v1517_v7  ;;  %v224_v42 = vld [vmem:[%s1727_s12 + $0x8] sm:$0xff]  ;;  %v1417_v43 = vpack.c.bf16 %v1253_v39, %v1251_v38  ;;  %v1419_v45 = vpack.c.bf16 %v1258_v41, %v1256_v40  ;;  %v1255_v46 = vld [vmem:[%s2122_s1 + $0x340] sm:$0xff]  ;;  %v1262_v49 = vld [vmem:[%s2122_s1 + $0x378] sm:$0xff] }
  0x2d   : > { %1354 = vmatpush1.bf16.msra.mxu1 %v1353_v2  ;;  %1218 = vmatmul.mubr.msk.f32.gmra.mrb[6].mxu0 %vm280_vm0, %v486_v10  ;;  %v622_v44 = vld [vmem:[%s1727_s12 + $0xb] sm:$0xff]  ;;  %v1421_v51 = vpack.c.bf16 %v1257_v47, %v1255_v46  ;;  %v623_v52 = vld [vmem:[%s1727_s12 + $0x13] sm:$0xff]  ;;  %v1259_v54 = vld [vmem:[%s2122_s1 + $0x360] sm:$0xff] }
  0x2e   : > { %1402 = vmatpush1.bf16.msra.mxu0 %v1401_v5  ;;  %1356 = vmatprep.subr.bf16.mxu1 %v1355_v6  ;;  %v1260_v48 = vld [vmem:[%s2122_s1 + $0x368] sm:$0xff]  ;;  %v225_v50 = vld [vmem:[%s1727_s12 + $0x10] sm:$0xff]  ;;  %v1266_v57 = vld [vmem:[%s2122_s1 + $0x398] sm:$0xff] }
  0x2f   : > { %1404 = vmatprep.subr.bf16.mxu0 %v1403_v11  ;;  %458 = vmatprep.mubr.f32.mxu1 %v1517_v7  ;;  %v1423_v53 = vpack.c.bf16 %v1262_v49, %v1260_v48  ;;  %v1261_v55 = vld [vmem:[%s2122_s1 + $0x370] sm:$0xff]  ;;  %v1264_v56 = vld [vmem:[%s2122_s1 + $0x388] sm:$0xff]  ;;  %v226_v58 = vld [vmem:[%s1727_s12 + $0x18] sm:$0xf] }
  0x30   : > { %726 = vmatprep.mubr.f32.mxu0 %v1517_v7  ;;  %v1425_v59 = vpack.c.bf16 %v1261_v55, %v1259_v54  ;;  %v624_v60 = vld [vmem:[%s1727_s12 + $0x1b] sm:$0xf]  ;;  %v1427_v61 = vpack.c.bf16 %v1266_v57, %v1264_v56  ;;  %v1263_v62 = vld [vmem:[%s2122_s1 + $0x380] sm:$0xff]  ;;  %v1265_v63 = vld [vmem:[%s2122_s1 + $0x390] sm:$0xff] }
  0x31   : > { %1358 = vmatpush1.bf16.msra.mxu1 %v1357_v17  ;;  %v1268_v0 = vld [vmem:[%s2122_s1 + $0x3a8] sm:$0xff]  ;;  %v1270_v1 = vld [vmem:[%s2122_s1 + $0x3b8] sm:$0xff]  ;;  %v1429_v2 = vpack.c.bf16 %v1265_v63, %v1263_v62  ;;  %v1267_v4 = vld [vmem:[%s2122_s1 + $0x3a0] sm:$0xff] }
  0x32   : > { %1406 = vmatpush1.bf16.msra.mxu0 %v1405_v18  ;;  %1360 = vmatprep.subr.bf16.mxu1 %v1359_v19  ;;  %v1431_v3 = vpack.c.bf16 %v1270_v1, %v1268_v0  ;;  %v1269_v5 = vld [vmem:[%s2122_s1 + $0x3b0] sm:$0xff]  ;;  %v759_v8 = vld [vmem:[%s1727_s12 + $0x4] sm:$0xff]  ;;  %v762_v11 = vld [vmem:[%s1727_s12 + $0x1c] sm:$0xf] }
  0x33   : > { %1408 = vmatprep.subr.bf16.mxu0 %v1407_v22  ;;  %v1433_v6 = vpack.c.bf16 %v1269_v5, %v1267_v4  ;;  %v760_v9 = vld [vmem:[%s1727_s12 + $0xc] sm:$0xff]  ;;  %v761_v10 = vld [vmem:[%s1727_s12 + $0x14] sm:$0xff]  ;;  %v993_v12 = vld [vmem:[%s2124_s3 + $0x80] sm:$0xff] }
  0x34   : > { %v994_v13 = vld [vmem:[%s2124_s3 + $0x88] sm:$0xff]  ;;  %v977_v15 = vld [vmem:[%s2124_s3] sm:$0xff]  ;;  %v995_v17 = vld [vmem:[%s2124_s3 + $0x90] sm:$0xff] }
  0x35   : > { %1362 = vmatpush1.bf16.msra.mxu1 %v1361_v27  ;;  %v1435_v14 = vpack.c.bf16 %v994_v13, %v993_v12  ;;  %v996_v18 = vld [vmem:[%s2124_s3 + $0x98] sm:$0xff]  ;;  %v979_v20 = vld [vmem:[%s2124_s3 + $0x10] sm:$0xff]  ;;  %v997_v23 = vld [vmem:[%s2124_s3 + $0xa0] sm:$0xff] }
  0x36   : > { %1410 = vmatpush1.bf16.msra.mxu0 %v1409_v28  ;;  %v1439_v19 = vpack.c.bf16 %v996_v18, %v995_v17  ;;  %v980_v21 = vld [vmem:[%s2124_s3 + $0x18] sm:$0xff]  ;;  %v998_v24 = vld [vmem:[%s2124_s3 + $0xa8] sm:$0xff]  ;;  %v981_v26 = vld [vmem:[%s2124_s3 + $0x20] sm:$0xff] }
  0x37   : > { %1412 = vmatprep.subr.bf16.mxu0 %v1411_v29  ;;  %1436 = vmatprep.subr.bf16.mxu1 %v1435_v14  ;;  %v1441_v22 = vpack.c.bf16 %v980_v21, %v979_v20  ;;  %v1443_v25 = vpack.c.bf16 %v998_v24, %v997_v23  ;;  %v982_v27 = vld [vmem:[%s2124_s3 + $0x28] sm:$0xff]  ;;  %v999_v29 = vld [vmem:[%s2124_s3 + $0xb0] sm:$0xff]  ;;  %v1000_v30 = vld [vmem:[%s2124_s3 + $0xb8] sm:$0xff] }
  0x38   : > { %1187 = vmatmul.mubr.msk.f32.vlgmr.msra.gmra.mrb[0].mxu1 %vm280_vm0, %v223_v34  ;;  %v1445_v28 = vpack.c.bf16 %v982_v27, %v981_v26  ;;  %v1447_v31 = vpack.c.bf16 %v1000_v30, %v999_v29  ;;  %v983_v32 = vld [vmem:[%s2124_s3 + $0x30] sm:$0xff]  ;;  %v984_v33 = vld [vmem:[%s2124_s3 + $0x38] sm:$0xff]  ;;  %v985_v38 = vld [vmem:[%s2124_s3 + $0x40] sm:$0xff] }
  0x39   : > { %1243 = vmatmul.mubr.msk.f32.vlgmr.msra.gmra.mrb[0].mxu0 %vm280_vm0, %v621_v35  ;;  %464 = vmatprep.mubr.f32.mxu1 %v1517_v7  ;;  %v1449_v34 = vpack.c.bf16 %v984_v33, %v983_v32  ;;  %v1001_v35 = vld [vmem:[%s2124_s3 + $0xc0] sm:$0xff]  ;;  %v986_v39 = vld [vmem:[%s2124_s3 + $0x48] sm:$0xff]  ;;  %v1003_v41 = vld [vmem:[%s2124_s3 + $0xd0] sm:$0xff] }
  0x3a   : > { %1414 = vmatpush1.bf16.msra.mxu0 %v1413_v36  ;;  %732 = vmatprep.mubr.f32.mxu0 %v1517_v7  ;;  %v1002_v36 = vld [vmem:[%s2124_s3 + $0xc8] sm:$0xff]  ;;  %v1453_v40 = vpack.c.bf16 %v986_v39, %v985_v38  ;;  %v1005_v47 = vld [vmem:[%s2124_s3 + $0xe0] sm:$0xff]  ;;  %v991_v56 = vld [vmem:[%s2124_s3 + $0x70] sm:$0xff] }
  0x3b   : > { %1416 = vmatprep.subr.bf16.mxu0 %v1415_v37  ;;  %v1451_v37 = vpack.c.bf16 %v1002_v36, %v1001_v35  ;;  %v1006_v48 = vld [vmem:[%s2124_s3 + $0xe8] sm:$0xff]  ;;  %v989_v49 = vld [vmem:[%s2124_s3 + $0x60] sm:$0xff]  ;;  %v992_v57 = vld [vmem:[%s2124_s3 + $0x78] sm:$0xff] }
  0x3c   : > { %1188 = vmatmul.mubr.msk.f32.gmra.mrb[2].mxu1 %vm280_vm0, %v224_v42  ;;  %v1004_v42 = vld [vmem:[%s2124_s3 + $0xd8] sm:$0xff] }
  0x3d   : > { %1244 = vmatmul.mubr.msk.f32.gmra.mrb[2].mxu0 %vm280_vm0, %v622_v44  ;;  %470 = vmatprep.mubr.f32.mxu1 %v1517_v7  ;;  %v987_v44 = vld [vmem:[%s2124_s3 + $0x50] sm:$0xff] }
  0x3e   : > { %1418 = vmatpush1.bf16.msra.mxu0 %v1417_v43  ;;  %738 = vmatprep.mubr.f32.mxu0 %v1517_v7  ;;  %v1455_v43 = vpack.c.bf16 %v1004_v42, %v1003_v41 }
  0x3f   : > { %1420 = vmatprep.subr.bf16.mxu0 %v1419_v45  ;;  %v988_v45 = vld [vmem:[%s2124_s3 + $0x58] sm:$0xff] }
  0x40   : > { %1189 = vmatmul.mubr.msk.f32.gmra.mrb[4].mxu1 %vm280_vm0, %v225_v50  ;;  %v1457_v46 = vpack.c.bf16 %v988_v45, %v987_v44  ;;  %v1459_v50 = vpack.c.bf16 %v1006_v48, %v1005_v47 }
  0x41   : > { %1245 = vmatmul.mubr.msk.f32.gmra.mrb[4].mxu0 %vm280_vm0, %v623_v52  ;;  %476 = vmatprep.mubr.f32.mxu1 %v1517_v7  ;;  %v1007_v52 = vld [vmem:[%s2124_s3 + $0xf0] sm:$0xff] }
  0x42   : > { %1422 = vmatpush1.bf16.msra.mxu0 %v1421_v51  ;;  %744 = vmatprep.mubr.f32.mxu0 %v1517_v7  ;;  %v990_v51 = vld [vmem:[%s2124_s3 + $0x68] sm:$0xff] }
  0x43   : > { %1424 = vmatprep.subr.bf16.mxu0 %v1423_v53  ;;  %v1008_v53 = vld [vmem:[%s2124_s3 + $0xf8] sm:$0xff]  ;;  %v1461_v54 = vpack.c.bf16 %v990_v51, %v989_v49 }
  0x44   : > { %1190 = vmatmul.mubr.msk.f32.gmra.mrb[6].mxu1 %vm280_vm0, %v226_v58  ;;  %v1463_v55 = vpack.c.bf16 %v1008_v53, %v1007_v52  ;;  %v1465_v58 = vpack.c.bf16 %v992_v57, %v991_v56 }
  0x45   : > { %1246 = vmatmul.mubr.msk.f32.gmra.mrb[6].mxu0 %vm280_vm0, %v624_v60 }
  0x46   : > { %1426 = vmatpush1.bf16.msra.mxu0 %v1425_v59  ;;  %864 = vmatprep.mubr.f32.mxu0 %v1517_v7 }
  0x47   : > { %1428 = vmatprep.subr.bf16.mxu0 %v1427_v61 }
  0x4a   : > { %1430 = vmatpush1.bf16.msra.mxu0 %v1429_v2  ;;  %v899_v2 = vlaneseq }
  0x4b   : > { %1432 = vmatprep.subr.bf16.mxu0 %v1431_v3 }
  0x4c   : > { %v900_v4 = vshrl.u32 %v899_v2, 7 }
  0x4e   : > { %1434 = vmatpush1.bf16.msra.mxu0 %v1433_v6  ;;  %v901_v5 = vsub.s32 0, %v900_v4  ;;  %v897_v6 = vld [vmem:[%s2123_s2] sm:$0x3] }
  0x51   : > { %1271 = vmatmul.mubr.msk.f32.vlgmr.msra.gmra.mrb[0].mxu0 %vm280_vm0, %v759_v8  ;;  %v905_v8 = vsub.s32 1, %v900_v4 }
  0x52   : > { %870 = vmatprep.mubr.f32.mxu0 %v1517_v7 }
  0x55   : > { %1272 = vmatmul.mubr.msk.f32.gmra.mrb[2].mxu0 %vm280_vm0, %v760_v9  ;;  %v902_v9 = vrot.slane %v897_v6, %v901_v5 }
  0x56   : > { %876 = vmatprep.mubr.f32.mxu0 %v1517_v7 }
  0x59   : > { %1273 = vmatmul.mubr.msk.f32.gmra.mrb[4].mxu0 %vm280_vm0, %v761_v10 }
  0x5a   : > { %882 = vmatprep.mubr.f32.mxu0 %v1517_v7  ;;  %v978_v7 = vld [vmem:[%s2124_s3 + $0x8] sm:$0xff] }
  0x5b   : > { %v1437_v16 = vpack.c.bf16 %v978_v7, %v977_v15 }
  0x5d   : > { %1274 = vmatmul.mubr.msk.f32.gmra.mrb[6].mxu0 %vm280_vm0, %v762_v11  ;;  %1438 = vmatpush3.bf16.msra.mxu1 %v1437_v16  ;;  %v906_v11 = vrot.slane %v897_v6, %v905_v8 }
  0x5e   : > { %1440 = vmatprep.subr.bf16.mxu1 %v1439_v19 }
  0x61   : > { %1442 = vmatpush3.bf16.msra.mxu1 %v1441_v22 }
  0x62   : > { %1444 = vmatprep.subr.bf16.mxu1 %v1443_v25 }
  0x65   : > { %1446 = vmatpush3.bf16.msra.mxu1 %v1445_v28 }
  0x66   : > { %1448 = vmatprep.subr.bf16.mxu1 %v1447_v31 }
  0x69   : > { %1450 = vmatpush3.bf16.msra.mxu1 %v1449_v34 }
  0x6a   : > { %1452 = vmatprep.subr.bf16.mxu1 %v1451_v37 }
  0x6d   : > { %1454 = vmatpush3.bf16.msra.mxu1 %v1453_v40 }
  0x6e   : > { %1456 = vmatprep.subr.bf16.mxu1 %v1455_v43 }
  0x71   : > { %1458 = vmatpush3.bf16.msra.mxu1 %v1457_v46 }
  0x72   : > { %1460 = vmatprep.subr.bf16.mxu1 %v1459_v50 }
  0x75   : > { %1462 = vmatpush3.bf16.msra.mxu1 %v1461_v54 }
  0x76   : > { %1464 = vmatprep.subr.bf16.mxu1 %v1463_v55 }
  0x79   : > { %1466 = vmatpush3.bf16.msra.mxu1 %v1465_v58 }
 0x10b   : > { %v460_v59 = vpop.f32.mrb[0].mxu1 }
 0x10c   : > { %v462_v60 = vpop.f32.mrb[1].mxu1 }
 0x10f   : > { %v466_v61 = vpop.f32.mrb[2].mxu1 }
 0x110   : > { %v468_v62 = vpop.f32.mrb[3].mxu1 }
 0x113   : > { %v472_v63 = vpop.f32.mrb[4].mxu1 }
 0x114   : > { %v474_v0 = vpop.f32.mrb[5].mxu1 }
 0x117   : > { %v478_v1 = vpop.f32.mrb[6].mxu1 }
 0x118   : > { %v480_v3 = vpop.f32.mrb[7].mxu1 }
 0x124   : > { %v866_v10 = vpop.f32.mrb[0].mxu0 }
 0x125   : > { %v1467_v12 = vadd.f32 %v866_v10, %v460_v59  ;;  %v868_v13 = vpop.f32.mrb[1].mxu0 }
 0x126   : > { %v1468_v14 = vadd.f32 %v868_v13, %v462_v60 }
 0x127   : > { %v909_v15 = vadd.f32 %v1467_v12, %v902_v9 }
 0x128   : > { %v910_v7 = vadd.f32 %v1468_v14, %v906_v11  ;;  %v872_v16 = vpop.f32.mrb[2].mxu0 }
 0x129   : > { %917 = vst [vmem:[%s2094_s28] sm:$0xff] %v909_v15  ;;  %v1469_v17 = vadd.f32 %v872_v16, %v466_v61  ;;  %v874_v18 = vpop.f32.mrb[3].mxu0  ;;  %v946_v23 = vmul.f32 %v909_v15, %v909_v15 }
 0x12a   : > { %918 = vst [vmem:[%s2094_s28 + $0x8] sm:$0xff] %v910_v7  ;;  %v1470_v19 = vadd.f32 %v874_v18, %v468_v62  ;;  %v947_v28 = vmul.f32 %v910_v7, %v910_v7 }
 0x12b   : > { %v911_v20 = vadd.f32 %v1469_v17, %v902_v9 }
 0x12c   : > { %v912_v21 = vadd.f32 %v1470_v19, %v906_v11  ;;  %v878_v22 = vpop.f32.mrb[4].mxu0 }
 0x12d   : > { %919 = vst [vmem:[%s2094_s28 + $0x10] sm:$0xff] %v911_v20  ;;  %v925_v24 = vadd.f32 %v911_v20, %v909_v15  ;;  %v948_v25 = vmul.f32 %v911_v20, %v911_v20  ;;  %v1471_v26 = vadd.f32 %v878_v22, %v472_v63  ;;  %v880_v27 = vpop.f32.mrb[5].mxu0 }
 0x12e   : > { %920 = vst [vmem:[%s2094_s28 + $0x18] sm:$0xff] %v912_v21  ;;  %v936_v29 = vadd.f32 %v912_v21, %v910_v7  ;;  %v949_v30 = vmul.f32 %v912_v21, %v912_v21  ;;  %v1472_v31 = vadd.f32 %v880_v27, %v474_v0 }
 0x12f   : > { %v954_v32 = vadd.f32 %v948_v25, %v946_v23  ;;  %v913_v33 = vadd.f32 %v1471_v26, %v902_v9  ;;  %v1518_v23 = vmov (!%p1275_p4), 0.0  }
 0x130   : > { %v964_v34 = vadd.f32 %v949_v30, %v947_v28  ;;  %v914_v35 = vadd.f32 %v1472_v31, %v906_v11  ;;  %v884_v36 = vpop.f32.mrb[6].mxu0  ;;  %1084 = vst.msk [vmem:[%s2126_s5] sm:$0x3] (!%p1275_p4), %vm1083_vm3, %v1518_v23 }
 0x131   : > { %921 = vst [vmem:[%s2094_s28 + $0x20] sm:$0xff] %v913_v33  ;;  %v926_v37 = vadd.f32 %v925_v24, %v913_v33  ;;  %v950_v38 = vmul.f32 %v913_v33, %v913_v33  ;;  %v1473_v39 = vadd.f32 %v884_v36, %v478_v1  ;;  %v886_v40 = vpop.f32.mrb[7].mxu0 }
 0x132   : > { %922 = vst [vmem:[%s2094_s28 + $0x28] sm:$0xff] %v914_v35  ;;  %v937_v41 = vadd.f32 %v936_v29, %v914_v35  ;;  %v951_v42 = vmul.f32 %v914_v35, %v914_v35  ;;  %v1474_v43 = vadd.f32 %v886_v40, %v480_v3 }
 0x133   : > { %v955_v44 = vadd.f32 %v954_v32, %v950_v38  ;;  %v915_v45 = vadd.f32 %v1473_v39, %v902_v9 }
 0x134   : > { %v965_v46 = vadd.f32 %v964_v34, %v951_v42  ;;  %v916_v47 = vadd.f32 %v1474_v43, %v906_v11 }
 0x135   : > { %923 = vst [vmem:[%s2094_s28 + $0x30] sm:$0xf] %v915_v45  ;;  %v928_v48 = vsel %vm927_vm1, %v915_v45, 0.0  ;;  %v952_v49 = vmul.f32 %v915_v45, %v915_v45 }
 0x136   : > { %v929_v50 = vadd.f32 %v928_v48, %v926_v37  ;;  %924 = vst [vmem:[%s2094_s28 + $0x38] sm:$0xf] %v916_v47  ;;  %v938_v51 = vsel %vm927_vm1, %v916_v47, 0.0  ;;  %v953_v52 = vmul.f32 %v916_v47, %v916_v47 }
 0x137   : > { %v956_v53 = vsel %vm927_vm1, %v952_v49, 0.0  ;;  %v939_v54 = vadd.f32 %v938_v51, %v937_v41 }
 0x138   : > { %v930_v55 = vrot.slane %v929_v50, 4  ;;  %v957_v56 = vadd.f32 %v956_v53, %v955_v44  ;;  %v966_v57 = vsel %vm927_vm1, %v953_v52, 0.0 }
 0x139   : > { %v940_v58 = vrot.slane %v939_v54, 4  ;;  %v967_v59 = vadd.f32 %v966_v57, %v965_v46 }
 0x13a   : > { %v931_v60 = vadd.f32 %v930_v55, %v929_v50  ;;  %v958_v61 = vrot.slane %v957_v56, 4 }
 0x13b   : > { %v941_v62 = vadd.f32 %v940_v58, %v939_v54  ;;  %v968_v63 = vrot.slane %v967_v59, 4 }
 0x13c   : > { %v932_v0 = vrot.slane %v931_v60, 2  ;;  %v959_v1 = vadd.f32 %v958_v61, %v957_v56 }
 0x13d   : > { %v942_v2 = vrot.slane %v941_v62, 2  ;;  %v969_v3 = vadd.f32 %v968_v63, %v967_v59 }
 0x13e   : > { %v933_v4 = vadd.f32 %v932_v0, %v931_v60  ;;  %v960_v5 = vrot.slane %v959_v1, 2 }
 0x13f   : > { %v943_v6 = vadd.f32 %v942_v2, %v941_v62  ;;  %v970_v8 = vrot.slane %v969_v3, 2 }
 0x140   : > { %v934_v9 = vrot.slane %v933_v4, 1  ;;  %v961_v10 = vadd.f32 %v960_v5, %v959_v1 }
 0x141   : > { %v944_v11 = vrot.slane %v943_v6, 1  ;;  %v971_v12 = vadd.f32 %v970_v8, %v969_v3 }
 0x142   : > { %v962_v13 = vrot.slane %v961_v10, 1  ;;  %v935_v15 = vadd.f32 %v934_v9, %v933_v4 }
 0x143   : > { %v972_v14 = vrot.slane %v971_v12, 1  ;;  %v945_v16 = vadd.f32 %v944_v11, %v943_v6 }
 0x144   : > { %v963_v7 = vadd.f32 %v962_v13, %v961_v10 }
 0x145   : > { %v973_v17 = vadd.f32 %v972_v14, %v971_v12 }
 0x146   : > { %v975_v18 = vsel %vm974_vm2, %v935_v15, %v963_v7 }
 0x147   : > { %v976_v19 = vsel %vm974_vm2, %v945_v16, %v973_v17 }
 0x148   : > { %1073 = vmatprep.mubr.f32.mxu1 %v976_v19 }
 0x149   : > { %1074 = vmatmul.mubr.f32.vlgmr.msra.gmra.mrb[8].mxu1 %v975_v18 }
 0x218   : > { %1082 = sbr.rel (%p1275_p4) target bundleno = 543 (0x21f), region = 40 }
 0x21c   : > { %v1312_v20 = vpop.f32.mrb[8].mxu1 }
 0x21d   : > { %v1313_v21 = vpop.f32.mrb[9].mxu1 }
 0x21e   : > { %v1314_v22 = vadd.f32 %v1313_v21, %v1312_v20 }
 0x21f PF: > { %v1085_v24 = vld [vmem:[%s2126_s5] sm:$0x3]  ;;  %vm1087_vm4 = vcmask 41984  }
 0x220   : > { %v1086_v25 = vadd.f32 %v1314_v22, %v1085_v24 }
 0x222   : > { %1088 = vst.msk [vmem:[%s2126_s5] sm:$0x3] %vm1087_vm4, %v1086_v25 }
 0x223 PF: > { %s16_s18 = sadd.s32 1, %s1515_s18  }
 0x224   : > { %p13_p5 = scmp.ge.s32.totalorder %s16_s18, 4  }
 0x226   :  { %15 = sbr.rel (!%p13_p5) target bundleno = 1 (0x1), region = 82 }

// kernel: lenet_bn_forward.5
= control target key start
LH: loop header
LB: loop body
LE: loop exit
PB: predicated region body
PF: predicated region fallthrough
CT: control target
= control target key end

     0   :  { %s1301_s21 = smov 0   ;;  %s1554_s0 = inlined_call_operand.vmem [shape: f32[2,28,256], index: 0, kind: input, shape index: {}]   ;;  %s1555_s1 = inlined_call_operand.vmem [shape: f32[2,6], index: 1, kind: input, shape index: {}]   ;;  %s1556_s2 = inlined_call_operand.vmem [shape: f32[6,256], index: 2, kind: input, shape index: {}]   ;;  %s1557_s3 = inlined_call_operand.vmem [shape: f32[2,256], index: 3, kind: input, shape index: {}]   ;;  %s1558_s4 = inlined_call_operand.vmem [shape: f32[2,256,128], index: 4, kind: input, shape index: {}]   ;;  %s1559_s5 = inlined_call_operand.vmem [shape: f32[2,14,28], index: 5, kind: input, shape index: {}]   ;;  %s1560_s6 = inlined_call_operand.vmem [shape: f32[2,14,128], index: 6, kind: output, shape index: {}]  }
   0x1 LB: > { %s976_s22 = sadd.s32 4294967295, %s1261_s21   ;;  %p980_p0 = scmp.ge.s32.totalorder %s1261_s21, 1  ;;  %s1261_s21 = sphi %s1301_s21, %s16_s21  }
   0x2   : > { %p212_p1 = scmp.lt.s32.totalorder %s1261_s21, 3 }
   0x4   : > { %p213_p2 = pnand %p980_p0, %p212_p1 }
   0x5   : > { %v261_v0 = vld [vmem:[%s1556_s2 + $0x8] sm:$0x3f] (!%p213_p2)  ;;  %vm266_vm0 = vcmask (!%p213_p2), 1045504   ;;  %v260_v1 = vld [vmem:[%s1556_s2] sm:$0x3f] (!%p213_p2)  ;;  %vm262_vm1 = vcmask (!%p213_p2), 48128  }
   0x6   : > { %216 = sbr.rel (%p213_p2) target bundleno = 709 (0x2c5), region = 44  ;;  %988 = vmatprep.subr.msk.mxu1 (!%p213_p2), %vm266_vm0, %v261_v0  ;;  %985 = vmatprep.subr.msk.mxu0 (!%p213_p2), %vm266_vm0, %v261_v0  ;;  %v252_v2 = vld [vmem:[%s1555_s1] sm:$0x1] (!%p213_p2)  ;;  %v254_v3 = vld [vmem:[%s1555_s1 + $0x1] sm:$0x1] (!%p213_p2)  ;;  %v1263_v5 = vmov (!%p213_p2), 0.0  }
   0x7   : > { %v522_v4 = vld [vmem:[%s1558_s4 + $0x80] sm:$0xff] (!%p213_p2)  ;;  %989 = vmatpush1.msk.msra.mxu1 (!%p213_p2), %vm266_vm0, %v260_v1  ;;  %411 = vmatprep.mubr.f32.mxu1 (!%p213_p2), %v1263_v5  ;;  %v253_v6 = vmul.f32 (!%p213_p2), 0.0006377551, %v252_v2  ;;  %v255_v7 = vmul.f32 (!%p213_p2), 0.0006377551, %v254_v3  ;;  %v523_v8 = vld [vmem:[%s1558_s4 + $0x88] sm:$0xff] (!%p213_p2) }
   0x8   : > { %v1008_v9 = vld [vmem:[%s1558_s4 + $0x180] sm:$0xff] (!%p213_p2)  ;;  %986 = vmatpush1.msk.msra.mxu0 (!%p213_p2), %vm266_vm0, %v260_v1  ;;  %337 = vmatprep.mubr.f32.mxu0 (!%p213_p2), %v1263_v5  ;;  %v1158_v10 = vpack.c.bf16 (!%p213_p2), %v523_v8, %v522_v4  ;;  %v1009_v11 = vld [vmem:[%s1558_s4 + $0x188] sm:$0xff] (!%p213_p2)  ;;  %v524_v17 = vld [vmem:[%s1558_s4 + $0x90] sm:$0xff] (!%p213_p2)  ;;  %p242_p3 = scmp.lt.s32.totalorder (!%p213_p2), %s976_s22, 1  ;;  %vm747_vm2 = vcmask (!%p213_p2), 228352   ;;  %vm754_vm3 = vcmask (!%p213_p2), 1043456  }
   0x9   : > { %v506_v12 = vld [vmem:[%s1558_s4] sm:$0xff] (!%p213_p2)  ;;  %v507_v13 = vld [vmem:[%s1558_s4 + $0x8] sm:$0xff] (!%p213_p2)  ;;  %v256_v14 = vmul.f32 (!%p213_p2), %v253_v6, %v253_v6  ;;  %987 = vmatmul.mubr.msk.f32.vlgmr.msra.gmra.mrb[0].mxu0 (!%p213_p2), %vm262_vm1, %v253_v6  ;;  %v1190_v15 = vpack.c.bf16 (!%p213_p2), %v1009_v11, %v1008_v9  ;;  %v525_v18 = vld [vmem:[%s1558_s4 + $0x98] sm:$0xff] (!%p213_p2)  ;;  %vm1265_vm4 = vmmov (!%p213_p2), 1  }
   0xa   : > { %v1160_v16 = vpack.c.bf16 (!%p213_p2), %v507_v13, %v506_v12  ;;  %1159 = vmatprep.subr.bf16.mxu0 (!%p213_p2), %v1158_v10  ;;  %v1162_v20 = vpack.c.bf16 (!%p213_p2), %v525_v18, %v524_v17  ;;  %v508_v21 = vld [vmem:[%s1558_s4 + $0x10] sm:$0xff] (!%p213_p2)  ;;  %v509_v22 = vld [vmem:[%s1558_s4 + $0x18] sm:$0xff] (!%p213_p2)  ;;  %v526_v24 = vld [vmem:[%s1558_s4 + $0xa0] sm:$0xff] (!%p213_p2) }
   0xb   : > { %v257_v19 = vsub.f32 (!%p213_p2), %v255_v7, %v256_v14  ;;  %1191 = vmatprep.subr.bf16.mxu1 (!%p213_p2), %v1190_v15  ;;  %v1164_v23 = vpack.c.bf16 (!%p213_p2), %v509_v22, %v508_v21  ;;  %v527_v25 = vld [vmem:[%s1558_s4 + $0xa8] sm:$0xff] (!%p213_p2)  ;;  %v510_v28 = vld [vmem:[%s1558_s4 + $0x20] sm:$0xff] (!%p213_p2)  ;;  %v1010_v33 = vld [vmem:[%s1558_s4 + $0x190] sm:$0xff] (!%p213_p2) }
   0xc   : > { %1161 = vmatpush3.bf16.msra.mxu0 (!%p213_p2), %v1160_v16  ;;  %v1166_v27 = vpack.c.bf16 (!%p213_p2), %v527_v25, %v526_v24  ;;  %v511_v29 = vld [vmem:[%s1558_s4 + $0x28] sm:$0xff] (!%p213_p2)  ;;  %v992_v31 = vld [vmem:[%s1558_s4 + $0x100] sm:$0xff] (!%p213_p2)  ;;  %v1011_v34 = vld [vmem:[%s1558_s4 + $0x198] sm:$0xff] (!%p213_p2) }
   0xd   : > { %v258_v26 = vadd.f32 1e-05, %v257_v19  ;;  %1163 = vmatprep.subr.bf16.mxu0 %v1162_v20  ;;  %v1168_v30 = vpack.c.bf16 %v511_v29, %v510_v28  ;;  %v993_v32 = vld [vmem:[%s1558_s4 + $0x108] sm:$0xff]  ;;  %v1194_v36 = vpack.c.bf16 %v1011_v34, %v1010_v33  ;;  %v994_v37 = vld [vmem:[%s1558_s4 + $0x110] sm:$0xff]  ;;  %v995_v38 = vld [vmem:[%s1558_s4 + $0x118] sm:$0xff]  ;;  %s1562_s22 = smov (!%p242_p3, %s976_s22), 1 }
   0xe   : > { %v1192_v35 = vpack.c.bf16 %v993_v32, %v992_v31  ;;  %v1012_v40 = vld [vmem:[%s1558_s4 + $0x1a0] sm:$0xff]  ;;  %v1013_v41 = vld [vmem:[%s1558_s4 + $0x1a8] sm:$0xff]  ;;  %v1196_v42 = vpack.c.bf16 %v995_v38, %v994_v37  ;;  %v528_v47 = vld [vmem:[%s1558_s4 + $0xb0] sm:$0xff]  ;;  %s1034_s29 = sshll.u32 %s1562_s22, 6  ;;  %s1035_s19 = sshll.u32 %s1562_s22, 4 }
   0xf   : > { %1253 = vrsqrt.f32 %v258_v26  ;;  %v1198_v43 = vpack.c.bf16 %v1013_v41, %v1012_v40  ;;  %v996_v44 = vld [vmem:[%s1558_s4 + $0x120] sm:$0xff]  ;;  %v997_v45 = vld [vmem:[%s1558_s4 + $0x128] sm:$0xff]  ;;  %v529_v48 = vld [vmem:[%s1558_s4 + $0xb8] sm:$0xff]  ;;  %s246_s8 = scalar_lea.vmem %s1554_s0, %s1034_s29  ;;  %s251_s24 = scalar_lea.vmem %s1560_s6, %s1035_s19 }
  0x10   : > { %1165 = vmatpush3.bf16.msra.mxu0 %v1164_v23  ;;  %v1200_v46 = vpack.c.bf16 %v997_v45, %v996_v44  ;;  %v1170_v49 = vpack.c.bf16 %v529_v48, %v528_v47  ;;  %v1014_v50 = vld [vmem:[%s1558_s4 + $0x1b0] sm:$0xff]  ;;  %v1015_v51 = vld [vmem:[%s1558_s4 + $0x1b8] sm:$0xff]  ;;  %v530_v59 = vld [vmem:[%s1558_s4 + $0xc0] sm:$0xff]  ;;  %v420_v45 = vlaneseq }
  0x11   : > { %1167 = vmatprep.subr.bf16.mxu0 %v1166_v27  ;;  %v512_v52 = vld [vmem:[%s1558_s4 + $0x30] sm:$0xff]  ;;  %v1202_v53 = vpack.c.bf16 %v1015_v51, %v1014_v50  ;;  %v513_v54 = vld [vmem:[%s1558_s4 + $0x38] sm:$0xff]  ;;  %v531_v60 = vld [vmem:[%s1558_s4 + $0xc8] sm:$0xff]  ;;  %v1264_v50 = vmov 1966171168  }
  0x12   : > { %v998_v55 = vld [vmem:[%s1558_s4 + $0x130] sm:$0xff]  ;;  %v999_v56 = vld [vmem:[%s1558_s4 + $0x138] sm:$0xff]  ;;  %v1172_v57 = vpack.c.bf16 %v513_v54, %v512_v52  ;;  %v1016_v61 = vld [vmem:[%s1558_s4 + $0x1c0] sm:$0xff]  ;;  %v1174_v62 = vpack.c.bf16 %v531_v60, %v530_v59  ;;  %v440_v51 = vunpack.c.l.s4 %v1264_v50 }
  0x13   : > { %v1204_v58 = vpack.c.bf16 %v999_v56, %v998_v55  ;;  %v1017_v63 = vld [vmem:[%s1558_s4 + $0x1c8] sm:$0xff]  ;;  %v514_v0 = vld [vmem:[%s1558_s4 + $0x40] sm:$0xff]  ;;  %v532_v7 = vld [vmem:[%s1558_s4 + $0xd0] sm:$0xff] }
  0x14   : > { %1169 = vmatpush3.bf16.msra.mxu0 %v1168_v30  ;;  %v515_v1 = vld [vmem:[%s1558_s4 + $0x48] sm:$0xff]  ;;  %v1206_v2 = vpack.c.bf16 %v1017_v63, %v1016_v61  ;;  %v1000_v4 = vld [vmem:[%s1558_s4 + $0x140] sm:$0xff]  ;;  %v533_v8 = vld [vmem:[%s1558_s4 + $0xd8] sm:$0xff]  ;;  %v441_v55 = vunpack.c.0.s8 %v440_v51 }
  0x15   : > { %1171 = vmatprep.subr.bf16.mxu0 %v1170_v49  ;;  %v1176_v3 = vpack.c.bf16 %v515_v1, %v514_v0  ;;  %v1001_v5 = vld [vmem:[%s1558_s4 + $0x148] sm:$0xff]  ;;  %v1018_v9 = vld [vmem:[%s1558_s4 + $0x1d0] sm:$0xff]  ;;  %v1178_v10 = vpack.c.bf16 %v533_v8, %v532_v7  ;;  %v1019_v11 = vld [vmem:[%s1558_s4 + $0x1d8] sm:$0xff] }
  0x16   : > { %v1208_v6 = vpack.c.bf16 %v1001_v5, %v1000_v4  ;;  %v516_v12 = vld [vmem:[%s1558_s4 + $0x50] sm:$0xff]  ;;  %v517_v13 = vld [vmem:[%s1558_s4 + $0x58] sm:$0xff]  ;;  %v1210_v14 = vpack.c.bf16 %v1019_v11, %v1018_v9  ;;  %v534_v19 = vld [vmem:[%s1558_s4 + $0xe0] sm:$0xff] }
  0x17   : > { %v1180_v15 = vpack.c.bf16 %v517_v13, %v516_v12  ;;  %v1002_v16 = vld [vmem:[%s1558_s4 + $0x150] sm:$0xff]  ;;  %v1003_v17 = vld [vmem:[%s1558_s4 + $0x158] sm:$0xff]  ;;  %v535_v20 = vld [vmem:[%s1558_s4 + $0xe8] sm:$0xff] }
  0x18   : > { %1173 = vmatpush3.bf16.msra.mxu0 %v1172_v57  ;;  %v1212_v18 = vpack.c.bf16 %v1003_v17, %v1002_v16  ;;  %v1020_v21 = vld [vmem:[%s1558_s4 + $0x1e0] sm:$0xff]  ;;  %v1182_v22 = vpack.c.bf16 %v535_v20, %v534_v19  ;;  %v1021_v23 = vld [vmem:[%s1558_s4 + $0x1e8] sm:$0xff]  ;;  %v536_v31 = vld [vmem:[%s1558_s4 + $0xf0] sm:$0xff] }
  0x19   : > { %v1254_v39 = vpop.eup %1253  ;;  %1175 = vmatprep.subr.bf16.mxu0 %v1174_v62  ;;  %v518_v24 = vld [vmem:[%s1558_s4 + $0x60] sm:$0xff]  ;;  %v519_v25 = vld [vmem:[%s1558_s4 + $0x68] sm:$0xff]  ;;  %v1214_v26 = vpack.c.bf16 %v1021_v23, %v1020_v21  ;;  %v537_v32 = vld [vmem:[%s1558_s4 + $0xf8] sm:$0xff] }
  0x1a   : > { %990 = vmatmul.mubr.msk.f32.vlgmr.msra.gmra.mrb[0].mxu1 %vm262_vm1, %v1254_v39  ;;  %v1184_v27 = vpack.c.bf16 %v519_v25, %v518_v24  ;;  %v1004_v28 = vld [vmem:[%s1558_s4 + $0x160] sm:$0xff]  ;;  %v1005_v29 = vld [vmem:[%s1558_s4 + $0x168] sm:$0xff]  ;;  %v1022_v33 = vld [vmem:[%s1558_s4 + $0x1f0] sm:$0xff]  ;;  %v1186_v34 = vpack.c.bf16 %v537_v32, %v536_v31 }
  0x1b   : > { %1193 = vmatpush3.bf16.msra.mxu1 %v1192_v35  ;;  %v1216_v30 = vpack.c.bf16 %v1005_v29, %v1004_v28  ;;  %v1023_v35 = vld [vmem:[%s1558_s4 + $0x1f8] sm:$0xff]  ;;  %v1006_v40 = vld [vmem:[%s1558_s4 + $0x170] sm:$0xff]  ;;  %v418_v48 = vld [vmem:[%s1557_s3] ss:$2 sm:$0x3] }
  0x1c   : > { %1195 = vmatprep.subr.bf16.mxu1 %v1194_v36  ;;  %1177 = vmatpush3.bf16.msra.mxu0 %v1176_v3  ;;  %v520_v36 = vld [vmem:[%s1558_s4 + $0x70] sm:$0xff]  ;;  %v521_v37 = vld [vmem:[%s1558_s4 + $0x78] sm:$0xff]  ;;  %v1218_v38 = vpack.c.bf16 %v1023_v35, %v1022_v33  ;;  %v991_v1 = vld [vmem:[%s1557_s3 + $0x1] ss:$2 sm:$0x3] }
  0x1d   : > { %1179 = vmatprep.subr.bf16.mxu0 %v1178_v10  ;;  %v1188_v39 = vpack.c.bf16 %v521_v37, %v520_v36  ;;  %v1007_v41 = vld [vmem:[%s1558_s4 + $0x178] sm:$0xff]  ;;  %v455_v4 = vld [vmem:[%s246_s8] sm:$0xff]  ;;  %v457_v5 = vld [vmem:[%s246_s8 + $0x10] sm:$0xff] }
  0x1e   : > { %v458_v7 = vld [vmem:[%s246_s8 + $0x18] sm:$0xff]  ;;  %v460_v8 = vld [vmem:[%s246_s8 + $0x28] sm:$0xff]  ;;  %v459_v10 = vld [vmem:[%s246_s8 + $0x20] sm:$0xff] }
  0x1f   : > { %1197 = vmatpush3.bf16.msra.mxu1 %v1196_v42  ;;  %v1220_v42 = vpack.c.bf16 %v1007_v41, %v1006_v40  ;;  %v462_v11 = vld [vmem:[%s246_s8 + $0x38] sm:$0xf]  ;;  %v461_v12 = vld [vmem:[%s246_s8 + $0x30] sm:$0xf]  ;;  %vm1227_vm5 = vmpackc.low %vm754_vm3, %vm1265_vm4 }
  0x20   : > { %1199 = vmatprep.subr.bf16.mxu1 %v1198_v43  ;;  %1181 = vmatpush3.bf16.msra.mxu0 %v1180_v15  ;;  %v1027_v40 = vld [vmem:[%s1559_s5 + $0x10] sm:$0xff] }
  0x21   : > { %1183 = vmatprep.subr.bf16.mxu0 %v1182_v22 }
  0x23   : > { %1201 = vmatpush3.bf16.msra.mxu1 %v1200_v46  ;;  %v421_v46 = vshrl.u32 %v420_v45, 7 }
  0x24   : > { %1203 = vmatprep.subr.bf16.mxu1 %v1202_v53  ;;  %1185 = vmatpush3.bf16.msra.mxu0 %v1184_v27 }
  0x25   : > { %1187 = vmatprep.subr.bf16.mxu0 %v1186_v34  ;;  %v422_v47 = vsub.s32 0, %v421_v46  ;;  %v426_v49 = vsub.s32 1, %v421_v46  ;;  %v444_v61 = vsub.s32 %v441_v55, %v421_v46 }
  0x27   : > { %1205 = vmatpush3.bf16.msra.mxu1 %v1204_v58  ;;  %v423_v52 = vrot.slane %v418_v48, %v422_v47  ;;  %v427_v53 = vrot.slane %v418_v48, %v426_v49 }
  0x28   : > { %1207 = vmatprep.subr.bf16.mxu1 %v1206_v2  ;;  %1189 = vmatpush3.bf16.msra.mxu0 %v1188_v39  ;;  %v745_v39 = vld [vmem:[%s1559_s5] sm:$0xff] }
  0x2b   : > { %1209 = vmatpush3.bf16.msra.mxu1 %v1208_v6  ;;  %v456_v6 = vld [vmem:[%s246_s8 + $0x8] sm:$0xff] }
  0x2c   : > { %1211 = vmatprep.subr.bf16.mxu1 %v1210_v14 }
  0x2f   : > { %1213 = vmatpush3.bf16.msra.mxu1 %v1212_v18 }
  0x30   : > { %1215 = vmatprep.subr.bf16.mxu1 %v1214_v26 }
  0x33   : > { %1217 = vmatpush3.bf16.msra.mxu1 %v1216_v30 }
  0x34   : > { %1219 = vmatprep.subr.bf16.mxu1 %v1218_v38 }
  0x37   : > { %1221 = vmatpush3.bf16.msra.mxu1 %v1220_v42 }
  0xdc   : > { %v339_v43 = vpop.f32.mrb[0].mxu0 }
  0xdd   : > { %v341_v44 = vpop.f32.mrb[1].mxu0 }
  0xed   : > { %v413_v54 = vpop.f32.mrb[0].mxu1 }
  0xee   : > { %v430_v56 = vmul.f32 %v423_v52, %v413_v54  ;;  %v415_v57 = vpop.f32.mrb[1].mxu1 }
  0xef   : > { %v431_v58 = vmul.f32 %v427_v53, %v415_v57 }
  0xf0   : > { %v434_v59 = vmul.f32 %v430_v56, %v339_v43  ;;  %v466_v0 = vrot.slane %v430_v56, %v422_v47 }
  0xf1   : > { %v435_v60 = vmul.f32 %v431_v58, %v341_v44  ;;  %v470_v2 = vrot.slane %v431_v58, %v422_v47 }
  0xf2   : > { %v471_v13 = vmul.f32 %v466_v0, %v455_v4  ;;  %v473_v14 = vmul.f32 %v466_v0, %v457_v5  ;;  %v475_v20 = vmul.f32 %v466_v0, %v459_v10  ;;  %v477_v22 = vmul.f32 %v466_v0, %v461_v12 }
  0xf3   : > { %v438_v62 = vcombine.low %v434_v59, %v435_v60  ;;  %v472_v17 = vmul.f32 %v470_v2, %v456_v6  ;;  %v474_v18 = vmul.f32 %v470_v2, %v458_v7  ;;  %v476_v19 = vmul.f32 %v470_v2, %v460_v8  ;;  %v746_v7 = vld [vmem:[%s1559_s5 + $0x8] sm:$0x3f]  ;;  %v1028_v8 = vld [vmem:[%s1559_s5 + $0x18] sm:$0x3f] }
  0xf4   : > { %v478_v21 = vmul.f32 %v470_v2, %v462_v11 }
  0xf5   : > { %v445_v63 = vrot.slane %v438_v62, %v444_v61 }
  0xf7   : > { %v452_v3 = vrot.slane %v445_v63, %v444_v61 }
  0xf9   : > { %v454_v9 = vsub.f32 %v991_v1, %v452_v3 }
  0xfb   : > { %v483_v15 = vrot.slane %v454_v9, %v422_v47  ;;  %v487_v16 = vrot.slane %v454_v9, %v426_v49 }
  0xfd   : > { %v491_v23 = vadd.f32 %v487_v16, %v472_v17  ;;  %v490_v24 = vadd.f32 %v483_v15, %v471_v13  ;;  %v493_v25 = vadd.f32 %v487_v16, %v474_v18  ;;  %v492_v26 = vadd.f32 %v483_v15, %v473_v14 }
  0xfe   : > { %v495_v27 = vadd.f32 %v487_v16, %v476_v19  ;;  %v494_v28 = vadd.f32 %v483_v15, %v475_v20  ;;  %v497_v29 = vadd.f32 %v487_v16, %v478_v21  ;;  %v496_v30 = vadd.f32 %v483_v15, %v477_v22 }
  0xff   : > { %v499_v31 = vmax.f32 %v491_v23, 0.0  ;;  %v498_v32 = vmax.f32 %v490_v24, 0.0  ;;  %v501_v33 = vmax.f32 %v493_v25, 0.0  ;;  %v500_v34 = vmax.f32 %v492_v26, 0.0 }
 0x100   : > { %v503_v35 = vmax.f32 %v495_v27, 0.0  ;;  %v502_v36 = vmax.f32 %v494_v28, 0.0  ;;  %v505_v37 = vmax.f32 %v497_v29, 0.0  ;;  %v504_v38 = vmax.f32 %v496_v30, 0.0 }
 0x101   : > { %602 = vmatprep.mubr.f32.mxu0 %v499_v31  ;;  %720 = vmatprep.mubr.f32.mxu1 %v499_v31 }
 0x102   : > { %603 = vmatmul.mubr.f32.vlgmr.msra.gmra.mrb[2].mxu0 %v498_v32  ;;  %721 = vmatmul.mubr.f32.vlgmr.msra.gmra.mrb[2].mxu1 %v498_v32 }
 0x103   : > { %607 = vmatprep.mubr.f32.mxu0 %v501_v33  ;;  %725 = vmatprep.mubr.f32.mxu1 %v501_v33 }
 0x106   : > { %608 = vmatmul.mubr.f32.gmra.mrb[4].mxu0 %v500_v34  ;;  %726 = vmatmul.mubr.f32.gmra.mrb[4].mxu1 %v500_v34 }
 0x107   : > { %612 = vmatprep.mubr.f32.mxu0 %v503_v35  ;;  %730 = vmatprep.mubr.f32.mxu1 %v503_v35 }
 0x10a   : > { %613 = vmatmul.mubr.f32.gmra.mrb[6].mxu0 %v502_v36  ;;  %731 = vmatmul.mubr.f32.gmra.mrb[6].mxu1 %v502_v36 }
 0x10b   : > { %617 = vmatprep.mubr.f32.mxu0 %v505_v37  ;;  %735 = vmatprep.mubr.f32.mxu1 %v505_v37 }
 0x10e   : > { %618 = vmatmul.mubr.f32.gmra.mrb[8].mxu0 %v504_v38  ;;  %736 = vmatmul.mubr.f32.gmra.mrb[8].mxu1 %v504_v38 }
 0x10f   : > { %1144 = vmatprep.mubr.msk.f32.mxu0 %vm747_vm2, %v745_v39  ;;  %1155 = vmatprep.mubr.msk.f32.mxu1 %vm747_vm2, %v1027_v40 }
 0x1d5   : > { %v1068_v41 = vpop.f32.mrb[2].mxu0  ;;  %v1112_v42 = vpop.f32.mrb[2].mxu1 }
 0x1d6   : > { %v1069_v43 = vpop.f32.mrb[3].mxu0  ;;  %v1113_v44 = vpop.f32.mrb[3].mxu1 }
 0x1d7   : > { %v1070_v45 = vadd.f32 %v1069_v43, %v1068_v41  ;;  %v1114_v46 = vadd.f32 %v1113_v44, %v1112_v42 }
 0x1d9   : > { %v741_v47 = vmax.f32 %v1070_v45, %v1114_v46  ;;  %v1071_v48 = vpop.f32.mrb[4].mxu0  ;;  %v1115_v49 = vpop.f32.mrb[4].mxu1 }
 0x1da   : > { %v1072_v50 = vpop.f32.mrb[5].mxu0  ;;  %v1116_v51 = vpop.f32.mrb[5].mxu1 }
 0x1db   : > { %v1073_v52 = vadd.f32 %v1072_v50, %v1071_v48  ;;  %v1117_v53 = vadd.f32 %v1116_v51, %v1115_v49 }
 0x1dd   : > { %v742_v54 = vmax.f32 %v1073_v52, %v1117_v53  ;;  %v1074_v55 = vpop.f32.mrb[6].mxu0  ;;  %v1118_v56 = vpop.f32.mrb[6].mxu1 }
 0x1de   : > { %v1075_v57 = vpop.f32.mrb[7].mxu0  ;;  %v1119_v58 = vpop.f32.mrb[7].mxu1 }
 0x1df   : > { %v1222_v59 = vpack.c.bf16 %v742_v54, %v741_v47  ;;  %v1076_v60 = vadd.f32 %v1075_v57, %v1074_v55  ;;  %v1120_v61 = vadd.f32 %v1119_v58, %v1118_v56 }
 0x1e1   : > { %v743_v62 = vmax.f32 %v1076_v60, %v1120_v61  ;;  %v1077_v63 = vpop.f32.mrb[8].mxu0  ;;  %v1121_v0 = vpop.f32.mrb[8].mxu1  ;;  %1223 = vmatprep.subr.bf16.mxu0 %v1222_v59  ;;  %1233 = vmatprep.subr.bf16.mxu1 %v1222_v59 }
 0x1e2   : > { %v1078_v1 = vpop.f32.mrb[9].mxu0  ;;  %v1122_v2 = vpop.f32.mrb[9].mxu1  ;;  %1225 = vmatpush3.bf16.msra.mxu0 %v1222_v59  ;;  %1235 = vmatpush3.bf16.msra.mxu1 %v1222_v59 }
 0x1e3   : > { %v1079_v3 = vadd.f32 %v1078_v1, %v1077_v63  ;;  %v1123_v4 = vadd.f32 %v1122_v2, %v1121_v0 }
 0x1e5   : > { %v744_v5 = vmax.f32 %v1079_v3, %v1123_v4 }
 0x1e7   : > { %v1226_v6 = vpack.c.bf16 %v744_v5, %v743_v62 }
 0x1e9   : > { %1228 = vmatprep.subr.msk.bf16.mxu0 %vm1227_vm5, %v1226_v6  ;;  %1238 = vmatprep.subr.msk.bf16.mxu1 %vm1227_vm5, %v1226_v6 }
 0x1ea   : > { %1231 = vmatpush3.bf16.msk.msra.mxu0 %vm1227_vm5, %v1226_v6  ;;  %1241 = vmatpush3.bf16.msk.msra.mxu1 %vm1227_vm5, %v1226_v6 }
 0x1ed   : > { %1145 = vmatmul.mubr.msk.f32.vlgmr.msra.gmra.mrb[10].mxu0 %vm747_vm2, %v746_v7  ;;  %1156 = vmatmul.mubr.msk.f32.vlgmr.msra.gmra.mrb[10].mxu1 %vm747_vm2, %v1028_v8 }
 0x2c0   : > { %v1146_v9 = vpop.f32.mrb[10].mxu0  ;;  %v1157_v10 = vpop.f32.mrb[10].mxu1 }
 0x2c1   : > { %v918_v11 = vmax.f32 %v1146_v9, %v1157_v10  ;;  %v824_v12 = vpop.f32.mrb[11].mxu0  ;;  %v908_v13 = vpop.f32.mrb[11].mxu1 }
 0x2c2   : > { %v917_v14 = vmax.f32 %v824_v12, %v908_v13 }
 0x2c3   : > { %920 = vst [vmem:[%s251_s24 + $0x8] sm:$0x3f] %v918_v11 }
 0x2c4   : > { %919 = vst [vmem:[%s251_s24] sm:$0xff] %v917_v14 }
 0x2c5 PF: > { %s16_s21 = sadd.s32 1, %s1261_s21  }
 0x2c6   : > { %p13_p4 = scmp.ge.s32.totalorder %s16_s21, 4  }
 0x2c8   :  { %15 = sbr.rel (!%p13_p4) target bundleno = 1 (0x1), region = 77 }

// kernel: lenet_bn_forward.6
= control target key start
LH: loop header
LB: loop body
LE: loop exit
PB: predicated region body
PF: predicated region fallthrough
CT: control target
= control target key end

     0   :  { %s1462_s18 = smov 0   ;;  %s2104_s0 = inlined_call_operand.vmem [shape: f32[2,14,128], index: 0, kind: input, shape index: {}]   ;;  %s2105_s1 = inlined_call_operand.vmem [shape: f32[5,128,256], index: 1, kind: input, shape index: {}]   ;;  %s2106_s2 = inlined_call_operand.vmem [shape: f32[1,256], index: 2, kind: input, shape index: {}]   ;;  %s2107_s3 = inlined_call_operand.vmem [shape: f32[256,16], index: 3, kind: input, shape index: {}]   ;;  %s2108_s4 = inlined_call_operand.vmem [shape: f32[2,10,256], index: 4, kind: output, shape index: {0}]   ;;  %s2109_s5 = inlined_call_operand.vmem [shape: f32[2,16], index: 5, kind: output, shape index: {1}]  }
   0x1 LB: > { %s1468_s19 = sadd.s32 4294967295, %s1428_s18   ;;  %p1031_p0 = scmp.ge.s32.totalorder %s1428_s18, 1  ;;  %s1428_s18 = sphi %s1462_s18, %s16_s18  }
   0x2   : > { %p185_p1 = scmp.lt.s32.totalorder %s1428_s18, 3 }
   0x4   : > { %p186_p2 = pnand %p1031_p0, %p185_p1 }
   0x5   : > { %v1037_v0 = vld [vmem:[%s2105_s1 + $0x108] sm:$0xff] (!%p186_p2)  ;;  %v1039_v1 = vld [vmem:[%s2105_s1 + $0x118] sm:$0xff] (!%p186_p2)  ;;  %v1036_v5 = vld [vmem:[%s2105_s1 + $0x100] sm:$0xff] (!%p186_p2)  ;;  %v1430_v7 = vmov (!%p186_p2), 0.0   ;;  %p213_p3 = scmp.lt.s32.totalorder (!%p186_p2), %s1468_s19, 1  ;;  %vm814_vm0 = vcmask (!%p186_p2), 1041408  }
   0x6   : > { %189 = sbr.rel (%p186_p2) target bundleno = 563 (0x233), region = 36  ;;  %v1069_v2 = vld [vmem:[%s2105_s1 + $0x208] sm:$0xff] (!%p186_p2)  ;;  %v1204_v3 = vpack.c.bf16 (!%p186_p2), %v1039_v1, %v1037_v0  ;;  %v1071_v4 = vld [vmem:[%s2105_s1 + $0x218] sm:$0xff] (!%p186_p2)  ;;  %v1038_v6 = vld [vmem:[%s2105_s1 + $0x110] sm:$0xff] (!%p186_p2)  ;;  %356 = vmatprep.mubr.f32.mxu1 (!%p186_p2), %v1430_v7  ;;  %545 = vmatprep.mubr.f32.mxu0 (!%p186_p2), %v1430_v7  ;;  %vm851_vm1 = vcmask (!%p186_p2), 1040384   ;;  %p1164_p4 = scmp.ne.s32.totalorder (!%p186_p2), %s1468_s19, 0 }
   0x7   : > { %v1268_v8 = vpack.c.bf16 (!%p186_p2), %v1071_v4, %v1069_v2  ;;  %v1206_v9 = vpack.c.bf16 (!%p186_p2), %v1038_v6, %v1036_v5  ;;  %v1068_v10 = vld [vmem:[%s2105_s1 + $0x200] sm:$0xff] (!%p186_p2)  ;;  %v1070_v11 = vld [vmem:[%s2105_s1 + $0x210] sm:$0xff] (!%p186_p2)  ;;  %v1041_v12 = vld [vmem:[%s2105_s1 + $0x128] sm:$0xff] (!%p186_p2) }
   0x8   : > { %1205 = vmatprep.subr.bf16.mxu1 (!%p186_p2), %v1204_v3  ;;  %v1270_v13 = vpack.c.bf16 (!%p186_p2), %v1070_v11, %v1068_v10  ;;  %v1043_v14 = vld [vmem:[%s2105_s1 + $0x138] sm:$0xff] (!%p186_p2)  ;;  %v1073_v15 = vld [vmem:[%s2105_s1 + $0x228] sm:$0xff] (!%p186_p2)  ;;  %v1040_v19 = vld [vmem:[%s2105_s1 + $0x120] sm:$0xff] (!%p186_p2) }
   0x9   : > { %v1075_v16 = vld [vmem:[%s2105_s1 + $0x238] sm:$0xff] (!%p186_p2)  ;;  %1269 = vmatprep.subr.bf16.mxu0 (!%p186_p2), %v1268_v8  ;;  %1207 = vmatpush1.bf16.msra.mxu1 (!%p186_p2), %v1206_v9  ;;  %v1208_v17 = vpack.c.bf16 (!%p186_p2), %v1043_v14, %v1041_v12  ;;  %v1042_v20 = vld [vmem:[%s2105_s1 + $0x130] sm:$0xff] (!%p186_p2)  ;;  %v1072_v21 = vld [vmem:[%s2105_s1 + $0x220] sm:$0xff] (!%p186_p2) }
   0xa   : > { %v1272_v18 = vpack.c.bf16 (!%p186_p2), %v1075_v16, %v1073_v15  ;;  %1271 = vmatpush1.bf16.msra.mxu0 (!%p186_p2), %v1270_v13  ;;  %v1210_v22 = vpack.c.bf16 (!%p186_p2), %v1042_v20, %v1040_v19  ;;  %v1074_v23 = vld [vmem:[%s2105_s1 + $0x230] sm:$0xff] (!%p186_p2)  ;;  %v1045_v24 = vld [vmem:[%s2105_s1 + $0x148] sm:$0xff] (!%p186_p2)  ;;  %v1047_v25 = vld [vmem:[%s2105_s1 + $0x158] sm:$0xff] (!%p186_p2) }
   0xb   : > { %1209 = vmatprep.subr.bf16.mxu1 (!%p186_p2), %v1208_v17  ;;  %v1274_v26 = vpack.c.bf16 (!%p186_p2), %v1074_v23, %v1072_v21  ;;  %v1212_v27 = vpack.c.bf16 (!%p186_p2), %v1047_v25, %v1045_v24  ;;  %v1077_v28 = vld [vmem:[%s2105_s1 + $0x248] sm:$0xff] (!%p186_p2)  ;;  %v1079_v29 = vld [vmem:[%s2105_s1 + $0x258] sm:$0xff] (!%p186_p2)  ;;  %v1044_v30 = vld [vmem:[%s2105_s1 + $0x140] sm:$0xff] (!%p186_p2) }
   0xc   : > { %1273 = vmatprep.subr.bf16.mxu0 (!%p186_p2), %v1272_v18  ;;  %v1276_v31 = vpack.c.bf16 (!%p186_p2), %v1079_v29, %v1077_v28  ;;  %v1046_v32 = vld [vmem:[%s2105_s1 + $0x150] sm:$0xff] (!%p186_p2)  ;;  %v1076_v33 = vld [vmem:[%s2105_s1 + $0x240] sm:$0xff] (!%p186_p2)  ;;  %v1049_v36 = vld [vmem:[%s2105_s1 + $0x168] sm:$0xff] (!%p186_p2) }
   0xd   : > { %v1078_v34 = vld [vmem:[%s2105_s1 + $0x250] sm:$0xff]  ;;  %1211 = vmatpush1.bf16.msra.mxu1 %v1210_v22  ;;  %v1214_v35 = vpack.c.bf16 %v1046_v32, %v1044_v30  ;;  %v1051_v37 = vld [vmem:[%s2105_s1 + $0x178] sm:$0xff]  ;;  %v1081_v38 = vld [vmem:[%s2105_s1 + $0x268] sm:$0xff]  ;;  %s1652_s21 = scalar_select %p213_p3, %s1468_s19, 1 }
   0xe   : > { %1275 = vmatpush1.bf16.msra.mxu0 %v1274_v26  ;;  %1213 = vmatprep.subr.bf16.mxu1 %v1212_v27  ;;  %v1278_v39 = vpack.c.bf16 %v1078_v34, %v1076_v33  ;;  %v1216_v40 = vpack.c.bf16 %v1051_v37, %v1049_v36  ;;  %v1083_v41 = vld [vmem:[%s2105_s1 + $0x278] sm:$0xff]  ;;  %v1048_v42 = vld [vmem:[%s2105_s1 + $0x160] sm:$0xff]  ;;  %v1050_v43 = vld [vmem:[%s2105_s1 + $0x170] sm:$0xff]  ;;  %vm960_vm2 = vcmask (!%p1164_p4), 123904  }
   0xf   : > { %1277 = vmatprep.subr.bf16.mxu0 %v1276_v31  ;;  %v1280_v44 = vpack.c.bf16 %v1083_v41, %v1081_v38  ;;  %v1080_v45 = vld [vmem:[%s2105_s1 + $0x260] sm:$0xff]  ;;  %v1082_v46 = vld [vmem:[%s2105_s1 + $0x270] sm:$0xff]  ;;  %v1053_v47 = vld [vmem:[%s2105_s1 + $0x188] sm:$0xff]  ;;  %v1218_v51 = vpack.c.bf16 %v1050_v43, %v1048_v42  ;;  %s1167_s13 = sshll.u32 %s1652_s21, 4  ;;  %s1168_s15 = sshll.u32 %s1652_s21, 5 }
  0x10   : > { %v1055_v48 = vld [vmem:[%s2105_s1 + $0x198] sm:$0xff]  ;;  %v1085_v49 = vld [vmem:[%s2105_s1 + $0x288] sm:$0xff]  ;;  %v1282_v52 = vpack.c.bf16 %v1082_v46, %v1080_v45  ;;  %v1052_v54 = vld [vmem:[%s2105_s1 + $0x180] sm:$0xff]  ;;  %s1688_s23 = scalar_lea.vmem %s2104_s0, %s1167_s13  ;;  %s222_s20 = scalar_lea.vmem %s2108_s4, %s1168_s15 }
  0x11   : > { %v1087_v50 = vld [vmem:[%s2105_s1 + $0x298] sm:$0xff]  ;;  %1215 = vmatpush1.bf16.msra.mxu1 %v1214_v35  ;;  %v1220_v53 = vpack.c.bf16 %v1055_v48, %v1053_v47  ;;  %v1054_v55 = vld [vmem:[%s2105_s1 + $0x190] sm:$0xff]  ;;  %v1084_v56 = vld [vmem:[%s2105_s1 + $0x280] sm:$0xff] }
  0x12   : > { %1279 = vmatpush1.bf16.msra.mxu0 %v1278_v39  ;;  %1217 = vmatprep.subr.bf16.mxu1 %v1216_v40  ;;  %v1284_v57 = vpack.c.bf16 %v1087_v50, %v1085_v49  ;;  %v1086_v58 = vld [vmem:[%s2105_s1 + $0x290] sm:$0xff]  ;;  %v1057_v59 = vld [vmem:[%s2105_s1 + $0x1a8] sm:$0xff]  ;;  %v1059_v60 = vld [vmem:[%s2105_s1 + $0x1b8] sm:$0xff]  ;;  %v1222_v63 = vpack.c.bf16 %v1054_v55, %v1052_v54 }
  0x13   : > { %1281 = vmatprep.subr.bf16.mxu0 %v1280_v44  ;;  %v1089_v61 = vld [vmem:[%s2105_s1 + $0x2a8] sm:$0xff]  ;;  %v1091_v62 = vld [vmem:[%s2105_s1 + $0x2b8] sm:$0xff]  ;;  %v1286_v0 = vpack.c.bf16 %v1086_v58, %v1084_v56  ;;  %v1224_v1 = vpack.c.bf16 %v1059_v60, %v1057_v59  ;;  %v1056_v2 = vld [vmem:[%s2105_s1 + $0x1a0] sm:$0xff] }
  0x14   : > { %v1058_v3 = vld [vmem:[%s2105_s1 + $0x1b0] sm:$0xff]  ;;  %v1088_v4 = vld [vmem:[%s2105_s1 + $0x2a0] sm:$0xff]  ;;  %v1288_v5 = vpack.c.bf16 %v1091_v62, %v1089_v61  ;;  %v1061_v8 = vld [vmem:[%s2105_s1 + $0x1c8] sm:$0xff] }
  0x15   : > { %1219 = vmatpush1.bf16.msra.mxu1 %v1218_v51  ;;  %v1090_v6 = vld [vmem:[%s2105_s1 + $0x2b0] sm:$0xff]  ;;  %v1063_v9 = vld [vmem:[%s2105_s1 + $0x1d8] sm:$0xff]  ;;  %v1093_v10 = vld [vmem:[%s2105_s1 + $0x2c8] sm:$0xff]  ;;  %v1226_v12 = vpack.c.bf16 %v1058_v3, %v1056_v2 }
  0x16   : > { %1283 = vmatpush1.bf16.msra.mxu0 %v1282_v52  ;;  %1221 = vmatprep.subr.bf16.mxu1 %v1220_v53  ;;  %v1095_v11 = vld [vmem:[%s2105_s1 + $0x2d8] sm:$0xff]  ;;  %v1290_v13 = vpack.c.bf16 %v1090_v6, %v1088_v4  ;;  %v1228_v14 = vpack.c.bf16 %v1063_v9, %v1061_v8  ;;  %v1060_v15 = vld [vmem:[%s2105_s1 + $0x1c0] sm:$0xff]  ;;  %v1062_v16 = vld [vmem:[%s2105_s1 + $0x1d0] sm:$0xff] }
  0x17   : > { %1285 = vmatprep.subr.bf16.mxu0 %v1284_v57  ;;  %v1092_v17 = vld [vmem:[%s2105_s1 + $0x2c0] sm:$0xff]  ;;  %v1292_v18 = vpack.c.bf16 %v1095_v11, %v1093_v10  ;;  %v1094_v19 = vld [vmem:[%s2105_s1 + $0x2d0] sm:$0xff]  ;;  %v1065_v20 = vld [vmem:[%s2105_s1 + $0x1e8] sm:$0xff]  ;;  %v1230_v24 = vpack.c.bf16 %v1062_v16, %v1060_v15 }
  0x18   : > { %v1067_v21 = vld [vmem:[%s2105_s1 + $0x1f8] sm:$0xff]  ;;  %v1097_v22 = vld [vmem:[%s2105_s1 + $0x2e8] sm:$0xff]  ;;  %v1294_v25 = vpack.c.bf16 %v1094_v19, %v1092_v17  ;;  %v1064_v27 = vld [vmem:[%s2105_s1 + $0x1e0] sm:$0xff] }
  0x19   : > { %1223 = vmatpush1.bf16.msra.mxu1 %v1222_v63  ;;  %v1099_v23 = vld [vmem:[%s2105_s1 + $0x2f8] sm:$0xff]  ;;  %v1232_v26 = vpack.c.bf16 %v1067_v21, %v1065_v20  ;;  %v1066_v28 = vld [vmem:[%s2105_s1 + $0x1f0] sm:$0xff]  ;;  %v1096_v29 = vld [vmem:[%s2105_s1 + $0x2e0] sm:$0xff] }
  0x1a   : > { %1287 = vmatpush1.bf16.msra.mxu0 %v1286_v0  ;;  %1225 = vmatprep.subr.bf16.mxu1 %v1224_v1  ;;  %v1296_v30 = vpack.c.bf16 %v1099_v23, %v1097_v22  ;;  %v1098_v31 = vld [vmem:[%s2105_s1 + $0x2f0] sm:$0xff]  ;;  %v226_v32 = vld [vmem:[%s2105_s1 + $0x8] sm:$0xff]  ;;  %v228_v33 = vld [vmem:[%s2105_s1 + $0x18] sm:$0xff]  ;;  %v1234_v36 = vpack.c.bf16 %v1066_v28, %v1064_v27 }
  0x1b   : > { %1289 = vmatprep.subr.bf16.mxu0 %v1288_v5  ;;  %v1101_v34 = vld [vmem:[%s2105_s1 + $0x308] sm:$0xff]  ;;  %v1103_v35 = vld [vmem:[%s2105_s1 + $0x318] sm:$0xff]  ;;  %v1298_v37 = vpack.c.bf16 %v1098_v31, %v1096_v29  ;;  %v1236_v38 = vpack.c.bf16 %v228_v33, %v226_v32  ;;  %v225_v39 = vld [vmem:[%s2105_s1] sm:$0xff] }
  0x1c   : > { %v227_v40 = vld [vmem:[%s2105_s1 + $0x10] sm:$0xff]  ;;  %v1100_v41 = vld [vmem:[%s2105_s1 + $0x300] sm:$0xff]  ;;  %v1300_v42 = vpack.c.bf16 %v1103_v35, %v1101_v34  ;;  %v230_v44 = vld [vmem:[%s2105_s1 + $0x28] sm:$0xff] }
  0x1d   : > { %1227 = vmatpush1.bf16.msra.mxu1 %v1226_v12  ;;  %v1102_v43 = vld [vmem:[%s2105_s1 + $0x310] sm:$0xff]  ;;  %v232_v45 = vld [vmem:[%s2105_s1 + $0x38] sm:$0xff]  ;;  %v1105_v46 = vld [vmem:[%s2105_s1 + $0x328] sm:$0xff]  ;;  %v1238_v49 = vpack.c.bf16 %v227_v40, %v225_v39 }
  0x1e   : > { %1291 = vmatpush1.bf16.msra.mxu0 %v1290_v13  ;;  %1229 = vmatprep.subr.bf16.mxu1 %v1228_v14  ;;  %v1107_v47 = vld [vmem:[%s2105_s1 + $0x338] sm:$0xff]  ;;  %v257_v48 = vld [vmem:[%s1688_s23 + $0x1] sm:$0xff]  ;;  %v1302_v51 = vpack.c.bf16 %v1102_v43, %v1100_v41  ;;  %v1240_v52 = vpack.c.bf16 %v232_v45, %v230_v44  ;;  %v231_v54 = vld [vmem:[%s2105_s1 + $0x30] sm:$0xff] }
  0x1f   : > { %1293 = vmatprep.subr.bf16.mxu0 %v1292_v18  ;;  %v446_v50 = vld [vmem:[%s1688_s23 + $0x2] sm:$0xff]  ;;  %v1304_v56 = vpack.c.bf16 %v1107_v47, %v1105_v46  ;;  %v1106_v57 = vld [vmem:[%s2105_s1 + $0x330] sm:$0xff]  ;;  %v236_v59 = vld [vmem:[%s2105_s1 + $0x58] sm:$0xff] }
  0x20   : > { %v229_v53 = vld [vmem:[%s2105_s1 + $0x20] sm:$0xff]  ;;  %v234_v58 = vld [vmem:[%s2105_s1 + $0x48] sm:$0xff]  ;;  %v1111_v61 = vld [vmem:[%s2105_s1 + $0x358] sm:$0xff] }
  0x21   : > { %1231 = vmatpush1.bf16.msra.mxu1 %v1230_v24  ;;  %v1104_v55 = vld [vmem:[%s2105_s1 + $0x320] sm:$0xff]  ;;  %v1109_v60 = vld [vmem:[%s2105_s1 + $0x348] sm:$0xff]  ;;  %v1242_v62 = vpack.c.bf16 %v231_v54, %v229_v53  ;;  %v1244_v0 = vpack.c.bf16 %v236_v59, %v234_v58  ;;  %v235_v2 = vld [vmem:[%s2105_s1 + $0x50] sm:$0xff] }
  0x22   : > { %1295 = vmatpush1.bf16.msra.mxu0 %v1294_v25  ;;  %1233 = vmatprep.subr.bf16.mxu1 %v1232_v26  ;;  %v1306_v63 = vpack.c.bf16 %v1106_v57, %v1104_v55  ;;  %v233_v1 = vld [vmem:[%s2105_s1 + $0x40] sm:$0xff]  ;;  %v1308_v4 = vpack.c.bf16 %v1111_v61, %v1109_v60  ;;  %v1110_v5 = vld [vmem:[%s2105_s1 + $0x350] sm:$0xff]  ;;  %v238_v6 = vld [vmem:[%s2105_s1 + $0x68] sm:$0xff] }
  0x23   : > { %1297 = vmatprep.subr.bf16.mxu0 %v1296_v30  ;;  %v1108_v3 = vld [vmem:[%s2105_s1 + $0x340] sm:$0xff]  ;;  %v240_v8 = vld [vmem:[%s2105_s1 + $0x78] sm:$0xff]  ;;  %v1113_v9 = vld [vmem:[%s2105_s1 + $0x368] sm:$0xff]  ;;  %v1246_v11 = vpack.c.bf16 %v235_v2, %v233_v1 }
  0x24   : > { %v1115_v10 = vld [vmem:[%s2105_s1 + $0x378] sm:$0xff]  ;;  %v258_v12 = vld [vmem:[%s1688_s23 + $0x9] sm:$0x3]  ;;  %v1310_v13 = vpack.c.bf16 %v1110_v5, %v1108_v3  ;;  %v1248_v14 = vpack.c.bf16 %v240_v8, %v238_v6  ;;  %v237_v15 = vld [vmem:[%s2105_s1 + $0x60] sm:$0xff] }
  0x25   : > { %1235 = vmatpush1.bf16.msra.mxu1 %v1234_v36  ;;  %v239_v16 = vld [vmem:[%s2105_s1 + $0x70] sm:$0xff]  ;;  %v1112_v17 = vld [vmem:[%s2105_s1 + $0x360] sm:$0xff]  ;;  %v1312_v18 = vpack.c.bf16 %v1115_v10, %v1113_v9  ;;  %v242_v20 = vld [vmem:[%s2105_s1 + $0x88] sm:$0xff] }
  0x26   : > { %1299 = vmatpush1.bf16.msra.mxu0 %v1298_v37  ;;  %1237 = vmatprep.subr.bf16.mxu1 %v1236_v38  ;;  %v1114_v19 = vld [vmem:[%s2105_s1 + $0x370] sm:$0xff]  ;;  %v244_v21 = vld [vmem:[%s2105_s1 + $0x98] sm:$0xff]  ;;  %v1117_v22 = vld [vmem:[%s2105_s1 + $0x388] sm:$0xff]  ;;  %v1250_v25 = vpack.c.bf16 %v239_v16, %v237_v15 }
  0x27   : > { %1301 = vmatprep.subr.bf16.mxu0 %v1300_v42  ;;  %v1119_v23 = vld [vmem:[%s2105_s1 + $0x398] sm:$0xff]  ;;  %v447_v24 = vld [vmem:[%s1688_s23 + $0xa] sm:$0x3]  ;;  %v1314_v26 = vpack.c.bf16 %v1114_v19, %v1112_v17  ;;  %v1252_v27 = vpack.c.bf16 %v244_v21, %v242_v20  ;;  %v241_v28 = vld [vmem:[%s2105_s1 + $0x80] sm:$0xff] }
  0x28   : > { %357 = vmatmul.mubr.f32.vlgmr.msra.gmra.mrb[0].mxu1 %v257_v48  ;;  %v243_v29 = vld [vmem:[%s2105_s1 + $0x90] sm:$0xff]  ;;  %v1116_v30 = vld [vmem:[%s2105_s1 + $0x380] sm:$0xff]  ;;  %v1316_v31 = vpack.c.bf16 %v1119_v23, %v1117_v22  ;;  %v246_v33 = vld [vmem:[%s2105_s1 + $0xa8] sm:$0xff] }
  0x29   : > { %1239 = vmatpush1.bf16.msra.mxu1 %v1238_v49  ;;  %546 = vmatmul.mubr.f32.vlgmr.msra.gmra.mrb[0].mxu0 %v446_v50  ;;  %v1118_v32 = vld [vmem:[%s2105_s1 + $0x390] sm:$0xff]  ;;  %v248_v34 = vld [vmem:[%s2105_s1 + $0xb8] sm:$0xff]  ;;  %v1121_v35 = vld [vmem:[%s2105_s1 + $0x3a8] sm:$0xff]  ;;  %v1254_v37 = vpack.c.bf16 %v243_v29, %v241_v28 }
  0x2a   : > { %1303 = vmatpush1.bf16.msra.mxu0 %v1302_v51  ;;  %1241 = vmatprep.subr.bf16.mxu1 %v1240_v52  ;;  %v1123_v36 = vld [vmem:[%s2105_s1 + $0x3b8] sm:$0xff]  ;;  %v1318_v38 = vpack.c.bf16 %v1118_v32, %v1116_v30  ;;  %v1256_v39 = vpack.c.bf16 %v248_v34, %v246_v33  ;;  %v245_v40 = vld [vmem:[%s2105_s1 + $0xa0] sm:$0xff]  ;;  %v247_v41 = vld [vmem:[%s2105_s1 + $0xb0] sm:$0xff] }
  0x2b   : > { %1305 = vmatprep.subr.bf16.mxu0 %v1304_v56  ;;  %362 = vmatprep.mubr.f32.mxu1 %v1430_v7  ;;  %v1120_v42 = vld [vmem:[%s2105_s1 + $0x3a0] sm:$0xff]  ;;  %v1320_v43 = vpack.c.bf16 %v1123_v36, %v1121_v35  ;;  %v1122_v44 = vld [vmem:[%s2105_s1 + $0x3b0] sm:$0xff]  ;;  %v250_v45 = vld [vmem:[%s2105_s1 + $0xc8] sm:$0xff]  ;;  %v1258_v49 = vpack.c.bf16 %v247_v41, %v245_v40 }
  0x2c   : > { %551 = vmatprep.mubr.f32.mxu0 %v1430_v7  ;;  %363 = vmatmul.mubr.f32.gmra.mrb[2].mxu1 %v258_v12  ;;  %v252_v46 = vld [vmem:[%s2105_s1 + $0xd8] sm:$0xff]  ;;  %v1125_v47 = vld [vmem:[%s2105_s1 + $0x3c8] sm:$0xff]  ;;  %v1322_v50 = vpack.c.bf16 %v1122_v44, %v1120_v42  ;;  %v249_v52 = vld [vmem:[%s2105_s1 + $0xc0] sm:$0xff] }
  0x2d   : > { %1243 = vmatpush1.bf16.msra.mxu1 %v1242_v62  ;;  %433 = vmatprep.mubr.f32.mxu1 %v1430_v7  ;;  %v1127_v48 = vld [vmem:[%s2105_s1 + $0x3d8] sm:$0xff]  ;;  %v1260_v51 = vpack.c.bf16 %v252_v46, %v250_v45  ;;  %v251_v53 = vld [vmem:[%s2105_s1 + $0xd0] sm:$0xff]  ;;  %v1124_v54 = vld [vmem:[%s2105_s1 + $0x3c0] sm:$0xff] }
  0x2e   : > { %1307 = vmatpush1.bf16.msra.mxu0 %v1306_v63  ;;  %1245 = vmatprep.subr.bf16.mxu1 %v1244_v0  ;;  %v1324_v55 = vpack.c.bf16 %v1127_v48, %v1125_v47  ;;  %v1126_v56 = vld [vmem:[%s2105_s1 + $0x3d0] sm:$0xff]  ;;  %v254_v57 = vld [vmem:[%s2105_s1 + $0xe8] sm:$0xff]  ;;  %v256_v58 = vld [vmem:[%s2105_s1 + $0xf8] sm:$0xff]  ;;  %v1262_v61 = vpack.c.bf16 %v251_v53, %v249_v52 }
  0x2f   : > { %1309 = vmatprep.subr.bf16.mxu0 %v1308_v4  ;;  %552 = vmatmul.mubr.f32.gmra.mrb[2].mxu0 %v447_v24  ;;  %v1129_v59 = vld [vmem:[%s2105_s1 + $0x3e8] sm:$0xff]  ;;  %v1131_v60 = vld [vmem:[%s2105_s1 + $0x3f8] sm:$0xff]  ;;  %v1326_v62 = vpack.c.bf16 %v1126_v56, %v1124_v54  ;;  %v1264_v63 = vpack.c.bf16 %v256_v58, %v254_v57  ;;  %v253_v0 = vld [vmem:[%s2105_s1 + $0xe0] sm:$0xff] }
  0x30   : > { %661 = vmatprep.mubr.f32.mxu0 %v1430_v7  ;;  %v255_v1 = vld [vmem:[%s2105_s1 + $0xf0] sm:$0xff]  ;;  %v1328_v2 = vpack.c.bf16 %v1131_v60, %v1129_v59  ;;  %v1128_v3 = vld [vmem:[%s2105_s1 + $0x3e0] sm:$0xff]  ;;  %v1133_v5 = vld [vmem:[%s2105_s1 + $0x408] sm:$0xff] }
  0x31   : > { %1247 = vmatpush1.bf16.msra.mxu1 %v1246_v11  ;;  %v1130_v4 = vld [vmem:[%s2105_s1 + $0x3f0] sm:$0xff]  ;;  %v1135_v6 = vld [vmem:[%s2105_s1 + $0x418] sm:$0xff]  ;;  %v1266_v8 = vpack.c.bf16 %v255_v1, %v253_v0  ;;  %v1132_v11 = vld [vmem:[%s2105_s1 + $0x400] sm:$0xff] }
  0x32   : > { %1311 = vmatpush1.bf16.msra.mxu0 %v1310_v13  ;;  %1249 = vmatprep.subr.bf16.mxu1 %v1248_v14  ;;  %v1330_v9 = vpack.c.bf16 %v1130_v4, %v1128_v3  ;;  %v1332_v10 = vpack.c.bf16 %v1135_v6, %v1133_v5  ;;  %v1134_v12 = vld [vmem:[%s2105_s1 + $0x410] sm:$0xff]  ;;  %v1137_v13 = vld [vmem:[%s2105_s1 + $0x428] sm:$0xff]  ;;  %v1139_v14 = vld [vmem:[%s2105_s1 + $0x438] sm:$0xff] }
  0x33   : > { %1313 = vmatprep.subr.bf16.mxu0 %v1312_v18  ;;  %v223_v15 = vld [vmem:[%s1688_s23] sm:$0xff]  ;;  %v1334_v17 = vpack.c.bf16 %v1134_v12, %v1132_v11  ;;  %v1336_v18 = vpack.c.bf16 %v1139_v14, %v1137_v13  ;;  %v1138_v20 = vld [vmem:[%s2105_s1 + $0x430] sm:$0xff]  ;;  %v1141_v21 = vld [vmem:[%s2105_s1 + $0x448] sm:$0xff] }
  0x34   : > { %v562_v16 = vld [vmem:[%s1688_s23 + $0x3] sm:$0xff]  ;;  %v1143_v22 = vld [vmem:[%s2105_s1 + $0x458] sm:$0xff]  ;;  %v1142_v28 = vld [vmem:[%s2105_s1 + $0x450] sm:$0xff] }
  0x35   : > { %1251 = vmatpush1.bf16.msra.mxu1 %v1250_v25  ;;  %v1136_v19 = vld [vmem:[%s2105_s1 + $0x420] sm:$0xff]  ;;  %v224_v23 = vld [vmem:[%s1688_s23 + $0x8] sm:$0x3]  ;;  %v563_v25 = vld [vmem:[%s1688_s23 + $0xb] sm:$0x3] }
  0x36   : > { %1315 = vmatpush1.bf16.msra.mxu0 %v1314_v26  ;;  %1253 = vmatprep.subr.bf16.mxu1 %v1252_v27  ;;  %v1338_v24 = vpack.c.bf16 %v1138_v20, %v1136_v19  ;;  %v1340_v26 = vpack.c.bf16 %v1143_v22, %v1141_v21  ;;  %v1140_v27 = vld [vmem:[%s2105_s1 + $0x440] sm:$0xff]  ;;  %v1145_v29 = vld [vmem:[%s2105_s1 + $0x468] sm:$0xff]  ;;  %v1147_v30 = vld [vmem:[%s2105_s1 + $0x478] sm:$0xff] }
  0x37   : > { %1317 = vmatprep.subr.bf16.mxu0 %v1316_v31  ;;  %v1342_v31 = vpack.c.bf16 %v1142_v28, %v1140_v27  ;;  %v1344_v32 = vpack.c.bf16 %v1147_v30, %v1145_v29  ;;  %v1144_v33 = vld [vmem:[%s2105_s1 + $0x460] sm:$0xff]  ;;  %v1146_v34 = vld [vmem:[%s2105_s1 + $0x470] sm:$0xff]  ;;  %v1149_v35 = vld [vmem:[%s2105_s1 + $0x488] sm:$0xff] }
  0x38   : > { %v1151_v36 = vld [vmem:[%s2105_s1 + $0x498] sm:$0xff]  ;;  %v1150_v40 = vld [vmem:[%s2105_s1 + $0x490] sm:$0xff]  ;;  %v1153_v41 = vld [vmem:[%s2105_s1 + $0x4a8] sm:$0xff] }
  0x39   : > { %1255 = vmatpush1.bf16.msra.mxu1 %v1254_v37  ;;  %v1346_v37 = vpack.c.bf16 %v1146_v34, %v1144_v33  ;;  %v1155_v42 = vld [vmem:[%s2105_s1 + $0x4b8] sm:$0xff]  ;;  %v1152_v45 = vld [vmem:[%s2105_s1 + $0x4a0] sm:$0xff]  ;;  %v1154_v46 = vld [vmem:[%s2105_s1 + $0x4b0] sm:$0xff] }
  0x3a   : > { %1319 = vmatpush1.bf16.msra.mxu0 %v1318_v38  ;;  %1257 = vmatprep.subr.bf16.mxu1 %v1256_v39  ;;  %v1348_v38 = vpack.c.bf16 %v1151_v36, %v1149_v35  ;;  %v1148_v39 = vld [vmem:[%s2105_s1 + $0x480] sm:$0xff]  ;;  %v1352_v44 = vpack.c.bf16 %v1155_v42, %v1153_v41  ;;  %v1157_v47 = vld [vmem:[%s2105_s1 + $0x4c8] sm:$0xff]  ;;  %v1159_v48 = vld [vmem:[%s2105_s1 + $0x4d8] sm:$0xff] }
  0x3b   : > { %1321 = vmatprep.subr.bf16.mxu0 %v1320_v43  ;;  %v1350_v43 = vpack.c.bf16 %v1150_v40, %v1148_v39  ;;  %v1158_v52 = vld [vmem:[%s2105_s1 + $0x4d0] sm:$0xff]  ;;  %v1161_v53 = vld [vmem:[%s2105_s1 + $0x4e8] sm:$0xff]  ;;  %v1163_v54 = vld [vmem:[%s2105_s1 + $0x4f8] sm:$0xff] }
  0x3c   : > { %v1360_v56 = vpack.c.bf16 %v1163_v54, %v1161_v53  ;;  %v1160_v57 = vld [vmem:[%s2105_s1 + $0x4e0] sm:$0xff]  ;;  %v1162_v58 = vld [vmem:[%s2105_s1 + $0x4f0] sm:$0xff]  ;;  %v873_v4 = vld [vmem:[%s2107_s3 + $0x98] sm:$0xff] }
  0x3d   : > { %1259 = vmatpush1.bf16.msra.mxu1 %v1258_v49  ;;  %v1354_v49 = vpack.c.bf16 %v1154_v46, %v1152_v45  ;;  %v1362_v59 = vpack.c.bf16 %v1162_v58, %v1160_v57  ;;  %v678_v60 = vld [vmem:[%s1688_s23 + $0x4] sm:$0xff]  ;;  %v872_v3 = vld [vmem:[%s2107_s3 + $0x90] sm:$0xff]  ;;  %v861_v20 = vld [vmem:[%s2107_s3 + $0x38] sm:$0xff] }
  0x3e   : > { %1323 = vmatpush1.bf16.msra.mxu0 %v1322_v50  ;;  %1261 = vmatprep.subr.bf16.mxu1 %v1260_v51  ;;  %v1356_v50 = vpack.c.bf16 %v1159_v48, %v1157_v47  ;;  %v1156_v51 = vld [vmem:[%s2105_s1 + $0x4c0] sm:$0xff]  ;;  %v1368_v5 = vpack.c.bf16 %v873_v4, %v872_v3  ;;  %v856_v6 = vld [vmem:[%s2107_s3 + $0x10] sm:$0xff]  ;;  %v875_v11 = vld [vmem:[%s2107_s3 + $0xa8] sm:$0xff] }
  0x3f   : > { %1325 = vmatprep.subr.bf16.mxu0 %v1324_v55  ;;  %v1358_v55 = vpack.c.bf16 %v1158_v52, %v1156_v51  ;;  %v854_v0 = vld [vmem:[%s2107_s3] sm:$0xff]  ;;  %v859_v14 = vld [vmem:[%s2107_s3 + $0x28] sm:$0xff]  ;;  %v860_v19 = vld [vmem:[%s2107_s3 + $0x30] sm:$0xff] }
  0x40   : > { %v858_v13 = vld [vmem:[%s2107_s3 + $0x20] sm:$0xff]  ;;  %v1378_v21 = vpack.c.bf16 %v861_v20, %v860_v19  ;;  %v880_v28 = vld [vmem:[%s2107_s3 + $0xd0] sm:$0xff]  ;;  %v881_v29 = vld [vmem:[%s2107_s3 + $0xd8] sm:$0xff] }
  0x41   : > { %1263 = vmatpush1.bf16.msra.mxu1 %v1262_v61  ;;  %v679_v61 = vld [vmem:[%s1688_s23 + $0xc] sm:$0x3]  ;;  %v878_v22 = vld [vmem:[%s2107_s3 + $0xc0] sm:$0xff]  ;;  %v1384_v30 = vpack.c.bf16 %v881_v29, %v880_v28  ;;  %v884_v39 = vld [vmem:[%s2107_s3 + $0xf0] sm:$0xff] }
  0x42   : > { %1327 = vmatpush1.bf16.msra.mxu0 %v1326_v62  ;;  %1265 = vmatprep.subr.bf16.mxu1 %v1264_v63  ;;  %v870_v62 = vld [vmem:[%s2107_s3 + $0x80] sm:$0xff]  ;;  %v871_v63 = vld [vmem:[%s2107_s3 + $0x88] sm:$0xff]  ;;  %v885_v40 = vld [vmem:[%s2107_s3 + $0xf8] sm:$0xff] }
  0x43   : > { %1329 = vmatprep.subr.bf16.mxu0 %v1328_v2  ;;  %v1364_v1 = vpack.c.bf16 %v871_v63, %v870_v62  ;;  %v855_v2 = vld [vmem:[%s2107_s3 + $0x8] sm:$0xff]  ;;  %v882_v34 = vld [vmem:[%s2107_s3 + $0xe0] sm:$0xff]  ;;  %v1392_v42 = vpack.c.bf16 %v885_v40, %v884_v39 }
  0x44   : > { %v883_v35 = vld [vmem:[%s2107_s3 + $0xe8] sm:$0xff]  ;;  %v866_v36 = vld [vmem:[%s2107_s3 + $0x60] sm:$0xff] }
  0x45   : > { %1267 = vmatpush1.bf16.msra.mxu1 %v1266_v8  ;;  %v857_v8 = vld [vmem:[%s2107_s3 + $0x18] sm:$0xff]  ;;  %v794_v53 = vld [vmem:[%s2106_s2] sm:$0x3] }
  0x46   : > { %1331 = vmatpush1.bf16.msra.mxu0 %v1330_v9  ;;  %1365 = vmatprep.subr.bf16.mxu1 %v1364_v1  ;;  %v1370_v9 = vpack.c.bf16 %v857_v8, %v856_v6 }
  0x47   : > { %1333 = vmatprep.subr.bf16.mxu0 %v1332_v10  ;;  %v874_v10 = vld [vmem:[%s2107_s3 + $0xa0] sm:$0xff] }
  0x48   : > { %434 = vmatmul.mubr.f32.vlgmr.msra.gmra.mrb[0].mxu1 %v223_v15  ;;  %v1372_v12 = vpack.c.bf16 %v875_v11, %v874_v10  ;;  %v1374_v15 = vpack.c.bf16 %v859_v14, %v858_v13 }
  0x49   : > { %662 = vmatmul.mubr.f32.vlgmr.msra.gmra.mrb[0].mxu0 %v562_v16  ;;  %439 = vmatprep.mubr.f32.mxu1 %v1430_v7  ;;  %v876_v16 = vld [vmem:[%s2107_s3 + $0xb0] sm:$0xff] }
  0x4a   : > { %1335 = vmatpush1.bf16.msra.mxu0 %v1334_v17  ;;  %667 = vmatprep.mubr.f32.mxu0 %v1430_v7  ;;  %v877_v17 = vld [vmem:[%s2107_s3 + $0xb8] sm:$0xff] }
  0x4b   : > { %1337 = vmatprep.subr.bf16.mxu0 %v1336_v18  ;;  %v1376_v18 = vpack.c.bf16 %v877_v17, %v876_v16 }
  0x4c   : > { %440 = vmatmul.mubr.f32.gmra.mrb[2].mxu1 %v224_v23  ;;  %v879_v23 = vld [vmem:[%s2107_s3 + $0xc8] sm:$0xff] }
  0x4d   : > { %668 = vmatmul.mubr.f32.gmra.mrb[2].mxu0 %v563_v25  ;;  %v862_v25 = vld [vmem:[%s2107_s3 + $0x40] sm:$0xff] }
  0x4e   : > { %1339 = vmatpush1.bf16.msra.mxu0 %v1338_v24  ;;  %777 = vmatprep.mubr.f32.mxu0 %v1430_v7  ;;  %v1380_v24 = vpack.c.bf16 %v879_v23, %v878_v22 }
  0x4f   : > { %1341 = vmatprep.subr.bf16.mxu0 %v1340_v26  ;;  %v863_v26 = vld [vmem:[%s2107_s3 + $0x48] sm:$0xff] }
  0x50   : > { %v1382_v27 = vpack.c.bf16 %v863_v26, %v862_v25 }
  0x52   : > { %1343 = vmatpush1.bf16.msra.mxu0 %v1342_v31  ;;  %v864_v31 = vld [vmem:[%s2107_s3 + $0x50] sm:$0xff] }
  0x53   : > { %1345 = vmatprep.subr.bf16.mxu0 %v1344_v32  ;;  %v865_v32 = vld [vmem:[%s2107_s3 + $0x58] sm:$0xff] }
  0x54   : > { %v1386_v33 = vpack.c.bf16 %v865_v32, %v864_v31 }
  0x56   : > { %1347 = vmatpush1.bf16.msra.mxu0 %v1346_v37  ;;  %v1388_v37 = vpack.c.bf16 %v883_v35, %v882_v34 }
  0x57   : > { %1349 = vmatprep.subr.bf16.mxu0 %v1348_v38  ;;  %v867_v38 = vld [vmem:[%s2107_s3 + $0x68] sm:$0xff] }
  0x58   : > { %v1390_v41 = vpack.c.bf16 %v867_v38, %v866_v36 }
  0x5a   : > { %1351 = vmatpush1.bf16.msra.mxu0 %v1350_v43  ;;  %v868_v43 = vld [vmem:[%s2107_s3 + $0x70] sm:$0xff] }
  0x5b   : > { %1353 = vmatprep.subr.bf16.mxu0 %v1352_v44  ;;  %v869_v44 = vld [vmem:[%s2107_s3 + $0x78] sm:$0xff] }
  0x5c   : > { %v1394_v45 = vpack.c.bf16 %v869_v44, %v868_v43 }
  0x5e   : > { %1355 = vmatpush1.bf16.msra.mxu0 %v1354_v49 }
  0x5f   : > { %1357 = vmatprep.subr.bf16.mxu0 %v1356_v50  ;;  %v796_v50 = vlaneseq }
  0x61   : > { %v797_v51 = vshrl.u32 %v796_v50, 7 }
  0x62   : > { %1359 = vmatpush1.bf16.msra.mxu0 %v1358_v55 }
  0x63   : > { %1361 = vmatprep.subr.bf16.mxu0 %v1360_v56  ;;  %v798_v52 = vsub.s32 0, %v797_v51  ;;  %v802_v54 = vsub.s32 1, %v797_v51 }
  0x65   : > { %v799_v55 = vrot.slane %v794_v53, %v798_v52  ;;  %v803_v57 = vrot.slane %v794_v53, %v802_v54 }
  0x66   : > { %1363 = vmatpush1.bf16.msra.mxu0 %v1362_v59 }
  0x69   : > { %778 = vmatmul.mubr.f32.vlgmr.msra.gmra.mrb[0].mxu0 %v678_v60 }
  0x6a   : > { %783 = vmatprep.mubr.f32.mxu0 %v1430_v7  ;;  %v1366_v7 = vpack.c.bf16 %v855_v2, %v854_v0 }
  0x6c   : > { %1367 = vmatpush3.bf16.msra.mxu1 %v1366_v7 }
  0x6d   : > { %784 = vmatmul.mubr.f32.gmra.mrb[2].mxu0 %v679_v61  ;;  %1369 = vmatprep.subr.bf16.mxu1 %v1368_v5 }
  0x70   : > { %1371 = vmatpush3.bf16.msra.mxu1 %v1370_v9 }
  0x71   : > { %1373 = vmatprep.subr.bf16.mxu1 %v1372_v12 }
  0x74   : > { %1375 = vmatpush3.bf16.msra.mxu1 %v1374_v15 }
  0x75   : > { %1377 = vmatprep.subr.bf16.mxu1 %v1376_v18 }
  0x78   : > { %1379 = vmatpush3.bf16.msra.mxu1 %v1378_v21 }
  0x79   : > { %1381 = vmatprep.subr.bf16.mxu1 %v1380_v24 }
  0x7c   : > { %1383 = vmatpush3.bf16.msra.mxu1 %v1382_v27 }
  0x7d   : > { %1385 = vmatprep.subr.bf16.mxu1 %v1384_v30 }
  0x80   : > { %1387 = vmatpush3.bf16.msra.mxu1 %v1386_v33 }
  0x81   : > { %1389 = vmatprep.subr.bf16.mxu1 %v1388_v37 }
  0x84   : > { %1391 = vmatpush3.bf16.msra.mxu1 %v1390_v41 }
  0x85   : > { %1393 = vmatprep.subr.bf16.mxu1 %v1392_v42 }
  0x88   : > { %1395 = vmatpush3.bf16.msra.mxu1 %v1394_v45 }
 0x11b   : > { %v435_v46 = vpop.f32.mrb[0].mxu1 }
 0x11c   : > { %v437_v47 = vpop.f32.mrb[1].mxu1 }
 0x11f   : > { %v441_v48 = vpop.f32.mrb[2].mxu1 }
 0x120   : > { %v443_v49 = vpop.f32.mrb[3].mxu1 }
 0x13c   : > { %v779_v56 = vpop.f32.mrb[0].mxu0 }
 0x13d   : > { %v1396_v58 = vadd.f32 %v779_v56, %v435_v46  ;;  %v781_v59 = vpop.f32.mrb[1].mxu0  ;;  %v1431_v46 = vmov (!%p1164_p4), 0.0  }
 0x13e   : > { %v1397_v60 = vadd.f32 %v781_v59, %v437_v47  ;;  %961 = vst.msk [vmem:[%s2109_s5] sm:$0x3] (!%p1164_p4), %vm960_vm2, %v1431_v46 }
 0x13f   : > { %v806_v61 = vadd.f32 %v1396_v58, %v799_v55 }
 0x140   : > { %v807_v62 = vadd.f32 %v1397_v60, %v803_v57  ;;  %v785_v63 = vpop.f32.mrb[2].mxu0 }
 0x141   : > { %810 = vst [vmem:[%s222_s20] sm:$0xff] %v806_v61  ;;  %v1398_v0 = vadd.f32 %v785_v63, %v441_v48  ;;  %v787_v1 = vpop.f32.mrb[3].mxu0  ;;  %v831_v6 = vmul.f32 %v806_v61, %v806_v61 }
 0x142   : > { %811 = vst [vmem:[%s222_s20 + $0x8] sm:$0xff] %v807_v62  ;;  %v1399_v2 = vadd.f32 %v787_v1, %v443_v49  ;;  %v832_v11 = vmul.f32 %v807_v62, %v807_v62 }
 0x143   : > { %v808_v7 = vadd.f32 %v1398_v0, %v799_v55 }
 0x144   : > { %v809_v3 = vadd.f32 %v1399_v2, %v803_v57 }
 0x145   : > { %812 = vst [vmem:[%s222_s20 + $0x10] sm:$0x3] %v808_v7  ;;  %v815_v4 = vsel %vm814_vm0, %v808_v7, 0.0  ;;  %v833_v5 = vmul.f32 %v808_v7, %v808_v7 }
 0x146   : > { %v816_v8 = vadd.f32 %v815_v4, %v806_v61  ;;  %813 = vst [vmem:[%s222_s20 + $0x18] sm:$0x3] %v809_v3  ;;  %v823_v9 = vsel %vm814_vm0, %v809_v3, 0.0  ;;  %v834_v10 = vmul.f32 %v809_v3, %v809_v3 }
 0x147   : > { %v835_v12 = vsel %vm814_vm0, %v833_v5, 0.0  ;;  %v824_v13 = vadd.f32 %v823_v9, %v807_v62 }
 0x148   : > { %v817_v14 = vrot.slane %v816_v8, 4  ;;  %v836_v15 = vadd.f32 %v835_v12, %v831_v6  ;;  %v843_v16 = vsel %vm814_vm0, %v834_v10, 0.0 }
 0x149   : > { %v825_v17 = vrot.slane %v824_v13, 4  ;;  %v844_v18 = vadd.f32 %v843_v16, %v832_v11 }
 0x14a   : > { %v818_v19 = vadd.f32 %v817_v14, %v816_v8  ;;  %v837_v20 = vrot.slane %v836_v15, 4 }
 0x14b   : > { %v826_v21 = vadd.f32 %v825_v17, %v824_v13  ;;  %v845_v22 = vrot.slane %v844_v18, 4 }
 0x14c   : > { %v819_v23 = vrot.slane %v818_v19, 2  ;;  %v838_v24 = vadd.f32 %v837_v20, %v836_v15 }
 0x14d   : > { %v827_v25 = vrot.slane %v826_v21, 2  ;;  %v846_v26 = vadd.f32 %v845_v22, %v844_v18 }
 0x14e   : > { %v820_v27 = vadd.f32 %v819_v23, %v818_v19  ;;  %v839_v28 = vrot.slane %v838_v24, 2 }
 0x14f   : > { %v828_v29 = vadd.f32 %v827_v25, %v826_v21  ;;  %v847_v30 = vrot.slane %v846_v26, 2 }
 0x150   : > { %v821_v31 = vrot.slane %v820_v27, 1  ;;  %v840_v32 = vadd.f32 %v839_v28, %v838_v24 }
 0x151   : > { %v829_v33 = vrot.slane %v828_v29, 1  ;;  %v848_v34 = vadd.f32 %v847_v30, %v846_v26 }
 0x152   : > { %v841_v35 = vrot.slane %v840_v32, 1  ;;  %v822_v37 = vadd.f32 %v821_v31, %v820_v27 }
 0x153   : > { %v849_v36 = vrot.slane %v848_v34, 1  ;;  %v830_v39 = vadd.f32 %v829_v33, %v828_v29 }
 0x154   : > { %v842_v38 = vadd.f32 %v841_v35, %v840_v32 }
 0x155   : > { %v850_v40 = vadd.f32 %v849_v36, %v848_v34 }
 0x156   : > { %v852_v41 = vsel %vm851_vm1, %v822_v37, %v842_v38 }
 0x157   : > { %v853_v42 = vsel %vm851_vm1, %v830_v39, %v850_v40 }
 0x158   : > { %950 = vmatprep.mubr.f32.mxu1 %v853_v42 }
 0x159   : > { %951 = vmatmul.mubr.f32.vlgmr.msra.gmra.mrb[4].mxu1 %v852_v41 }
 0x228   : > { %959 = sbr.rel (%p1164_p4) target bundleno = 559 (0x22f), region = 40 }
 0x22c   : > { %v1201_v43 = vpop.f32.mrb[4].mxu1 }
 0x22d   : > { %v1202_v44 = vpop.f32.mrb[5].mxu1 }
 0x22e   : > { %v1203_v45 = vadd.f32 %v1202_v44, %v1201_v43 }
 0x22f PF: > { %v962_v47 = vld [vmem:[%s2109_s5] sm:$0x3]  ;;  %vm964_vm3 = vcmask 123904  }
 0x230   : > { %v963_v48 = vadd.f32 %v1203_v45, %v962_v47 }
 0x232   : > { %965 = vst.msk [vmem:[%s2109_s5] sm:$0x3] %vm964_vm3, %v963_v48 }
 0x233 PF: > { %s16_s18 = sadd.s32 1, %s1428_s18  }
 0x234   : > { %p13_p5 = scmp.ge.s32.totalorder %s16_s18, 4  }
 0x236   :  { %15 = sbr.rel (!%p13_p5) target bundleno = 1 (0x1), region = 82 }

// kernel: lenet_bn_forward.7
= control target key start
LH: loop header
LB: loop body
LE: loop exit
PB: predicated region body
PF: predicated region fallthrough
CT: control target
= control target key end

     0   :  { %s1199_s21 = smov 0   ;;  %s1452_s0 = inlined_call_operand.vmem [shape: f32[2,10,256], index: 0, kind: input, shape index: {}]   ;;  %s1453_s1 = inlined_call_operand.vmem [shape: f32[2,16], index: 1, kind: input, shape index: {}]   ;;  %s1454_s2 = inlined_call_operand.vmem [shape: f32[16,256], index: 2, kind: input, shape index: {}]   ;;  %s1455_s3 = inlined_call_operand.vmem [shape: f32[2,256], index: 3, kind: input, shape index: {}]   ;;  %s1456_s4 = inlined_call_operand.vmem [shape: f32[2,256,128], index: 4, kind: input, shape index: {}]   ;;  %s1457_s5 = inlined_call_operand.vmem [shape: f32[2,5,10], index: 5, kind: input, shape index: {}]   ;;  %s1458_s6 = inlined_call_operand.vmem [shape: f32[2,5,128], index: 6, kind: output, shape index: {}]  }
   0x1 LB: > { %s909_s22 = sadd.s32 4294967295, %s1157_s21   ;;  %p913_p0 = scmp.ge.s32.totalorder %s1157_s21, 1  ;;  %s1157_s21 = sphi %s1199_s21, %s16_s21  }
   0x2   : > { %p212_p1 = scmp.lt.s32.totalorder %s1157_s21, 3 }
   0x4   : > { %p213_p2 = pnand %p913_p0, %p212_p1 }
   0x5   : > { %v259_v0 = vld [vmem:[%s1454_s2 + $0x8] sm:$0xff] (!%p213_p2)  ;;  %v261_v1 = vld [vmem:[%s1454_s2 + $0x18] sm:$0xff] (!%p213_p2)  ;;  %v258_v2 = vld [vmem:[%s1454_s2] sm:$0xff] (!%p213_p2)  ;;  %v1159_v5 = vmov (!%p213_p2), 0.0   ;;  %vm262_vm0 = vcmask (!%p213_p2), 130048   ;;  %p241_p3 = scmp.lt.s32.totalorder (!%p213_p2), %s909_s22, 1 }
   0x6   : > { %216 = sbr.rel (%p213_p2) target bundleno = 699 (0x2bb), region = 44  ;;  %v1056_v3 = vpack.c.bf16 (!%p213_p2), %v261_v1, %v259_v0  ;;  %v260_v4 = vld [vmem:[%s1454_s2 + $0x10] sm:$0xff] (!%p213_p2)  ;;  %404 = vmatprep.mubr.f32.mxu1 (!%p213_p2), %v1159_v5  ;;  %330 = vmatprep.mubr.f32.mxu0 (!%p213_p2), %v1159_v5  ;;  %v250_v6 = vld [vmem:[%s1453_s1] sm:$0x1] (!%p213_p2)  ;;  %v252_v7 = vld [vmem:[%s1453_s1 + $0x1] sm:$0x1] (!%p213_p2) }
   0x7   : > { %v1058_v8 = vpack.c.bf16 (!%p213_p2), %v260_v4, %v258_v2  ;;  %v251_v9 = vmul.f32 (!%p213_p2), 0.005, %v250_v6  ;;  %v253_v10 = vmul.f32 (!%p213_p2), 0.005, %v252_v7  ;;  %v499_v11 = vld [vmem:[%s1456_s4 + $0x80] sm:$0xff] (!%p213_p2)  ;;  %v500_v12 = vld [vmem:[%s1456_s4 + $0x88] sm:$0xff] (!%p213_p2) }
   0x8   : > { %1061 = vmatprep.subr.bf16.mxu1 (!%p213_p2), %v1056_v3  ;;  %1057 = vmatprep.subr.bf16.mxu0 (!%p213_p2), %v1056_v3  ;;  %v1064_v13 = vpack.c.bf16 (!%p213_p2), %v500_v12, %v499_v11  ;;  %v936_v14 = vld [vmem:[%s1456_s4 + $0x180] sm:$0xff] (!%p213_p2)  ;;  %v937_v15 = vld [vmem:[%s1456_s4 + $0x188] sm:$0xff] (!%p213_p2)  ;;  %v501_v21 = vld [vmem:[%s1456_s4 + $0x90] sm:$0xff] (!%p213_p2)  ;;  %vm1162_vm1 = vmmov (!%p213_p2), 0   ;;  %vm705_vm2 = vcmask (!%p213_p2), 1041408   ;;  %vm1163_vm3 = vmmov (!%p213_p2), 1  }
   0x9   : > { %v483_v16 = vld [vmem:[%s1456_s4] sm:$0xff] (!%p213_p2)  ;;  %1063 = vmatpush1.bf16.msra.mxu1 (!%p213_p2), %v1058_v8  ;;  %1059 = vmatpush1.bf16.msra.mxu0 (!%p213_p2), %v1058_v8  ;;  %v254_v17 = vmul.f32 (!%p213_p2), %v251_v9, %v251_v9  ;;  %v1096_v18 = vpack.c.bf16 (!%p213_p2), %v937_v15, %v936_v14  ;;  %v484_v19 = vld [vmem:[%s1456_s4 + $0x8] sm:$0xff] (!%p213_p2)  ;;  %v502_v22 = vld [vmem:[%s1456_s4 + $0x98] sm:$0xff] (!%p213_p2)  ;;  %vm701_vm5 = vcmask (!%p213_p2), 80896  }
   0xa   : > { %1065 = vmatprep.subr.bf16.mxu0 (!%p213_p2), %v1064_v13  ;;  %v1066_v20 = vpack.c.bf16 (!%p213_p2), %v484_v19, %v483_v16  ;;  %v1068_v24 = vpack.c.bf16 (!%p213_p2), %v502_v22, %v501_v21  ;;  %v485_v25 = vld [vmem:[%s1456_s4 + $0x10] sm:$0xff] (!%p213_p2)  ;;  %v486_v26 = vld [vmem:[%s1456_s4 + $0x18] sm:$0xff] (!%p213_p2)  ;;  %v503_v27 = vld [vmem:[%s1456_s4 + $0xa0] sm:$0xff] (!%p213_p2) }
   0xb   : > { %v255_v23 = vsub.f32 (!%p213_p2), %v253_v10, %v254_v17  ;;  %1097 = vmatprep.subr.bf16.mxu1 (!%p213_p2), %v1096_v18  ;;  %v1070_v29 = vpack.c.bf16 (!%p213_p2), %v486_v26, %v485_v25  ;;  %v504_v30 = vld [vmem:[%s1456_s4 + $0xa8] sm:$0xff] (!%p213_p2)  ;;  %v487_v32 = vld [vmem:[%s1456_s4 + $0x20] sm:$0xff] (!%p213_p2)  ;;  %v938_v37 = vld [vmem:[%s1456_s4 + $0x190] sm:$0xff] (!%p213_p2) }
   0xc   : > { %917 = vmatmul.mubr.msk.f32.vlgmr.msra.gmra.mrb[0].mxu0 (!%p213_p2), %vm262_vm0, %v251_v9  ;;  %v1072_v31 = vpack.c.bf16 (!%p213_p2), %v504_v30, %v503_v27  ;;  %v488_v33 = vld [vmem:[%s1456_s4 + $0x28] sm:$0xff] (!%p213_p2)  ;;  %v920_v35 = vld [vmem:[%s1456_s4 + $0x100] sm:$0xff] (!%p213_p2)  ;;  %v939_v38 = vld [vmem:[%s1456_s4 + $0x198] sm:$0xff] (!%p213_p2) }
   0xd   : > { %v256_v28 = vadd.f32 1e-05, %v255_v23  ;;  %1067 = vmatpush3.bf16.msra.mxu0 %v1066_v20  ;;  %v1074_v34 = vpack.c.bf16 %v488_v33, %v487_v32  ;;  %v921_v36 = vld [vmem:[%s1456_s4 + $0x108] sm:$0xff]  ;;  %v1100_v40 = vpack.c.bf16 %v939_v38, %v938_v37  ;;  %v922_v41 = vld [vmem:[%s1456_s4 + $0x110] sm:$0xff]  ;;  %v923_v42 = vld [vmem:[%s1456_s4 + $0x118] sm:$0xff]  ;;  %s1460_s22 = smov (!%p241_p3, %s909_s22), 1 }
   0xe   : > { %1069 = vmatprep.subr.bf16.mxu0 %v1068_v24  ;;  %v1098_v39 = vpack.c.bf16 %v921_v36, %v920_v35  ;;  %v940_v44 = vld [vmem:[%s1456_s4 + $0x1a0] sm:$0xff]  ;;  %v941_v45 = vld [vmem:[%s1456_s4 + $0x1a8] sm:$0xff]  ;;  %v1102_v46 = vpack.c.bf16 %v923_v42, %v922_v41  ;;  %v505_v51 = vld [vmem:[%s1456_s4 + $0xb0] sm:$0xff]  ;;  %s959_s9 = sshll.u32 %s1460_s22, 5  ;;  %s916_s19 = sshll.u32 %s1460_s22, 3 }
   0xf   : > { %1149 = vrsqrt.f32 %v256_v28  ;;  %v1104_v47 = vpack.c.bf16 %v941_v45, %v940_v44  ;;  %v924_v48 = vld [vmem:[%s1456_s4 + $0x120] sm:$0xff]  ;;  %v925_v49 = vld [vmem:[%s1456_s4 + $0x128] sm:$0xff]  ;;  %v506_v52 = vld [vmem:[%s1456_s4 + $0xb8] sm:$0xff]  ;;  %s245_s12 = scalar_lea.vmem %s1452_s0, %s959_s9  ;;  %s249_s24 = scalar_lea.vmem %s1458_s6, %s916_s19 }
  0x10   : > { %v1106_v50 = vpack.c.bf16 %v925_v49, %v924_v48  ;;  %v1076_v53 = vpack.c.bf16 %v506_v52, %v505_v51  ;;  %v942_v54 = vld [vmem:[%s1456_s4 + $0x1b0] sm:$0xff]  ;;  %v943_v55 = vld [vmem:[%s1456_s4 + $0x1b8] sm:$0xff]  ;;  %v507_v63 = vld [vmem:[%s1456_s4 + $0xc0] sm:$0xff]  ;;  %v413_v48 = vlaneseq }
  0x11   : > { %1071 = vmatpush3.bf16.msra.mxu0 %v1070_v29  ;;  %v489_v56 = vld [vmem:[%s1456_s4 + $0x30] sm:$0xff]  ;;  %v1108_v57 = vpack.c.bf16 %v943_v55, %v942_v54  ;;  %v490_v58 = vld [vmem:[%s1456_s4 + $0x38] sm:$0xff]  ;;  %v508_v0 = vld [vmem:[%s1456_s4 + $0xc8] sm:$0xff]  ;;  %v1160_v55 = vmov 1966171168  }
  0x12   : > { %1073 = vmatprep.subr.bf16.mxu0 %v1072_v31  ;;  %v926_v59 = vld [vmem:[%s1456_s4 + $0x130] sm:$0xff]  ;;  %v927_v60 = vld [vmem:[%s1456_s4 + $0x138] sm:$0xff]  ;;  %v1078_v61 = vpack.c.bf16 %v490_v58, %v489_v56  ;;  %v944_v1 = vld [vmem:[%s1456_s4 + $0x1c0] sm:$0xff]  ;;  %v1080_v2 = vpack.c.bf16 %v508_v0, %v507_v63  ;;  %v414_v51 = vshrl.u32 %v413_v48, 7  ;;  %v433_v56 = vunpack.c.l.s4 %v1160_v55 }
  0x13   : > { %v1110_v62 = vpack.c.bf16 %v927_v60, %v926_v59  ;;  %v945_v3 = vld [vmem:[%s1456_s4 + $0x1c8] sm:$0xff]  ;;  %v491_v4 = vld [vmem:[%s1456_s4 + $0x40] sm:$0xff]  ;;  %v509_v12 = vld [vmem:[%s1456_s4 + $0xd0] sm:$0xff] }
  0x14   : > { %v492_v6 = vld [vmem:[%s1456_s4 + $0x48] sm:$0xff]  ;;  %v1112_v7 = vpack.c.bf16 %v945_v3, %v944_v1  ;;  %v928_v9 = vld [vmem:[%s1456_s4 + $0x140] sm:$0xff]  ;;  %v510_v13 = vld [vmem:[%s1456_s4 + $0xd8] sm:$0xff]  ;;  %v415_v52 = vsub.s32 0, %v414_v51  ;;  %v419_v54 = vsub.s32 1, %v414_v51  ;;  %v434_v60 = vunpack.c.0.s8 %v433_v56 }
  0x15   : > { %1075 = vmatpush3.bf16.msra.mxu0 %v1074_v34  ;;  %v1082_v8 = vpack.c.bf16 %v492_v6, %v491_v4  ;;  %v929_v10 = vld [vmem:[%s1456_s4 + $0x148] sm:$0xff]  ;;  %v946_v14 = vld [vmem:[%s1456_s4 + $0x1d0] sm:$0xff]  ;;  %v1084_v15 = vpack.c.bf16 %v510_v13, %v509_v12  ;;  %v947_v16 = vld [vmem:[%s1456_s4 + $0x1d8] sm:$0xff] }
  0x16   : > { %1077 = vmatprep.subr.bf16.mxu0 %v1076_v53  ;;  %v1114_v11 = vpack.c.bf16 %v929_v10, %v928_v9  ;;  %v493_v17 = vld [vmem:[%s1456_s4 + $0x50] sm:$0xff]  ;;  %v494_v18 = vld [vmem:[%s1456_s4 + $0x58] sm:$0xff]  ;;  %v1116_v19 = vpack.c.bf16 %v947_v16, %v946_v14  ;;  %v511_v24 = vld [vmem:[%s1456_s4 + $0xe0] sm:$0xff] }
  0x17   : > { %v1086_v20 = vpack.c.bf16 %v494_v18, %v493_v17  ;;  %v930_v21 = vld [vmem:[%s1456_s4 + $0x150] sm:$0xff]  ;;  %v931_v22 = vld [vmem:[%s1456_s4 + $0x158] sm:$0xff]  ;;  %v512_v25 = vld [vmem:[%s1456_s4 + $0xe8] sm:$0xff] }
  0x18   : > { %v1118_v23 = vpack.c.bf16 %v931_v22, %v930_v21  ;;  %v948_v26 = vld [vmem:[%s1456_s4 + $0x1e0] sm:$0xff]  ;;  %v1088_v27 = vpack.c.bf16 %v512_v25, %v511_v24  ;;  %v949_v28 = vld [vmem:[%s1456_s4 + $0x1e8] sm:$0xff]  ;;  %v513_v35 = vld [vmem:[%s1456_s4 + $0xf0] sm:$0xff] }
  0x19   : > { %v1150_v43 = vpop.eup %1149  ;;  %1079 = vmatpush3.bf16.msra.mxu0 %v1078_v61  ;;  %v495_v29 = vld [vmem:[%s1456_s4 + $0x60] sm:$0xff]  ;;  %v496_v30 = vld [vmem:[%s1456_s4 + $0x68] sm:$0xff]  ;;  %v1120_v31 = vpack.c.bf16 %v949_v28, %v948_v26  ;;  %v514_v37 = vld [vmem:[%s1456_s4 + $0xf8] sm:$0xff] }
  0x1a   : > { %918 = vmatmul.mubr.msk.f32.vlgmr.msra.gmra.mrb[0].mxu1 %vm262_vm0, %v1150_v43  ;;  %1081 = vmatprep.subr.bf16.mxu0 %v1080_v2  ;;  %v1090_v32 = vpack.c.bf16 %v496_v30, %v495_v29  ;;  %v932_v33 = vld [vmem:[%s1456_s4 + $0x160] sm:$0xff]  ;;  %v933_v34 = vld [vmem:[%s1456_s4 + $0x168] sm:$0xff]  ;;  %v950_v38 = vld [vmem:[%s1456_s4 + $0x1f0] sm:$0xff]  ;;  %v437_v2 = vsub.s32 %v434_v60, %v414_v51  ;;  %v1161_v29 = vmov 0.0|0.0  }
  0x1b   : > { %1099 = vmatpush3.bf16.msra.mxu1 %v1098_v39  ;;  %v1122_v36 = vpack.c.bf16 %v933_v34, %v932_v33  ;;  %v951_v39 = vld [vmem:[%s1456_s4 + $0x1f8] sm:$0xff]  ;;  %v497_v42 = vld [vmem:[%s1456_s4 + $0x70] sm:$0xff]  ;;  %v411_v53 = vld [vmem:[%s1455_s3] ss:$2 sm:$0x3] }
  0x1c   : > { %1101 = vmatprep.subr.bf16.mxu1 %v1100_v40  ;;  %v1092_v40 = vpack.c.bf16 %v514_v37, %v513_v35  ;;  %v1124_v41 = vpack.c.bf16 %v951_v39, %v950_v38  ;;  %v498_v43 = vld [vmem:[%s1456_s4 + $0x78] sm:$0xff]  ;;  %v934_v44 = vld [vmem:[%s1456_s4 + $0x170] sm:$0xff]  ;;  %v420_v58 = vrot.slane %v411_v53, %v419_v54  ;;  %v449_v12 = vld [vmem:[%s245_s12 + $0x8] sm:$0xff] }
  0x1d   : > { %1083 = vmatpush3.bf16.msra.mxu0 %v1082_v8  ;;  %v1094_v45 = vpack.c.bf16 %v498_v43, %v497_v42  ;;  %v448_v8 = vld [vmem:[%s245_s12] sm:$0xff]  ;;  %v450_v9 = vld [vmem:[%s245_s12 + $0x10] sm:$0x3]  ;;  %v451_v13 = vld [vmem:[%s245_s12 + $0x18] sm:$0x3] }
  0x1e   : > { %1085 = vmatprep.subr.bf16.mxu0 %v1084_v15  ;;  %vm1130_vm4 = vmpackc.low %vm705_vm2, %vm1163_vm3 }
  0x1f   : > { %1103 = vmatpush3.bf16.msra.mxu1 %v1102_v46  ;;  %v935_v46 = vld [vmem:[%s1456_s4 + $0x178] sm:$0xff] }
  0x20   : > { %1105 = vmatprep.subr.bf16.mxu1 %v1104_v47  ;;  %v1126_v47 = vpack.c.bf16 %v935_v46, %v934_v44 }
  0x21   : > { %1087 = vmatpush3.bf16.msra.mxu0 %v1086_v20 }
  0x22   : > { %1089 = vmatprep.subr.bf16.mxu0 %v1088_v27 }
  0x23   : > { %1107 = vmatpush3.bf16.msra.mxu1 %v1106_v50 }
  0x24   : > { %1109 = vmatprep.subr.bf16.mxu1 %v1108_v57  ;;  %v416_v57 = vrot.slane %v411_v53, %v415_v52 }
  0x25   : > { %1091 = vmatpush3.bf16.msra.mxu0 %v1090_v32 }
  0x26   : > { %1093 = vmatprep.subr.bf16.mxu0 %v1092_v40 }
  0x27   : > { %1111 = vmatpush3.bf16.msra.mxu1 %v1110_v62 }
  0x28   : > { %1113 = vmatprep.subr.bf16.mxu1 %v1112_v7  ;;  %v919_v7 = vld [vmem:[%s1455_s3 + $0x1] ss:$2 sm:$0x3] }
  0x29   : > { %1095 = vmatpush3.bf16.msra.mxu0 %v1094_v45  ;;  %v954_v45 = vld [vmem:[%s1457_s5 + $0x8] sm:$0x1f] }
  0x2a   : > { %1128 = vmatprep.subr.bf16.mxu0 %v1161_v29 }
  0x2b   : > { %1115 = vmatpush3.bf16.msra.mxu1 %v1114_v11 }
  0x2c   : > { %1117 = vmatprep.subr.bf16.mxu1 %v1116_v19 }
  0x2f   : > { %1119 = vmatpush3.bf16.msra.mxu1 %v1118_v23 }
  0x30   : > { %1121 = vmatprep.subr.bf16.mxu1 %v1120_v31 }
  0x33   : > { %1123 = vmatpush3.bf16.msra.mxu1 %v1122_v36 }
  0x34   : > { %1125 = vmatprep.subr.bf16.mxu1 %v1124_v41 }
  0x37   : > { %1127 = vmatpush3.bf16.msra.mxu1 %v1126_v47 }
  0x38   : > { %1132 = vmatprep.subr.bf16.mxu1 %v1161_v29 }
  0xdf   : > { %v332_v49 = vpop.f32.mrb[0].mxu0 }
  0xe0   : > { %v334_v50 = vpop.f32.mrb[1].mxu0 }
  0xed   : > { %v406_v59 = vpop.f32.mrb[0].mxu1 }
  0xee   : > { %v423_v61 = vmul.f32 %v416_v57, %v406_v59  ;;  %v408_v62 = vpop.f32.mrb[1].mxu1 }
  0xef   : > { %v424_v63 = vmul.f32 %v420_v58, %v408_v62 }
  0xf0   : > { %v427_v0 = vmul.f32 %v423_v61, %v332_v49  ;;  %v455_v6 = vrot.slane %v423_v61, %v415_v52 }
  0xf1   : > { %v428_v1 = vmul.f32 %v424_v63, %v334_v50  ;;  %v459_v10 = vrot.slane %v424_v63, %v415_v52 }
  0xf2   : > { %v460_v15 = vmul.f32 %v455_v6, %v448_v8  ;;  %v462_v16 = vmul.f32 %v455_v6, %v450_v9 }
  0xf3   : > { %v431_v3 = vcombine.low %v427_v0, %v428_v1  ;;  %v461_v17 = vmul.f32 %v459_v10, %v449_v12  ;;  %v463_v18 = vmul.f32 %v459_v10, %v451_v13 }
  0xf5   : > { %v438_v4 = vrot.slane %v431_v3, %v437_v2 }
  0xf7   : > { %v445_v11 = vrot.slane %v438_v4, %v437_v2 }
  0xf9   : > { %v447_v14 = vsub.f32 %v919_v7, %v445_v11 }
  0xfb   : > { %v472_v19 = vrot.slane %v447_v14, %v419_v54  ;;  %v468_v20 = vrot.slane %v447_v14, %v415_v52 }
  0xfd   : > { %v476_v21 = vadd.f32 %v472_v19, %v461_v17  ;;  %v475_v22 = vadd.f32 %v468_v20, %v460_v15  ;;  %v478_v23 = vadd.f32 %v472_v19, %v463_v18  ;;  %v477_v24 = vadd.f32 %v468_v20, %v462_v16 }
  0xff   : > { %v480_v25 = vmax.f32 %v476_v21, 0.0  ;;  %v479_v26 = vmax.f32 %v475_v22, 0.0  ;;  %v482_v27 = vmax.f32 %v478_v23, 0.0  ;;  %v481_v28 = vmax.f32 %v477_v24, 0.0 }
 0x101   : > { %579 = vmatprep.mubr.f32.mxu0 %v480_v25  ;;  %687 = vmatprep.mubr.f32.mxu1 %v480_v25 }
 0x102   : > { %580 = vmatmul.mubr.f32.vlgmr.msra.gmra.mrb[2].mxu0 %v479_v26  ;;  %688 = vmatmul.mubr.f32.vlgmr.msra.gmra.mrb[2].mxu1 %v479_v26 }
 0x103   : > { %584 = vmatprep.mubr.f32.mxu0 %v482_v27  ;;  %692 = vmatprep.mubr.f32.mxu1 %v482_v27 }
 0x106   : > { %585 = vmatmul.mubr.f32.gmra.mrb[4].mxu0 %v481_v28  ;;  %693 = vmatmul.mubr.f32.gmra.mrb[4].mxu1 %v481_v28 }
 0x107   : > { %1046 = vmatprep.mubr.msk.f32.mxu0 %vm1162_vm1, %v1159_v5  ;;  %1053 = vmatprep.mubr.msk.f32.mxu1 %vm1162_vm1, %v1159_v5  ;;  %v700_v5 = vld [vmem:[%s1457_s5] sm:$0x1f] }
 0x1d5   : > { %v992_v30 = vpop.f32.mrb[2].mxu0  ;;  %v1030_v31 = vpop.f32.mrb[2].mxu1 }
 0x1d6   : > { %v993_v32 = vpop.f32.mrb[3].mxu0  ;;  %v1031_v33 = vpop.f32.mrb[3].mxu1 }
 0x1d7   : > { %v994_v34 = vadd.f32 %v993_v32, %v992_v30  ;;  %v1032_v35 = vadd.f32 %v1031_v33, %v1030_v31 }
 0x1d9   : > { %v698_v36 = vmax.f32 %v994_v34, %v1032_v35  ;;  %v995_v37 = vpop.f32.mrb[4].mxu0  ;;  %v1033_v38 = vpop.f32.mrb[4].mxu1 }
 0x1da   : > { %v996_v39 = vpop.f32.mrb[5].mxu0  ;;  %v1034_v40 = vpop.f32.mrb[5].mxu1 }
 0x1db   : > { %v997_v41 = vadd.f32 %v996_v39, %v995_v37  ;;  %v1035_v42 = vadd.f32 %v1034_v40, %v1033_v38 }
 0x1dd   : > { %v699_v43 = vmax.f32 %v997_v41, %v1035_v42 }
 0x1df   : > { %v1129_v44 = vpack.c.bf16 %v699_v43, %v698_v36 }
 0x1e1   : > { %1131 = vmatpush3.bf16.msk.msra.mxu0 %vm1130_vm4, %v1129_v44  ;;  %1135 = vmatpush3.bf16.msk.msra.mxu1 %vm1130_vm4, %v1129_v44 }
 0x1e4   : > { %1047 = vmatmul.mubr.msk.f32.vlgmr.msra.gmra.mrb[6].mxu0 %vm701_vm5, %v700_v5  ;;  %1054 = vmatmul.mubr.msk.f32.vlgmr.msra.gmra.mrb[6].mxu1 %vm701_vm5, %v954_v45 }
 0x2b7   : > { %v775_v46 = vpop.f32.mrb[6].mxu0  ;;  %v850_v47 = vpop.f32.mrb[6].mxu1 }
 0x2b8   : > { %v854_v48 = vmax.f32 %v775_v46, %v850_v47  ;;  %v1048_v49 = vpop.f32.mrb[7].mxu0  ;;  %v1055_v50 = vpop.f32.mrb[7].mxu1 }
 0x2ba   : > { %855 = vst [vmem:[%s249_s24] sm:$0x1f] %v854_v48 }
 0x2bb PF: > { %s16_s21 = sadd.s32 1, %s1157_s21  }
 0x2bc   : > { %p13_p4 = scmp.ge.s32.totalorder %s16_s21, 4  }
 0x2be   :  { %15 = sbr.rel (!%p13_p4) target bundleno = 1 (0x1), region = 77 }

</bundles_post_ra>
